<compile_context>
chip_gen: v6e
topology: v6e:2x2x1
jax: 0.10.0
libtpu: 0.0.40
codegen_flags: <defaults>
</compile_context>

<pallas_src>
import jax
import jax.numpy as jnp
from jax import lax
from jax.experimental import pallas as pl
from jax.experimental.pallas import tpu as pltpu


class CenterROIHeadsPallas:
    """Inference path of CenterROIHeads (mask head + maskiou head), fully fused."""

    def __init__(self, key, *, in_channels=8, conv_dim=8, num_conv=2,
                 num_classes=4, pooler_resolution=8, fc_dim=128,
                 feature_stride=8):
        self.C = in_channels
        self.D = conv_dim
        self.num_conv = num_conv
        self.K = num_classes
        self.P = pooler_resolution
        self.F = fc_dim
        self.scale = 1.0 / feature_stride

        keys = iter(jax.random.split(key, 32))

        def init(shape, s=0.1):
            return s * jax.random.normal(next(keys), shape, jnp.float32)

        P, C, D, K, F = self.P, self.C, self.D, self.K, self.F
        bf = jnp.bfloat16

        # ---- mask head: num_conv x (conv3x3 s1 p1 + relu), weights [9, cin, cout]
        self.mask_convs = []
        cin = C
        for _ in range(num_conv):
            self.mask_convs.append((init((9, cin, D)).astype(bf),
                                    jnp.zeros((1, D), jnp.float32)))
            cin = D
        # deconv 2x2 stride2 + relu, taps [4, cin, cout]
        self.dec_w = init((4, D, D)).astype(bf)
        self.dec_b = jnp.zeros((1, D), jnp.float32)
        # 1x1 class predictor (sigmoid fused at inference == mask_rcnn_inference)
        self.pred_w = init((D, K))                     # tiny, kept f32
        self.pred_b = jnp.zeros((1, K), jnp.float32)

        # ---- maskiou head
        self.mi_w1 = init((9, C + 1, D)).astype(bf)    # conv3x3 s1 on concat(feat, maxpool(mask))
        self.mi_b1 = jnp.zeros((1, D), jnp.float32)
        self.mi_w2 = init((9, D, D)).astype(bf)        # conv3x3 s2 (subsample folded into fc1)
        self.mi_b2 = jnp.zeros((1, D), jnp.float32)
        hp = P // 2
        # logical fc1 weight over the NCHW-flattened [D, P/2, P/2] map (PyTorch .view order),
        # expanded so that the stride-2 spatial subsample is absorbed into zero rows.
        w1 = init((D, hp, hp, F))
        w1_full = jnp.zeros((D, P, P, F), jnp.float32)
        w1_full = w1_full.at[:, ::2, ::2, :].set(w1)
        self.fc1_w = jnp.transpose(w1_full.reshape(D, P * P, F),
                                   (0, 2, 1)).astype(bf)       # [D, F, P*P]
        self.fc1_b = jnp.zeros((F, 1), jnp.float32)
        self.fc2_w = init((F, F)).astype(bf)                   # [out, in]
        self.fc2_b = jnp.zeros((F, 1), jnp.float32)
        self.fc3_w = init((K, F)).astype(bf)                   # [out, in]
        self.fc3_b = jnp.zeros((K, 1), jnp.float32)

    # ------------------------------------------------------------------ kernel
    def _kernel(self, *refs):
        P, C, D, K, F = self.P, self.C, self.D, self.K, self.F
        PP = P * P
        nc = self.num_conv
        bf = jnp.bfloat16

        it = iter(refs)
        bidx_ref = next(it)          # scalar prefetch (unused in body, used in index_map)
        cls_ref = next(it)           # scalar prefetch: per-ROI class id
        feat_ref = next(it)          # [1, H*W, C] block, image chosen by bidx
        mk_ref = next(it)            # [1, P*P, H*W] bilinear interp matrix
        mc = [(next(it), next(it)) for _ in range(nc)]
        dec_w_ref = next(it); dec_b_ref = next(it)
        pred_w_ref = next(it); pred_b_ref = next(it)
        mi_w1_ref = next(it); mi_b1_ref = next(it)
        mi_w2_ref = next(it); mi_b2_ref = next(it)
        fc1_w_ref = next(it); fc1_b_ref = next(it)
        fc2_w_ref = next(it); fc2_b_ref = next(it)
        fc3_w_ref = next(it); fc3_b_ref = next(it)
        pooled_out_ref = next(it); mask_out_ref = next(it); miou_out_ref = next(it)
        pad_ref = next(it)           # VMEM scratch [(P+2), (P+2), Cpad] (zero-padded conv tile)

        del bidx_ref
        r = pl.program_id(0)
        cls = cls_ref[r]

        # zero the padded scratch each step (borders must read as zeros; safe under megacore)
        pad_ref[...] = jnp.zeros(pad_ref.shape, pad_ref.dtype)

        def write_pad(x_sp, cin, off=0):
            # x_sp: [P*P, cin] value, spatial-major -> padded interior of the scratch tile
            pad_ref[1:P + 1, 1:P + 1, off:off + cin] = x_sp.reshape(P, P, cin)

        def conv3x3_relu(cin, cout, w_ref, b_ref):
            # 3x3 / stride 1 / pad 1 as 9 accumulated dots on shifted views of pad_ref.
            acc = jnp.zeros((PP, cout), jnp.float32)
            for t in range(9):
                dy, dx = t // 3, t % 3
                sh = pad_ref[dy:dy + P, dx:dx + P, 0:cin].reshape(PP, cin)
                acc = acc + jnp.dot(sh.astype(bf), w_ref[t],
                                    preferred_element_type=jnp.float32)
            return jnp.maximum(acc + b_ref[...], 0.0)

        # ---- ROIAlign: one interpolation matmul (bilinear, aligned=True convention) ----
        feat = feat_ref[0]                                            # [H*W, C]
        pooled = jnp.dot(mk_ref[0], feat,
                         preferred_element_type=jnp.float32)          # [P*P, C]
        pooled_out_ref[...] = pooled.reshape(1, PP, C)

        # ---- mask head: conv3x3+relu stack ----
        x = pooled
        cin = C
        for w_ref, b_ref in mc:
            write_pad(x, cin)
            x = conv3x3_relu(cin, D, w_ref, b_ref)
            cin = D

        # ---- deconv2x2/s2 + relu, fused 1x1 predictor + sigmoid + class selection ----
        onehot_row = (lax.broadcasted_iota(jnp.int32, (1, K), 1) == cls
                      ).astype(jnp.float32)                           # [1, K]
        onehot_col = (lax.broadcasted_iota(jnp.int32, (K, 1), 0) == cls
                      ).astype(jnp.float32)                           # [K, 1]
        w_sel = jnp.dot(pred_w_ref[...], onehot_col)                  # [D, 1]
        b_sel = jnp.sum(pred_b_ref[...] * onehot_row)                 # scalar

        x_bf = x.astype(bf)
        mask_pool = jnp.zeros((PP, 1), jnp.float32)                   # maxpool2x2 accumulator
        for t in range(4):
            dy, dx = t // 2, t % 2
            sub = jnp.dot(x_bf, dec_w_ref[t],
                          preferred_element_type=jnp.float32)         # deconv sub-grid
            sub = jnp.maximum(sub + dec_b_ref[...], 0.0)              # [P*P, D]
            m = jax.nn.sigmoid(jnp.dot(sub, w_sel) + b_sel)           # [P*P, 1]
            # write interleaved: out[2y+dy, 2x+dx] = m[y*P+x]
            mask_out_ref[0, :, dy, :, dx:dx + 1] = m.reshape(P, P, 1)
            mask_pool = jnp.maximum(mask_pool, m)

        # ---- maskiou head: concat(pooled feats, maxpool(mask)) via the pad scratch ----
        write_pad(pooled, C, 0)
        write_pad(mask_pool, 1, C)
        x1 = conv3x3_relu(C + 1, D, mi_w1_ref, mi_b1_ref)             # [P*P, D]
        write_pad(x1, D)
        x2 = conv3x3_relu(D, D, mi_w2_ref, mi_b2_ref)                 # [P*P, D]
        # stride-2 subsample of x2 is absorbed into the expanded fc1 weights.

        h = fc1_b_ref[...]                                            # [F, 1]
        for c in range(D):
            col = x2[:, c:c + 1].astype(bf)                           # [P*P, 1]
            h = h + jnp.dot(fc1_w_ref[c], col,
                            preferred_element_type=jnp.float32)
        h = jnp.maximum(h, 0.0)
        h = jnp.maximum(jnp.dot(fc2_w_ref[...], h.astype(bf),
                                preferred_element_type=jnp.float32)
                        + fc2_b_ref[...], 0.0)
        miou = jnp.dot(fc3_w_ref[...], h.astype(bf),
                       preferred_element_type=jnp.float32) + fc3_b_ref[...]   # [K, 1]
        # mask_iou_inference: keep only the predicted class's iou
        miou_out_ref[...] = jnp.dot(onehot_row, miou).reshape(1, 1, 1)

    # ---------------------------------------------------------------- wrapper
    def _interp_matrix(self, boxes, H, W):
        """[R, P*P, H*W] bilinear interpolation matrices (no gathers)."""
        P = self.P
        b = boxes * self.scale - 0.5          # aligned=True convention
        x1, y1, x2, y2 = b[:, 0], b[:, 1], b[:, 2], b[:, 3]
        grid = jnp.arange(P, dtype=jnp.float32) + 0.5
        gx = x1[:, None] + grid[None, :] * ((x2 - x1) / P)[:, None]   # [R, P]
        gy = y1[:, None] + grid[None, :] * ((y2 - y1) / P)[:, None]   # [R, P]

        def lin(g, size):
            g = jnp.clip(g, 0.0, size - 1.0)
            g0 = jnp.floor(g)
            frac = g - g0
            g1 = jnp.minimum(g0 + 1.0, size - 1.0)
            idx = jnp.arange(size, dtype=jnp.float32)
            return ((idx[None, None, :] == g0[..., None]) * (1.0 - frac[..., None])
                    + (idx[None, None, :] == g1[..., None]) * frac[..., None])

        my = lin(gy, H)                                               # [R, P, H]
        mx = lin(gx, W)                                               # [R, P, W]
        mk = my[:, :, None, :, None] * mx[:, None, :, None, :]        # [R,P,P,H,W]
        return mk.reshape(boxes.shape[0], P * P, H * W)

    def _run_heads(self, feat_sp, mk, batch_idx, classes):
        P, C = self.P, self.C
        PP = P * P
        N, HW, _ = feat_sp.shape
        R = mk.shape[0]
        Cpad = max(C + 1, self.D)

        def const_map(nd):
            return lambda r, *_: (0,) * nd

        weights = []
        for w, b in self.mask_convs:
            weights += [w, b]
        weights += [self.dec_w, self.dec_b, self.pred_w, self.pred_b,
                    self.mi_w1, self.mi_b1, self.mi_w2, self.mi_b2,
                    self.fc1_w, self.fc1_b, self.fc2_w, self.fc2_b,
                    self.fc3_w, self.fc3_b]
        w_specs = [pl.BlockSpec(w.shape, const_map(w.ndim)) for w in weights]

        grid_spec = pltpu.PrefetchScalarGridSpec(
            num_scalar_prefetch=2,               # batch_idx, classes (SMEM)
            grid=(R,),
            in_specs=[
                # per-ROI image chosen via the scalar-prefetched batch index
                pl.BlockSpec((1, HW, C), lambda r, bi, cl: (bi[r], 0, 0)),
                pl.BlockSpec((1, PP, HW), lambda r, bi, cl: (r, 0, 0)),
                *w_specs,
            ],
            out_specs=[
                pl.BlockSpec((1, PP, C), lambda r, bi, cl: (r, 0, 0)),
                pl.BlockSpec((1, P, 2, P, 2), lambda r, bi, cl: (r, 0, 0, 0, 0)),
                pl.BlockSpec((1, 1, 1), lambda r, bi, cl: (r, 0, 0)),
            ],
            scratch_shapes=[pltpu.VMEM((P + 2, P + 2, Cpad), jnp.float32)],
        )
        out_shape = (
            jax.ShapeDtypeStruct((R, PP, C), jnp.float32),     # pooled ROI features
            jax.ShapeDtypeStruct((R, P, 2, P, 2), jnp.float32),  # interleaved mask
            jax.ShapeDtypeStruct((R, 1, 1), jnp.float32),      # selected maskiou
        )
        fn = pl.pallas_call(
            self._kernel,
            grid_spec=grid_spec,
            out_shape=out_shape,
            compiler_params=pltpu.CompilerParams(
                dimension_semantics=("parallel",)),
        )
        return fn(batch_idx, classes, feat_sp, mk, *weights)

    def forward(self, features_nchw, instances):
        # inference branch of CenterROIHeads.forward (== forward_with_given_boxes)
        N, C, H, W = features_nchw.shape
        assert C == self.C
        P = self.P
        feat_sp = jnp.transpose(features_nchw, (0, 2, 3, 1)).reshape(N, H * W, C)

        boxes = jnp.concatenate([i["pred_boxes"] for i in instances], 0)
        classes = jnp.concatenate([i["pred_classes"] for i in instances],
                                  0).astype(jnp.int32)
        scores = jnp.concatenate([i["scores"] for i in instances], 0)
        counts = [int(i["pred_boxes"].shape[0]) for i in instances]
        batch_idx = jnp.concatenate(
            [jnp.full((c,), i, jnp.int32) for i, c in enumerate(counts)])
        R = int(boxes.shape[0])

        mk = self._interp_matrix(boxes, H, W)
        pooled_sp, mask5, miou_sel = self._run_heads(feat_sp, mk, batch_idx, classes)

        mask_features = jnp.transpose(pooled_sp.reshape(R, P, P, C),
                                      (0, 3, 1, 2))                  # NCHW [R,C,P,P]
        pred_masks = mask5.reshape(R, 1, 2 * P, 2 * P)               # sigmoid probs
        new_scores = scores * miou_sel[:, 0, 0]                      # mask_iou_inference

        out, start = [], 0
        for i, c in enumerate(counts):
            out.append(dict(
                pred_boxes=instances[i]["pred_boxes"],
                pred_classes=instances[i]["pred_classes"],
                scores=new_scores[start:start + c],
                pred_masks=pred_masks[start:start + c],
                mask_features=mask_features[start:start + c],
            ))
            start += c
        return out, {}


if __name__ == "__main__":
    key = jax.random.PRNGKey(0)
    k_feat, k_box, k_cls, k_score, k_param = jax.random.split(key, 5)

    N, C, H, W = 2, 8, 16, 16          # feature map (single FPN level "p3")
    stride = 8                          # image size 128x128
    num_classes = 4
    rois_per_image = 3
    pooler_resolution = 8

    features = {"p3": jax.random.normal(k_feat, (N, C, H, W), jnp.float32)}

    instances = []
    kb = jax.random.split(k_box, N)
    kc = jax.random.split(k_cls, N)
    ks = jax.random.split(k_score, N)
    for i in range(N):
        xy = jax.random.uniform(kb[i], (rois_per_image, 2), minval=0.0,
                                maxval=90.0)
        wh = jax.random.uniform(jax.random.fold_in(kb[i], 1),
                                (rois_per_image, 2), minval=10.0, maxval=36.0)
        boxes = jnp.concatenate([xy, xy + wh], axis=-1)  # xyxy in image coords
        instances.append(dict(
            pred_boxes=boxes,
            pred_classes=jax.random.randint(kc[i], (rois_per_image,), 0,
                                            num_classes),
            scores=jax.random.uniform(ks[i], (rois_per_image,),
                                      dtype=jnp.float32),
        ))

    head = CenterROIHeadsPallas(
        k_param, in_channels=C, conv_dim=8, num_conv=2,
        num_classes=num_classes, pooler_resolution=pooler_resolution,
        fc_dim=128, feature_stride=stride)

    results, losses = head.forward(features["p3"], instances)
    for r in results:
        jax.block_until_ready(r["pred_masks"])
        jax.block_until_ready(r["scores"])

    assert results[0]["pred_masks"].shape == (rois_per_image, 1,
                                              2 * pooler_resolution,
                                              2 * pooler_resolution)
    assert results[0]["scores"].shape == (rois_per_image,)
    assert results[0]["mask_features"].shape == (rois_per_image, C,
                                                 pooler_resolution,
                                                 pooler_resolution)
    assert losses == {}
    print("KERNEL_OK")
</pallas_src>

<mosaic_0001>
module attributes {stable_mosaic.version = 11 : i64} {
  func.func @_kernel(%arg0: i32, %arg1: memref<6xi32, #tpu.memory_space<smem>>, %arg2: memref<6xi32, #tpu.memory_space<smem>>, %arg3: memref<1x256x8xf32, #tpu.memory_space<vmem>>, %arg4: memref<1x64x256xf32, #tpu.memory_space<vmem>>, %arg5: memref<9x8x8xbf16, #tpu.memory_space<vmem>>, %arg6: memref<1x8xf32, #tpu.memory_space<vmem>>, %arg7: memref<9x8x8xbf16, #tpu.memory_space<vmem>>, %arg8: memref<1x8xf32, #tpu.memory_space<vmem>>, %arg9: memref<4x8x8xbf16, #tpu.memory_space<vmem>>, %arg10: memref<1x8xf32, #tpu.memory_space<vmem>>, %arg11: memref<8x4xf32, #tpu.memory_space<vmem>>, %arg12: memref<1x4xf32, #tpu.memory_space<vmem>>, %arg13: memref<9x9x8xbf16, #tpu.memory_space<vmem>>, %arg14: memref<1x8xf32, #tpu.memory_space<vmem>>, %arg15: memref<9x8x8xbf16, #tpu.memory_space<vmem>>, %arg16: memref<1x8xf32, #tpu.memory_space<vmem>>, %arg17: memref<8x128x64xbf16, #tpu.memory_space<vmem>>, %arg18: memref<128x1xf32, #tpu.memory_space<vmem>>, %arg19: memref<128x128xbf16, #tpu.memory_space<vmem>>, %arg20: memref<128x1xf32, #tpu.memory_space<vmem>>, %arg21: memref<4x128xbf16, #tpu.memory_space<vmem>>, %arg22: memref<4x1xf32, #tpu.memory_space<vmem>>, %arg23: memref<1x64x8xf32, #tpu.memory_space<vmem>>, %arg24: memref<1x8x2x8x2xf32, #tpu.memory_space<vmem>>, %arg25: memref<1x1x1xf32, #tpu.memory_space<vmem>>, %arg26: memref<10x10x9xf32, #tpu.memory_space<vmem>>) attributes {dimension_semantics = [#tpu.dimension_semantics<parallel>], iteration_bounds = array<i64: 6>, scalar_prefetch = 2 : i64, scratch_operands = 1 : i64, tpu.core_type = #tpu.core_type<tc>, window_params = [{transform_indices = @transform_0, window_bounds = array<i64: 1, 256, 8>}, {transform_indices = @transform_1, window_bounds = array<i64: 1, 64, 256>}, {pipeline_mode = #tpu.pipeline_mode<synchronous>, transform_indices = @transform_2, window_bounds = array<i64: 9, 8, 8>}, {pipeline_mode = #tpu.pipeline_mode<synchronous>, transform_indices = @transform_3, window_bounds = array<i64: 1, 8>}, {pipeline_mode = #tpu.pipeline_mode<synchronous>, transform_indices = @transform_4, window_bounds = array<i64: 9, 8, 8>}, {pipeline_mode = #tpu.pipeline_mode<synchronous>, transform_indices = @transform_5, window_bounds = array<i64: 1, 8>}, {pipeline_mode = #tpu.pipeline_mode<synchronous>, transform_indices = @transform_6, window_bounds = array<i64: 4, 8, 8>}, {pipeline_mode = #tpu.pipeline_mode<synchronous>, transform_indices = @transform_7, window_bounds = array<i64: 1, 8>}, {pipeline_mode = #tpu.pipeline_mode<synchronous>, transform_indices = @transform_8, window_bounds = array<i64: 8, 4>}, {pipeline_mode = #tpu.pipeline_mode<synchronous>, transform_indices = @transform_9, window_bounds = array<i64: 1, 4>}, {pipeline_mode = #tpu.pipeline_mode<synchronous>, transform_indices = @transform_10, window_bounds = array<i64: 9, 9, 8>}, {pipeline_mode = #tpu.pipeline_mode<synchronous>, transform_indices = @transform_11, window_bounds = array<i64: 1, 8>}, {pipeline_mode = #tpu.pipeline_mode<synchronous>, transform_indices = @transform_12, window_bounds = array<i64: 9, 8, 8>}, {pipeline_mode = #tpu.pipeline_mode<synchronous>, transform_indices = @transform_13, window_bounds = array<i64: 1, 8>}, {pipeline_mode = #tpu.pipeline_mode<synchronous>, transform_indices = @transform_14, window_bounds = array<i64: 8, 128, 64>}, {pipeline_mode = #tpu.pipeline_mode<synchronous>, transform_indices = @transform_15, window_bounds = array<i64: 128, 1>}, {pipeline_mode = #tpu.pipeline_mode<synchronous>, transform_indices = @transform_16, window_bounds = array<i64: 128, 128>}, {pipeline_mode = #tpu.pipeline_mode<synchronous>, transform_indices = @transform_17, window_bounds = array<i64: 128, 1>}, {pipeline_mode = #tpu.pipeline_mode<synchronous>, transform_indices = @transform_18, window_bounds = array<i64: 4, 128>}, {pipeline_mode = #tpu.pipeline_mode<synchronous>, transform_indices = @transform_19, window_bounds = array<i64: 4, 1>}, {transform_indices = @transform_20, window_bounds = array<i64: 1, 64, 8>}, {transform_indices = @transform_21, window_bounds = array<i64: 1, 8, 2, 8, 2>}, {transform_indices = @transform_22, window_bounds = array<i64: 1, 1, 1>}]} {
    %0 = arith.index_cast %arg0 : i32 to index
    %1 = memref.load %arg2[%0] : memref<6xi32, #tpu.memory_space<smem>>
    %cst = arith.constant 0.000000e+00 : f32
    %2 = vector.broadcast %cst : f32 to vector<10x10x9xf32>
    %c0 = arith.constant 0 : index
    %c0_0 = arith.constant 0 : index
    %c0_1 = arith.constant 0 : index
    %3 = vector.load %arg26[%c0, %c0_0, %c0_1] : memref<10x10x9xf32, #tpu.memory_space<vmem>>, vector<10x10x9xf32>
    tpu.vector_store %arg26[%c0, %c0_0, %c0_1], %2 {strides = array<i32>} : memref<10x10x9xf32, #tpu.memory_space<vmem>>, vector<10x10x9xf32>,
    %c0_2 = arith.constant 0 : index
    %c0_3 = arith.constant 0 : index
    %c0_4 = arith.constant 0 : index
    %4 = vector.load %arg3[%c0_2, %c0_3, %c0_4] : memref<1x256x8xf32, #tpu.memory_space<vmem>>, vector<1x256x8xf32>
    %5 = vector.shape_cast %4 : vector<1x256x8xf32> to vector<256x8xf32>
    %c0_5 = arith.constant 0 : index
    %c0_6 = arith.constant 0 : index
    %c0_7 = arith.constant 0 : index
    %6 = vector.load %arg4[%c0_5, %c0_6, %c0_7] : memref<1x64x256xf32, #tpu.memory_space<vmem>>, vector<1x64x256xf32>
    %7 = vector.shape_cast %6 : vector<1x64x256xf32> to vector<64x256xf32>
    %cst_8 = arith.constant dense<0.000000e+00> : vector<64x8xf32>
    %8 = tpu.matmul %7, %5, %cst_8 {dimension_numbers = #tpu.dot_dimension_numbers<[1], [0], [0], [1], [0, 0, 1, 1], [], []>} : vector<64x256xf32>, vector<256x8xf32>, vector<64x8xf32> -> vector<64x8xf32>
    %9 = vector.shape_cast %8 : vector<64x8xf32> to vector<1x64x8xf32>
    %c0_9 = arith.constant 0 : index
    %c0_10 = arith.constant 0 : index
    %c0_11 = arith.constant 0 : index
    %10 = vector.load %arg23[%c0_9, %c0_10, %c0_11] : memref<1x64x8xf32, #tpu.memory_space<vmem>>, vector<1x64x8xf32>
    tpu.vector_store %arg23[%c0_9, %c0_10, %c0_11], %9 {strides = array<i32>} : memref<1x64x8xf32, #tpu.memory_space<vmem>>, vector<1x64x8xf32>,
    %11 = vector.shape_cast %8 : vector<64x8xf32> to vector<8x8x8xf32>
    %c1 = arith.constant 1 : index
    %c1_12 = arith.constant 1 : index
    %c0_13 = arith.constant 0 : index
    %12 = vector.load %arg26[%c1, %c1_12, %c0_13] : memref<10x10x9xf32, #tpu.memory_space<vmem>>, vector<8x8x8xf32>
    tpu.vector_store %arg26[%c1, %c1_12, %c0_13], %11 {strides = array<i32>} : memref<10x10x9xf32, #tpu.memory_space<vmem>>, vector<8x8x8xf32>,
    %cst_14 = arith.constant 0.000000e+00 : f32
    %13 = vector.broadcast %cst_14 : f32 to vector<64x8xf32>
    %c0_15 = arith.constant 0 : index
    %c0_16 = arith.constant 0 : index
    %c0_17 = arith.constant 0 : index
    %14 = vector.load %arg26[%c0_15, %c0_16, %c0_17] : memref<10x10x9xf32, #tpu.memory_space<vmem>>, vector<8x8x8xf32>
    %15 = vector.shape_cast %14 : vector<8x8x8xf32> to vector<64x8xf32>
    %16 = arith.truncf %15 : vector<64x8xf32> to vector<64x8xbf16>
    %c0_18 = arith.constant 0 : index
    %c0_19 = arith.constant 0 : index
    %c0_20 = arith.constant 0 : index
    %17 = vector.load %arg5[%c0_18, %c0_19, %c0_20] : memref<9x8x8xbf16, #tpu.memory_space<vmem>>, vector<1x8x8xbf16>
    %18 = vector.shape_cast %17 : vector<1x8x8xbf16> to vector<8x8xbf16>
    %cst_21 = arith.constant dense<0.000000e+00> : vector<64x8xf32>
    %19 = tpu.matmul %16, %18, %cst_21 {dimension_numbers = #tpu.dot_dimension_numbers<[1], [0], [0], [1], [0, 0, 1, 1], [], []>} : vector<64x8xbf16>, vector<8x8xbf16>, vector<64x8xf32> -> vector<64x8xf32>
    %20 = arith.addf %13, %19 : vector<64x8xf32>
    %c0_22 = arith.constant 0 : index
    %c1_23 = arith.constant 1 : index
    %c0_24 = arith.constant 0 : index
    %21 = vector.load %arg26[%c0_22, %c1_23, %c0_24] : memref<10x10x9xf32, #tpu.memory_space<vmem>>, vector<8x8x8xf32>
    %22 = vector.shape_cast %21 : vector<8x8x8xf32> to vector<64x8xf32>
    %23 = arith.truncf %22 : vector<64x8xf32> to vector<64x8xbf16>
    %c1_25 = arith.constant 1 : index
    %c0_26 = arith.constant 0 : index
    %c0_27 = arith.constant 0 : index
    %24 = vector.load %arg5[%c1_25, %c0_26, %c0_27] : memref<9x8x8xbf16, #tpu.memory_space<vmem>>, vector<1x8x8xbf16>
    %25 = vector.shape_cast %24 : vector<1x8x8xbf16> to vector<8x8xbf16>
    %cst_28 = arith.constant dense<0.000000e+00> : vector<64x8xf32>
    %26 = tpu.matmul %23, %25, %cst_28 {dimension_numbers = #tpu.dot_dimension_numbers<[1], [0], [0], [1], [0, 0, 1, 1], [], []>} : vector<64x8xbf16>, vector<8x8xbf16>, vector<64x8xf32> -> vector<64x8xf32>
    %27 = arith.addf %20, %26 : vector<64x8xf32>
    %c0_29 = arith.constant 0 : index
    %c2 = arith.constant 2 : index
    %c0_30 = arith.constant 0 : index
    %28 = vector.load %arg26[%c0_29, %c2, %c0_30] : memref<10x10x9xf32, #tpu.memory_space<vmem>>, vector<8x8x8xf32>
    %29 = vector.shape_cast %28 : vector<8x8x8xf32> to vector<64x8xf32>
    %30 = arith.truncf %29 : vector<64x8xf32> to vector<64x8xbf16>
    %c2_31 = arith.constant 2 : index
    %c0_32 = arith.constant 0 : index
    %c0_33 = arith.constant 0 : index
    %31 = vector.load %arg5[%c2_31, %c0_32, %c0_33] : memref<9x8x8xbf16, #tpu.memory_space<vmem>>, vector<1x8x8xbf16>
    %32 = vector.shape_cast %31 : vector<1x8x8xbf16> to vector<8x8xbf16>
    %cst_34 = arith.constant dense<0.000000e+00> : vector<64x8xf32>
    %33 = tpu.matmul %30, %32, %cst_34 {dimension_numbers = #tpu.dot_dimension_numbers<[1], [0], [0], [1], [0, 0, 1, 1], [], []>} : vector<64x8xbf16>, vector<8x8xbf16>, vector<64x8xf32> -> vector<64x8xf32>
    %34 = arith.addf %27, %33 : vector<64x8xf32>
    %c1_35 = arith.constant 1 : index
    %c0_36 = arith.constant 0 : index
    %c0_37 = arith.constant 0 : index
    %35 = vector.load %arg26[%c1_35, %c0_36, %c0_37] : memref<10x10x9xf32, #tpu.memory_space<vmem>>, vector<8x8x8xf32>
    %36 = vector.shape_cast %35 : vector<8x8x8xf32> to vector<64x8xf32>
    %37 = arith.truncf %36 : vector<64x8xf32> to vector<64x8xbf16>
    %c3 = arith.constant 3 : index
    %c0_38 = arith.constant 0 : index
    %c0_39 = arith.constant 0 : index
    %38 = vector.load %arg5[%c3, %c0_38, %c0_39] : memref<9x8x8xbf16, #tpu.memory_space<vmem>>, vector<1x8x8xbf16>
    %39 = vector.shape_cast %38 : vector<1x8x8xbf16> to vector<8x8xbf16>
    %cst_40 = arith.constant dense<0.000000e+00> : vector<64x8xf32>
    %40 = tpu.matmul %37, %39, %cst_40 {dimension_numbers = #tpu.dot_dimension_numbers<[1], [0], [0], [1], [0, 0, 1, 1], [], []>} : vector<64x8xbf16>, vector<8x8xbf16>, vector<64x8xf32> -> vector<64x8xf32>
    %41 = arith.addf %34, %40 : vector<64x8xf32>
    %c1_41 = arith.constant 1 : index
    %c1_42 = arith.constant 1 : index
    %c0_43 = arith.constant 0 : index
    %42 = vector.load %arg26[%c1_41, %c1_42, %c0_43] : memref<10x10x9xf32, #tpu.memory_space<vmem>>, vector<8x8x8xf32>
    %43 = vector.shape_cast %42 : vector<8x8x8xf32> to vector<64x8xf32>
    %44 = arith.truncf %43 : vector<64x8xf32> to vector<64x8xbf16>
    %c4 = arith.constant 4 : index
    %c0_44 = arith.constant 0 : index
    %c0_45 = arith.constant 0 : index
    %45 = vector.load %arg5[%c4, %c0_44, %c0_45] : memref<9x8x8xbf16, #tpu.memory_space<vmem>>, vector<1x8x8xbf16>
    %46 = vector.shape_cast %45 : vector<1x8x8xbf16> to vector<8x8xbf16>
    %cst_46 = arith.constant dense<0.000000e+00> : vector<64x8xf32>
    %47 = tpu.matmul %44, %46, %cst_46 {dimension_numbers = #tpu.dot_dimension_numbers<[1], [0], [0], [1], [0, 0, 1, 1], [], []>} : vector<64x8xbf16>, vector<8x8xbf16>, vector<64x8xf32> -> vector<64x8xf32>
    %48 = arith.addf %41, %47 : vector<64x8xf32>
    %c1_47 = arith.constant 1 : index
    %c2_48 = arith.constant 2 : index
    %c0_49 = arith.constant 0 : index
    %49 = vector.load %arg26[%c1_47, %c2_48, %c0_49] : memref<10x10x9xf32, #tpu.memory_space<vmem>>, vector<8x8x8xf32>
    %50 = vector.shape_cast %49 : vector<8x8x8xf32> to vector<64x8xf32>
    %51 = arith.truncf %50 : vector<64x8xf32> to vector<64x8xbf16>
    %c5 = arith.constant 5 : index
    %c0_50 = arith.constant 0 : index
    %c0_51 = arith.constant 0 : index
    %52 = vector.load %arg5[%c5, %c0_50, %c0_51] : memref<9x8x8xbf16, #tpu.memory_space<vmem>>, vector<1x8x8xbf16>
    %53 = vector.shape_cast %52 : vector<1x8x8xbf16> to vector<8x8xbf16>
    %cst_52 = arith.constant dense<0.000000e+00> : vector<64x8xf32>
    %54 = tpu.matmul %51, %53, %cst_52 {dimension_numbers = #tpu.dot_dimension_numbers<[1], [0], [0], [1], [0, 0, 1, 1], [], []>} : vector<64x8xbf16>, vector<8x8xbf16>, vector<64x8xf32> -> vector<64x8xf32>
    %55 = arith.addf %48, %54 : vector<64x8xf32>
    %c2_53 = arith.constant 2 : index
    %c0_54 = arith.constant 0 : index
    %c0_55 = arith.constant 0 : index
    %56 = vector.load %arg26[%c2_53, %c0_54, %c0_55] : memref<10x10x9xf32, #tpu.memory_space<vmem>>, vector<8x8x8xf32>
    %57 = vector.shape_cast %56 : vector<8x8x8xf32> to vector<64x8xf32>
    %58 = arith.truncf %57 : vector<64x8xf32> to vector<64x8xbf16>
    %c6 = arith.constant 6 : index
    %c0_56 = arith.constant 0 : index
    %c0_57 = arith.constant 0 : index
    %59 = vector.load %arg5[%c6, %c0_56, %c0_57] : memref<9x8x8xbf16, #tpu.memory_space<vmem>>, vector<1x8x8xbf16>
    %60 = vector.shape_cast %59 : vector<1x8x8xbf16> to vector<8x8xbf16>
    %cst_58 = arith.constant dense<0.000000e+00> : vector<64x8xf32>
    %61 = tpu.matmul %58, %60, %cst_58 {dimension_numbers = #tpu.dot_dimension_numbers<[1], [0], [0], [1], [0, 0, 1, 1], [], []>} : vector<64x8xbf16>, vector<8x8xbf16>, vector<64x8xf32> -> vector<64x8xf32>
    %62 = arith.addf %55, %61 : vector<64x8xf32>
    %c2_59 = arith.constant 2 : index
    %c1_60 = arith.constant 1 : index
    %c0_61 = arith.constant 0 : index
    %63 = vector.load %arg26[%c2_59, %c1_60, %c0_61] : memref<10x10x9xf32, #tpu.memory_space<vmem>>, vector<8x8x8xf32>
    %64 = vector.shape_cast %63 : vector<8x8x8xf32> to vector<64x8xf32>
    %65 = arith.truncf %64 : vector<64x8xf32> to vector<64x8xbf16>
    %c7 = arith.constant 7 : index
    %c0_62 = arith.constant 0 : index
    %c0_63 = arith.constant 0 : index
    %66 = vector.load %arg5[%c7, %c0_62, %c0_63] : memref<9x8x8xbf16, #tpu.memory_space<vmem>>, vector<1x8x8xbf16>
    %67 = vector.shape_cast %66 : vector<1x8x8xbf16> to vector<8x8xbf16>
    %cst_64 = arith.constant dense<0.000000e+00> : vector<64x8xf32>
    %68 = tpu.matmul %65, %67, %cst_64 {dimension_numbers = #tpu.dot_dimension_numbers<[1], [0], [0], [1], [0, 0, 1, 1], [], []>} : vector<64x8xbf16>, vector<8x8xbf16>, vector<64x8xf32> -> vector<64x8xf32>
    %69 = arith.addf %62, %68 : vector<64x8xf32>
    %c2_65 = arith.constant 2 : index
    %c2_66 = arith.constant 2 : index
    %c0_67 = arith.constant 0 : index
    %70 = vector.load %arg26[%c2_65, %c2_66, %c0_67] : memref<10x10x9xf32, #tpu.memory_space<vmem>>, vector<8x8x8xf32>
    %71 = vector.shape_cast %70 : vector<8x8x8xf32> to vector<64x8xf32>
    %72 = arith.truncf %71 : vector<64x8xf32> to vector<64x8xbf16>
    %c8 = arith.constant 8 : index
    %c0_68 = arith.constant 0 : index
    %c0_69 = arith.constant 0 : index
    %73 = vector.load %arg5[%c8, %c0_68, %c0_69] : memref<9x8x8xbf16, #tpu.memory_space<vmem>>, vector<1x8x8xbf16>
    %74 = vector.shape_cast %73 : vector<1x8x8xbf16> to vector<8x8xbf16>
    %cst_70 = arith.constant dense<0.000000e+00> : vector<64x8xf32>
    %75 = tpu.matmul %72, %74, %cst_70 {dimension_numbers = #tpu.dot_dimension_numbers<[1], [0], [0], [1], [0, 0, 1, 1], [], []>} : vector<64x8xbf16>, vector<8x8xbf16>, vector<64x8xf32> -> vector<64x8xf32>
    %76 = arith.addf %69, %75 : vector<64x8xf32>
    %c0_71 = arith.constant 0 : index
    %c0_72 = arith.constant 0 : index
    %77 = vector.load %arg6[%c0_71, %c0_72] : memref<1x8xf32, #tpu.memory_space<vmem>>, vector<1x8xf32>
    %78 = vector.broadcast %77 : vector<1x8xf32> to vector<64x8xf32>
    %79 = arith.addf %76, %78 : vector<64x8xf32>
    %cst_73 = arith.constant 0.000000e+00 : f32
    %80 = vector.broadcast %cst_73 : f32 to vector<64x8xf32>
    %81 = arith.maximumf %79, %80 : vector<64x8xf32>
    %82 = vector.shape_cast %81 : vector<64x8xf32> to vector<8x8x8xf32>
    %c1_74 = arith.constant 1 : index
    %c1_75 = arith.constant 1 : index
    %c0_76 = arith.constant 0 : index
    %83 = vector.load %arg26[%c1_74, %c1_75, %c0_76] : memref<10x10x9xf32, #tpu.memory_space<vmem>>, vector<8x8x8xf32>
    tpu.vector_store %arg26[%c1_74, %c1_75, %c0_76], %82 {strides = array<i32>} : memref<10x10x9xf32, #tpu.memory_space<vmem>>, vector<8x8x8xf32>,
    %cst_77 = arith.constant 0.000000e+00 : f32
    %84 = vector.broadcast %cst_77 : f32 to vector<64x8xf32>
    %c0_78 = arith.constant 0 : index
    %c0_79 = arith.constant 0 : index
    %c0_80 = arith.constant 0 : index
    %85 = vector.load %arg26[%c0_78, %c0_79, %c0_80] : memref<10x10x9xf32, #tpu.memory_space<vmem>>, vector<8x8x8xf32>
    %86 = vector.shape_cast %85 : vector<8x8x8xf32> to vector<64x8xf32>
    %87 = arith.truncf %86 : vector<64x8xf32> to vector<64x8xbf16>
    %c0_81 = arith.constant 0 : index
    %c0_82 = arith.constant 0 : index
    %c0_83 = arith.constant 0 : index
    %88 = vector.load %arg7[%c0_81, %c0_82, %c0_83] : memref<9x8x8xbf16, #tpu.memory_space<vmem>>, vector<1x8x8xbf16>
    %89 = vector.shape_cast %88 : vector<1x8x8xbf16> to vector<8x8xbf16>
    %cst_84 = arith.constant dense<0.000000e+00> : vector<64x8xf32>
    %90 = tpu.matmul %87, %89, %cst_84 {dimension_numbers = #tpu.dot_dimension_numbers<[1], [0], [0], [1], [0, 0, 1, 1], [], []>} : vector<64x8xbf16>, vector<8x8xbf16>, vector<64x8xf32> -> vector<64x8xf32>
    %91 = arith.addf %84, %90 : vector<64x8xf32>
    %c0_85 = arith.constant 0 : index
    %c1_86 = arith.constant 1 : index
    %c0_87 = arith.constant 0 : index
    %92 = vector.load %arg26[%c0_85, %c1_86, %c0_87] : memref<10x10x9xf32, #tpu.memory_space<vmem>>, vector<8x8x8xf32>
    %93 = vector.shape_cast %92 : vector<8x8x8xf32> to vector<64x8xf32>
    %94 = arith.truncf %93 : vector<64x8xf32> to vector<64x8xbf16>
    %c1_88 = arith.constant 1 : index
    %c0_89 = arith.constant 0 : index
    %c0_90 = arith.constant 0 : index
    %95 = vector.load %arg7[%c1_88, %c0_89, %c0_90] : memref<9x8x8xbf16, #tpu.memory_space<vmem>>, vector<1x8x8xbf16>
    %96 = vector.shape_cast %95 : vector<1x8x8xbf16> to vector<8x8xbf16>
    %cst_91 = arith.constant dense<0.000000e+00> : vector<64x8xf32>
    %97 = tpu.matmul %94, %96, %cst_91 {dimension_numbers = #tpu.dot_dimension_numbers<[1], [0], [0], [1], [0, 0, 1, 1], [], []>} : vector<64x8xbf16>, vector<8x8xbf16>, vector<64x8xf32> -> vector<64x8xf32>
    %98 = arith.addf %91, %97 : vector<64x8xf32>
    %c0_92 = arith.constant 0 : index
    %c2_93 = arith.constant 2 : index
    %c0_94 = arith.constant 0 : index
    %99 = vector.load %arg26[%c0_92, %c2_93, %c0_94] : memref<10x10x9xf32, #tpu.memory_space<vmem>>, vector<8x8x8xf32>
    %100 = vector.shape_cast %99 : vector<8x8x8xf32> to vector<64x8xf32>
    %101 = arith.truncf %100 : vector<64x8xf32> to vector<64x8xbf16>
    %c2_95 = arith.constant 2 : index
    %c0_96 = arith.constant 0 : index
    %c0_97 = arith.constant 0 : index
    %102 = vector.load %arg7[%c2_95, %c0_96, %c0_97] : memref<9x8x8xbf16, #tpu.memory_space<vmem>>, vector<1x8x8xbf16>
    %103 = vector.shape_cast %102 : vector<1x8x8xbf16> to vector<8x8xbf16>
    %cst_98 = arith.constant dense<0.000000e+00> : vector<64x8xf32>
    %104 = tpu.matmul %101, %103, %cst_98 {dimension_numbers = #tpu.dot_dimension_numbers<[1], [0], [0], [1], [0, 0, 1, 1], [], []>} : vector<64x8xbf16>, vector<8x8xbf16>, vector<64x8xf32> -> vector<64x8xf32>
    %105 = arith.addf %98, %104 : vector<64x8xf32>
    %c1_99 = arith.constant 1 : index
    %c0_100 = arith.constant 0 : index
    %c0_101 = arith.constant 0 : index
    %106 = vector.load %arg26[%c1_99, %c0_100, %c0_101] : memref<10x10x9xf32, #tpu.memory_space<vmem>>, vector<8x8x8xf32>
    %107 = vector.shape_cast %106 : vector<8x8x8xf32> to vector<64x8xf32>
    %108 = arith.truncf %107 : vector<64x8xf32> to vector<64x8xbf16>
    %c3_102 = arith.constant 3 : index
    %c0_103 = arith.constant 0 : index
    %c0_104 = arith.constant 0 : index
    %109 = vector.load %arg7[%c3_102, %c0_103, %c0_104] : memref<9x8x8xbf16, #tpu.memory_space<vmem>>, vector<1x8x8xbf16>
    %110 = vector.shape_cast %109 : vector<1x8x8xbf16> to vector<8x8xbf16>
    %cst_105 = arith.constant dense<0.000000e+00> : vector<64x8xf32>
    %111 = tpu.matmul %108, %110, %cst_105 {dimension_numbers = #tpu.dot_dimension_numbers<[1], [0], [0], [1], [0, 0, 1, 1], [], []>} : vector<64x8xbf16>, vector<8x8xbf16>, vector<64x8xf32> -> vector<64x8xf32>
    %112 = arith.addf %105, %111 : vector<64x8xf32>
    %c1_106 = arith.constant 1 : index
    %c1_107 = arith.constant 1 : index
    %c0_108 = arith.constant 0 : index
    %113 = vector.load %arg26[%c1_106, %c1_107, %c0_108] : memref<10x10x9xf32, #tpu.memory_space<vmem>>, vector<8x8x8xf32>
    %114 = vector.shape_cast %113 : vector<8x8x8xf32> to vector<64x8xf32>
    %115 = arith.truncf %114 : vector<64x8xf32> to vector<64x8xbf16>
    %c4_109 = arith.constant 4 : index
    %c0_110 = arith.constant 0 : index
    %c0_111 = arith.constant 0 : index
    %116 = vector.load %arg7[%c4_109, %c0_110, %c0_111] : memref<9x8x8xbf16, #tpu.memory_space<vmem>>, vector<1x8x8xbf16>
    %117 = vector.shape_cast %116 : vector<1x8x8xbf16> to vector<8x8xbf16>
    %cst_112 = arith.constant dense<0.000000e+00> : vector<64x8xf32>
    %118 = tpu.matmul %115, %117, %cst_112 {dimension_numbers = #tpu.dot_dimension_numbers<[1], [0], [0], [1], [0, 0, 1, 1], [], []>} : vector<64x8xbf16>, vector<8x8xbf16>, vector<64x8xf32> -> vector<64x8xf32>
    %119 = arith.addf %112, %118 : vector<64x8xf32>
    %c1_113 = arith.constant 1 : index
    %c2_114 = arith.constant 2 : index
    %c0_115 = arith.constant 0 : index
    %120 = vector.load %arg26[%c1_113, %c2_114, %c0_115] : memref<10x10x9xf32, #tpu.memory_space<vmem>>, vector<8x8x8xf32>
    %121 = vector.shape_cast %120 : vector<8x8x8xf32> to vector<64x8xf32>
    %122 = arith.truncf %121 : vector<64x8xf32> to vector<64x8xbf16>
    %c5_116 = arith.constant 5 : index
    %c0_117 = arith.constant 0 : index
    %c0_118 = arith.constant 0 : index
    %123 = vector.load %arg7[%c5_116, %c0_117, %c0_118] : memref<9x8x8xbf16, #tpu.memory_space<vmem>>, vector<1x8x8xbf16>
    %124 = vector.shape_cast %123 : vector<1x8x8xbf16> to vector<8x8xbf16>
    %cst_119 = arith.constant dense<0.000000e+00> : vector<64x8xf32>
    %125 = tpu.matmul %122, %124, %cst_119 {dimension_numbers = #tpu.dot_dimension_numbers<[1], [0], [0], [1], [0, 0, 1, 1], [], []>} : vector<64x8xbf16>, vector<8x8xbf16>, vector<64x8xf32> -> vector<64x8xf32>
    %126 = arith.addf %119, %125 : vector<64x8xf32>
    %c2_120 = arith.constant 2 : index
    %c0_121 = arith.constant 0 : index
    %c0_122 = arith.constant 0 : index
    %127 = vector.load %arg26[%c2_120, %c0_121, %c0_122] : memref<10x10x9xf32, #tpu.memory_space<vmem>>, vector<8x8x8xf32>
    %128 = vector.shape_cast %127 : vector<8x8x8xf32> to vector<64x8xf32>
    %129 = arith.truncf %128 : vector<64x8xf32> to vector<64x8xbf16>
    %c6_123 = arith.constant 6 : index
    %c0_124 = arith.constant 0 : index
    %c0_125 = arith.constant 0 : index
    %130 = vector.load %arg7[%c6_123, %c0_124, %c0_125] : memref<9x8x8xbf16, #tpu.memory_space<vmem>>, vector<1x8x8xbf16>
    %131 = vector.shape_cast %130 : vector<1x8x8xbf16> to vector<8x8xbf16>
    %cst_126 = arith.constant dense<0.000000e+00> : vector<64x8xf32>
    %132 = tpu.matmul %129, %131, %cst_126 {dimension_numbers = #tpu.dot_dimension_numbers<[1], [0], [0], [1], [0, 0, 1, 1], [], []>} : vector<64x8xbf16>, vector<8x8xbf16>, vector<64x8xf32> -> vector<64x8xf32>
    %133 = arith.addf %126, %132 : vector<64x8xf32>
    %c2_127 = arith.constant 2 : index
    %c1_128 = arith.constant 1 : index
    %c0_129 = arith.constant 0 : index
    %134 = vector.load %arg26[%c2_127, %c1_128, %c0_129] : memref<10x10x9xf32, #tpu.memory_space<vmem>>, vector<8x8x8xf32>
    %135 = vector.shape_cast %134 : vector<8x8x8xf32> to vector<64x8xf32>
    %136 = arith.truncf %135 : vector<64x8xf32> to vector<64x8xbf16>
    %c7_130 = arith.constant 7 : index
    %c0_131 = arith.constant 0 : index
    %c0_132 = arith.constant 0 : index
    %137 = vector.load %arg7[%c7_130, %c0_131, %c0_132] : memref<9x8x8xbf16, #tpu.memory_space<vmem>>, vector<1x8x8xbf16>
    %138 = vector.shape_cast %137 : vector<1x8x8xbf16> to vector<8x8xbf16>
    %cst_133 = arith.constant dense<0.000000e+00> : vector<64x8xf32>
    %139 = tpu.matmul %136, %138, %cst_133 {dimension_numbers = #tpu.dot_dimension_numbers<[1], [0], [0], [1], [0, 0, 1, 1], [], []>} : vector<64x8xbf16>, vector<8x8xbf16>, vector<64x8xf32> -> vector<64x8xf32>
    %140 = arith.addf %133, %139 : vector<64x8xf32>
    %c2_134 = arith.constant 2 : index
    %c2_135 = arith.constant 2 : index
    %c0_136 = arith.constant 0 : index
    %141 = vector.load %arg26[%c2_134, %c2_135, %c0_136] : memref<10x10x9xf32, #tpu.memory_space<vmem>>, vector<8x8x8xf32>
    %142 = vector.shape_cast %141 : vector<8x8x8xf32> to vector<64x8xf32>
    %143 = arith.truncf %142 : vector<64x8xf32> to vector<64x8xbf16>
    %c8_137 = arith.constant 8 : index
    %c0_138 = arith.constant 0 : index
    %c0_139 = arith.constant 0 : index
    %144 = vector.load %arg7[%c8_137, %c0_138, %c0_139] : memref<9x8x8xbf16, #tpu.memory_space<vmem>>, vector<1x8x8xbf16>
    %145 = vector.shape_cast %144 : vector<1x8x8xbf16> to vector<8x8xbf16>
    %cst_140 = arith.constant dense<0.000000e+00> : vector<64x8xf32>
    %146 = tpu.matmul %143, %145, %cst_140 {dimension_numbers = #tpu.dot_dimension_numbers<[1], [0], [0], [1], [0, 0, 1, 1], [], []>} : vector<64x8xbf16>, vector<8x8xbf16>, vector<64x8xf32> -> vector<64x8xf32>
    %147 = arith.addf %140, %146 : vector<64x8xf32>
    %c0_141 = arith.constant 0 : index
    %c0_142 = arith.constant 0 : index
    %148 = vector.load %arg8[%c0_141, %c0_142] : memref<1x8xf32, #tpu.memory_space<vmem>>, vector<1x8xf32>
    %149 = vector.broadcast %148 : vector<1x8xf32> to vector<64x8xf32>
    %150 = arith.addf %147, %149 : vector<64x8xf32>
    %cst_143 = arith.constant 0.000000e+00 : f32
    %151 = vector.broadcast %cst_143 : f32 to vector<64x8xf32>
    %152 = arith.maximumf %150, %151 : vector<64x8xf32>
    %153 = tpu.iota {dimensions = array<i32: 1>} : vector<1x4xi32>
    %154 = vector.broadcast %1 : i32 to vector<1x4xi32>
    %155 = arith.cmpi eq, %153, %154 : vector<1x4xi32>
    %156 = arith.extui %155 : vector<1x4xi1> to vector<1x4xi32>
    %157 = arith.sitofp %156 : vector<1x4xi32> to vector<1x4xf32>
    %158 = tpu.iota {dimensions = array<i32: 0>} : vector<4x1xi32>
    %159 = vector.broadcast %1 : i32 to vector<4x1xi32>
    %160 = arith.cmpi eq, %158, %159 : vector<4x1xi32>
    %161 = arith.extui %160 : vector<4x1xi1> to vector<4x1xi32>
    %162 = arith.sitofp %161 : vector<4x1xi32> to vector<4x1xf32>
    %c0_144 = arith.constant 0 : index
    %c0_145 = arith.constant 0 : index
    %163 = vector.load %arg11[%c0_144, %c0_145] : memref<8x4xf32, #tpu.memory_space<vmem>>, vector<8x4xf32>
    %cst_146 = arith.constant dense<0.000000e+00> : vector<8x1xf32>
    %164 = tpu.matmul %163, %162, %cst_146 {dimension_numbers = #tpu.dot_dimension_numbers<[1], [0], [0], [1], [0, 0, 1, 1], [], []>} : vector<8x4xf32>, vector<4x1xf32>, vector<8x1xf32> -> vector<8x1xf32>
    %c0_147 = arith.constant 0 : index
    %c0_148 = arith.constant 0 : index
    %165 = vector.load %arg12[%c0_147, %c0_148] : memref<1x4xf32, #tpu.memory_space<vmem>>, vector<1x4xf32>
    %166 = arith.mulf %165, %157 : vector<1x4xf32>
    %167 = vector.shape_cast %166 : vector<1x4xf32> to vector<1x1x4xf32>
    %cst_149 = arith.constant dense<0.000000e+00> : vector<1xf32>
    %168 = vector.multi_reduction <add>, %167, %cst_149 [1, 2] : vector<1x1x4xf32> to vector<1xf32>
    %169 = vector.shape_cast %168 : vector<1xf32> to vector<1x1x1xf32>
    %170 = vector.extract %169[0, 0, 0] : f32 from vector<1x1x1xf32>
    %171 = arith.truncf %152 : vector<64x8xf32> to vector<64x8xbf16>
    %cst_150 = arith.constant 0.000000e+00 : f32
    %172 = vector.broadcast %cst_150 : f32 to vector<64x1xf32>
    %c0_151 = arith.constant 0 : index
    %c0_152 = arith.constant 0 : index
    %c0_153 = arith.constant 0 : index
    %173 = vector.load %arg9[%c0_151, %c0_152, %c0_153] : memref<4x8x8xbf16, #tpu.memory_space<vmem>>, vector<1x8x8xbf16>
    %174 = vector.shape_cast %173 : vector<1x8x8xbf16> to vector<8x8xbf16>
    %cst_154 = arith.constant dense<0.000000e+00> : vector<64x8xf32>
    %175 = tpu.matmul %171, %174, %cst_154 {dimension_numbers = #tpu.dot_dimension_numbers<[1], [0], [0], [1], [0, 0, 1, 1], [], []>} : vector<64x8xbf16>, vector<8x8xbf16>, vector<64x8xf32> -> vector<64x8xf32>
    %c0_155 = arith.constant 0 : index
    %c0_156 = arith.constant 0 : index
    %176 = vector.load %arg10[%c0_155, %c0_156] : memref<1x8xf32, #tpu.memory_space<vmem>>, vector<1x8xf32>
    %177 = vector.broadcast %176 : vector<1x8xf32> to vector<64x8xf32>
    %178 = arith.addf %175, %177 : vector<64x8xf32>
    %cst_157 = arith.constant 0.000000e+00 : f32
    %179 = vector.broadcast %cst_157 : f32 to vector<64x8xf32>
    %180 = arith.maximumf %178, %179 : vector<64x8xf32>
    %cst_158 = arith.constant dense<0.000000e+00> : vector<64x1xf32>
    %181 = tpu.matmul %180, %164, %cst_158 {dimension_numbers = #tpu.dot_dimension_numbers<[1], [0], [0], [1], [0, 0, 1, 1], [], []>} : vector<64x8xf32>, vector<8x1xf32>, vector<64x1xf32> -> vector<64x1xf32>
    %182 = vector.broadcast %170 : f32 to vector<64x1xf32>
    %183 = arith.addf %181, %182 : vector<64x1xf32>
    %184 = arith.negf %183 : vector<64x1xf32>
    %185 = math.exp %184 : vector<64x1xf32>
    %cst_159 = arith.constant 1.000000e+00 : f32
    %186 = vector.broadcast %cst_159 : f32 to vector<64x1xf32>
    %187 = arith.addf %186, %185 : vector<64x1xf32>
    %188 = arith.divf %186, %187 : vector<64x1xf32>
    %189 = vector.shape_cast %188 : vector<64x1xf32> to vector<8x8x1xf32>
    %c0_160 = arith.constant 0 : index
    %c0_161 = arith.constant 0 : index
    %c0_162 = arith.constant 0 : index
    %c0_163 = arith.constant 0 : index
    %c0_164 = arith.constant 0 : index
    %190 = vector.load %arg24[%c0_160, %c0_161, %c0_162, %c0_163, %c0_164] : memref<1x8x2x8x2xf32, #tpu.memory_space<vmem>>, vector<1x8x1x8x1xf32>
    %191 = vector.shape_cast %190 : vector<1x8x1x8x1xf32> to vector<8x8x1xf32>
    %192 = vector.shape_cast %189 : vector<8x8x1xf32> to vector<1x8x1x8x1xf32>
    tpu.vector_store %arg24[%c0_160, %c0_161, %c0_162, %c0_163, %c0_164], %192 {strides = array<i32>} : memref<1x8x2x8x2xf32, #tpu.memory_space<vmem>>, vector<1x8x1x8x1xf32>,
    %193 = arith.maximumf %172, %188 : vector<64x1xf32>
    %c1_165 = arith.constant 1 : index
    %c0_166 = arith.constant 0 : index
    %c0_167 = arith.constant 0 : index
    %194 = vector.load %arg9[%c1_165, %c0_166, %c0_167] : memref<4x8x8xbf16, #tpu.memory_space<vmem>>, vector<1x8x8xbf16>
    %195 = vector.shape_cast %194 : vector<1x8x8xbf16> to vector<8x8xbf16>
    %cst_168 = arith.constant dense<0.000000e+00> : vector<64x8xf32>
    %196 = tpu.matmul %171, %195, %cst_168 {dimension_numbers = #tpu.dot_dimension_numbers<[1], [0], [0], [1], [0, 0, 1, 1], [], []>} : vector<64x8xbf16>, vector<8x8xbf16>, vector<64x8xf32> -> vector<64x8xf32>
    %c0_169 = arith.constant 0 : index
    %c0_170 = arith.constant 0 : index
    %197 = vector.load %arg10[%c0_169, %c0_170] : memref<1x8xf32, #tpu.memory_space<vmem>>, vector<1x8xf32>
    %198 = vector.broadcast %197 : vector<1x8xf32> to vector<64x8xf32>
    %199 = arith.addf %196, %198 : vector<64x8xf32>
    %cst_171 = arith.constant 0.000000e+00 : f32
    %200 = vector.broadcast %cst_171 : f32 to vector<64x8xf32>
    %201 = arith.maximumf %199, %200 : vector<64x8xf32>
    %cst_172 = arith.constant dense<0.000000e+00> : vector<64x1xf32>
    %202 = tpu.matmul %201, %164, %cst_172 {dimension_numbers = #tpu.dot_dimension_numbers<[1], [0], [0], [1], [0, 0, 1, 1], [], []>} : vector<64x8xf32>, vector<8x1xf32>, vector<64x1xf32> -> vector<64x1xf32>
    %203 = vector.broadcast %170 : f32 to vector<64x1xf32>
    %204 = arith.addf %202, %203 : vector<64x1xf32>
    %205 = arith.negf %204 : vector<64x1xf32>
    %206 = math.exp %205 : vector<64x1xf32>
    %cst_173 = arith.constant 1.000000e+00 : f32
    %207 = vector.broadcast %cst_173 : f32 to vector<64x1xf32>
    %208 = arith.addf %207, %206 : vector<64x1xf32>
    %209 = arith.divf %207, %208 : vector<64x1xf32>
    %210 = vector.shape_cast %209 : vector<64x1xf32> to vector<8x8x1xf32>
    %c0_174 = arith.constant 0 : index
    %c0_175 = arith.constant 0 : index
    %c0_176 = arith.constant 0 : index
    %c0_177 = arith.constant 0 : index
    %c1_178 = arith.constant 1 : index
    %211 = vector.load %arg24[%c0_174, %c0_175, %c0_176, %c0_177, %c1_178] : memref<1x8x2x8x2xf32, #tpu.memory_space<vmem>>, vector<1x8x1x8x1xf32>
    %212 = vector.shape_cast %211 : vector<1x8x1x8x1xf32> to vector<8x8x1xf32>
    %213 = vector.shape_cast %210 : vector<8x8x1xf32> to vector<1x8x1x8x1xf32>
    tpu.vector_store %arg24[%c0_174, %c0_175, %c0_176, %c0_177, %c1_178], %213 {strides = array<i32>} : memref<1x8x2x8x2xf32, #tpu.memory_space<vmem>>, vector<1x8x1x8x1xf32>,
    %214 = arith.maximumf %193, %209 : vector<64x1xf32>
    %c2_179 = arith.constant 2 : index
    %c0_180 = arith.constant 0 : index
    %c0_181 = arith.constant 0 : index
    %215 = vector.load %arg9[%c2_179, %c0_180, %c0_181] : memref<4x8x8xbf16, #tpu.memory_space<vmem>>, vector<1x8x8xbf16>
    %216 = vector.shape_cast %215 : vector<1x8x8xbf16> to vector<8x8xbf16>
    %cst_182 = arith.constant dense<0.000000e+00> : vector<64x8xf32>
    %217 = tpu.matmul %171, %216, %cst_182 {dimension_numbers = #tpu.dot_dimension_numbers<[1], [0], [0], [1], [0, 0, 1, 1], [], []>} : vector<64x8xbf16>, vector<8x8xbf16>, vector<64x8xf32> -> vector<64x8xf32>
    %c0_183 = arith.constant 0 : index
    %c0_184 = arith.constant 0 : index
    %218 = vector.load %arg10[%c0_183, %c0_184] : memref<1x8xf32, #tpu.memory_space<vmem>>, vector<1x8xf32>
    %219 = vector.broadcast %218 : vector<1x8xf32> to vector<64x8xf32>
    %220 = arith.addf %217, %219 : vector<64x8xf32>
    %cst_185 = arith.constant 0.000000e+00 : f32
    %221 = vector.broadcast %cst_185 : f32 to vector<64x8xf32>
    %222 = arith.maximumf %220, %221 : vector<64x8xf32>
    %cst_186 = arith.constant dense<0.000000e+00> : vector<64x1xf32>
    %223 = tpu.matmul %222, %164, %cst_186 {dimension_numbers = #tpu.dot_dimension_numbers<[1], [0], [0], [1], [0, 0, 1, 1], [], []>} : vector<64x8xf32>, vector<8x1xf32>, vector<64x1xf32> -> vector<64x1xf32>
    %224 = vector.broadcast %170 : f32 to vector<64x1xf32>
    %225 = arith.addf %223, %224 : vector<64x1xf32>
    %226 = arith.negf %225 : vector<64x1xf32>
    %227 = math.exp %226 : vector<64x1xf32>
    %cst_187 = arith.constant 1.000000e+00 : f32
    %228 = vector.broadcast %cst_187 : f32 to vector<64x1xf32>
    %229 = arith.addf %228, %227 : vector<64x1xf32>
    %230 = arith.divf %228, %229 : vector<64x1xf32>
    %231 = vector.shape_cast %230 : vector<64x1xf32> to vector<8x8x1xf32>
    %c0_188 = arith.constant 0 : index
    %c0_189 = arith.constant 0 : index
    %c1_190 = arith.constant 1 : index
    %c0_191 = arith.constant 0 : index
    %c0_192 = arith.constant 0 : index
    %232 = vector.load %arg24[%c0_188, %c0_189, %c1_190, %c0_191, %c0_192] : memref<1x8x2x8x2xf32, #tpu.memory_space<vmem>>, vector<1x8x1x8x1xf32>
    %233 = vector.shape_cast %232 : vector<1x8x1x8x1xf32> to vector<8x8x1xf32>
    %234 = vector.shape_cast %231 : vector<8x8x1xf32> to vector<1x8x1x8x1xf32>
    tpu.vector_store %arg24[%c0_188, %c0_189, %c1_190, %c0_191, %c0_192], %234 {strides = array<i32>} : memref<1x8x2x8x2xf32, #tpu.memory_space<vmem>>, vector<1x8x1x8x1xf32>,
    %235 = arith.maximumf %214, %230 : vector<64x1xf32>
    %c3_193 = arith.constant 3 : index
    %c0_194 = arith.constant 0 : index
    %c0_195 = arith.constant 0 : index
    %236 = vector.load %arg9[%c3_193, %c0_194, %c0_195] : memref<4x8x8xbf16, #tpu.memory_space<vmem>>, vector<1x8x8xbf16>
    %237 = vector.shape_cast %236 : vector<1x8x8xbf16> to vector<8x8xbf16>
    %cst_196 = arith.constant dense<0.000000e+00> : vector<64x8xf32>
    %238 = tpu.matmul %171, %237, %cst_196 {dimension_numbers = #tpu.dot_dimension_numbers<[1], [0], [0], [1], [0, 0, 1, 1], [], []>} : vector<64x8xbf16>, vector<8x8xbf16>, vector<64x8xf32> -> vector<64x8xf32>
    %c0_197 = arith.constant 0 : index
    %c0_198 = arith.constant 0 : index
    %239 = vector.load %arg10[%c0_197, %c0_198] : memref<1x8xf32, #tpu.memory_space<vmem>>, vector<1x8xf32>
    %240 = vector.broadcast %239 : vector<1x8xf32> to vector<64x8xf32>
    %241 = arith.addf %238, %240 : vector<64x8xf32>
    %cst_199 = arith.constant 0.000000e+00 : f32
    %242 = vector.broadcast %cst_199 : f32 to vector<64x8xf32>
    %243 = arith.maximumf %241, %242 : vector<64x8xf32>
    %cst_200 = arith.constant dense<0.000000e+00> : vector<64x1xf32>
    %244 = tpu.matmul %243, %164, %cst_200 {dimension_numbers = #tpu.dot_dimension_numbers<[1], [0], [0], [1], [0, 0, 1, 1], [], []>} : vector<64x8xf32>, vector<8x1xf32>, vector<64x1xf32> -> vector<64x1xf32>
    %245 = vector.broadcast %170 : f32 to vector<64x1xf32>
    %246 = arith.addf %244, %245 : vector<64x1xf32>
    %247 = arith.negf %246 : vector<64x1xf32>
    %248 = math.exp %247 : vector<64x1xf32>
    %cst_201 = arith.constant 1.000000e+00 : f32
    %249 = vector.broadcast %cst_201 : f32 to vector<64x1xf32>
    %250 = arith.addf %249, %248 : vector<64x1xf32>
    %251 = arith.divf %249, %250 : vector<64x1xf32>
    %252 = vector.shape_cast %251 : vector<64x1xf32> to vector<8x8x1xf32>
    %c0_202 = arith.constant 0 : index
    %c0_203 = arith.constant 0 : index
    %c1_204 = arith.constant 1 : index
    %c0_205 = arith.constant 0 : index
    %c1_206 = arith.constant 1 : index
    %253 = vector.load %arg24[%c0_202, %c0_203, %c1_204, %c0_205, %c1_206] : memref<1x8x2x8x2xf32, #tpu.memory_space<vmem>>, vector<1x8x1x8x1xf32>
    %254 = vector.shape_cast %253 : vector<1x8x1x8x1xf32> to vector<8x8x1xf32>
    %255 = vector.shape_cast %252 : vector<8x8x1xf32> to vector<1x8x1x8x1xf32>
    tpu.vector_store %arg24[%c0_202, %c0_203, %c1_204, %c0_205, %c1_206], %255 {strides = array<i32>} : memref<1x8x2x8x2xf32, #tpu.memory_space<vmem>>, vector<1x8x1x8x1xf32>,
    %256 = arith.maximumf %235, %251 : vector<64x1xf32>
    %257 = vector.shape_cast %8 : vector<64x8xf32> to vector<8x8x8xf32>
    %c1_207 = arith.constant 1 : index
    %c1_208 = arith.constant 1 : index
    %c0_209 = arith.constant 0 : index
    %258 = vector.load %arg26[%c1_207, %c1_208, %c0_209] : memref<10x10x9xf32, #tpu.memory_space<vmem>>, vector<8x8x8xf32>
    tpu.vector_store %arg26[%c1_207, %c1_208, %c0_209], %257 {strides = array<i32>} : memref<10x10x9xf32, #tpu.memory_space<vmem>>, vector<8x8x8xf32>,
    %259 = vector.shape_cast %256 : vector<64x1xf32> to vector<8x8x1xf32>
    %c1_210 = arith.constant 1 : index
    %c1_211 = arith.constant 1 : index
    %c8_212 = arith.constant 8 : index
    %260 = vector.load %arg26[%c1_210, %c1_211, %c8_212] : memref<10x10x9xf32, #tpu.memory_space<vmem>>, vector<8x8x1xf32>
    tpu.vector_store %arg26[%c1_210, %c1_211, %c8_212], %259 {strides = array<i32>} : memref<10x10x9xf32, #tpu.memory_space<vmem>>, vector<8x8x1xf32>,
    %cst_213 = arith.constant 0.000000e+00 : f32
    %261 = vector.broadcast %cst_213 : f32 to vector<64x8xf32>
    %c0_214 = arith.constant 0 : index
    %c0_215 = arith.constant 0 : index
    %c0_216 = arith.constant 0 : index
    %262 = vector.load %arg26[%c0_214, %c0_215, %c0_216] : memref<10x10x9xf32, #tpu.memory_space<vmem>>, vector<8x8x9xf32>
    %263 = vector.shape_cast %262 : vector<8x8x9xf32> to vector<64x9xf32>
    %264 = arith.truncf %263 : vector<64x9xf32> to vector<64x9xbf16>
    %c0_217 = arith.constant 0 : index
    %c0_218 = arith.constant 0 : index
    %c0_219 = arith.constant 0 : index
    %265 = vector.load %arg13[%c0_217, %c0_218, %c0_219] : memref<9x9x8xbf16, #tpu.memory_space<vmem>>, vector<1x9x8xbf16>
    %266 = vector.shape_cast %265 : vector<1x9x8xbf16> to vector<9x8xbf16>
    %cst_220 = arith.constant dense<0.000000e+00> : vector<64x8xf32>
    %267 = tpu.matmul %264, %266, %cst_220 {dimension_numbers = #tpu.dot_dimension_numbers<[1], [0], [0], [1], [0, 0, 1, 1], [], []>} : vector<64x9xbf16>, vector<9x8xbf16>, vector<64x8xf32> -> vector<64x8xf32>
    %268 = arith.addf %261, %267 : vector<64x8xf32>
    %c0_221 = arith.constant 0 : index
    %c1_222 = arith.constant 1 : index
    %c0_223 = arith.constant 0 : index
    %269 = vector.load %arg26[%c0_221, %c1_222, %c0_223] : memref<10x10x9xf32, #tpu.memory_space<vmem>>, vector<8x8x9xf32>
    %270 = vector.shape_cast %269 : vector<8x8x9xf32> to vector<64x9xf32>
    %271 = arith.truncf %270 : vector<64x9xf32> to vector<64x9xbf16>
    %c1_224 = arith.constant 1 : index
    %c0_225 = arith.constant 0 : index
    %c0_226 = arith.constant 0 : index
    %272 = vector.load %arg13[%c1_224, %c0_225, %c0_226] : memref<9x9x8xbf16, #tpu.memory_space<vmem>>, vector<1x9x8xbf16>
    %273 = vector.shape_cast %272 : vector<1x9x8xbf16> to vector<9x8xbf16>
    %cst_227 = arith.constant dense<0.000000e+00> : vector<64x8xf32>
    %274 = tpu.matmul %271, %273, %cst_227 {dimension_numbers = #tpu.dot_dimension_numbers<[1], [0], [0], [1], [0, 0, 1, 1], [], []>} : vector<64x9xbf16>, vector<9x8xbf16>, vector<64x8xf32> -> vector<64x8xf32>
    %275 = arith.addf %268, %274 : vector<64x8xf32>
    %c0_228 = arith.constant 0 : index
    %c2_229 = arith.constant 2 : index
    %c0_230 = arith.constant 0 : index
    %276 = vector.load %arg26[%c0_228, %c2_229, %c0_230] : memref<10x10x9xf32, #tpu.memory_space<vmem>>, vector<8x8x9xf32>
    %277 = vector.shape_cast %276 : vector<8x8x9xf32> to vector<64x9xf32>
    %278 = arith.truncf %277 : vector<64x9xf32> to vector<64x9xbf16>
    %c2_231 = arith.constant 2 : index
    %c0_232 = arith.constant 0 : index
    %c0_233 = arith.constant 0 : index
    %279 = vector.load %arg13[%c2_231, %c0_232, %c0_233] : memref<9x9x8xbf16, #tpu.memory_space<vmem>>, vector<1x9x8xbf16>
    %280 = vector.shape_cast %279 : vector<1x9x8xbf16> to vector<9x8xbf16>
    %cst_234 = arith.constant dense<0.000000e+00> : vector<64x8xf32>
    %281 = tpu.matmul %278, %280, %cst_234 {dimension_numbers = #tpu.dot_dimension_numbers<[1], [0], [0], [1], [0, 0, 1, 1], [], []>} : vector<64x9xbf16>, vector<9x8xbf16>, vector<64x8xf32> -> vector<64x8xf32>
    %282 = arith.addf %275, %281 : vector<64x8xf32>
    %c1_235 = arith.constant 1 : index
    %c0_236 = arith.constant 0 : index
    %c0_237 = arith.constant 0 : index
    %283 = vector.load %arg26[%c1_235, %c0_236, %c0_237] : memref<10x10x9xf32, #tpu.memory_space<vmem>>, vector<8x8x9xf32>
    %284 = vector.shape_cast %283 : vector<8x8x9xf32> to vector<64x9xf32>
    %285 = arith.truncf %284 : vector<64x9xf32> to vector<64x9xbf16>
    %c3_238 = arith.constant 3 : index
    %c0_239 = arith.constant 0 : index
    %c0_240 = arith.constant 0 : index
    %286 = vector.load %arg13[%c3_238, %c0_239, %c0_240] : memref<9x9x8xbf16, #tpu.memory_space<vmem>>, vector<1x9x8xbf16>
    %287 = vector.shape_cast %286 : vector<1x9x8xbf16> to vector<9x8xbf16>
    %cst_241 = arith.constant dense<0.000000e+00> : vector<64x8xf32>
    %288 = tpu.matmul %285, %287, %cst_241 {dimension_numbers = #tpu.dot_dimension_numbers<[1], [0], [0], [1], [0, 0, 1, 1], [], []>} : vector<64x9xbf16>, vector<9x8xbf16>, vector<64x8xf32> -> vector<64x8xf32>
    %289 = arith.addf %282, %288 : vector<64x8xf32>
    %c1_242 = arith.constant 1 : index
    %c1_243 = arith.constant 1 : index
    %c0_244 = arith.constant 0 : index
    %290 = vector.load %arg26[%c1_242, %c1_243, %c0_244] : memref<10x10x9xf32, #tpu.memory_space<vmem>>, vector<8x8x9xf32>
    %291 = vector.shape_cast %290 : vector<8x8x9xf32> to vector<64x9xf32>
    %292 = arith.truncf %291 : vector<64x9xf32> to vector<64x9xbf16>
    %c4_245 = arith.constant 4 : index
    %c0_246 = arith.constant 0 : index
    %c0_247 = arith.constant 0 : index
    %293 = vector.load %arg13[%c4_245, %c0_246, %c0_247] : memref<9x9x8xbf16, #tpu.memory_space<vmem>>, vector<1x9x8xbf16>
    %294 = vector.shape_cast %293 : vector<1x9x8xbf16> to vector<9x8xbf16>
    %cst_248 = arith.constant dense<0.000000e+00> : vector<64x8xf32>
    %295 = tpu.matmul %292, %294, %cst_248 {dimension_numbers = #tpu.dot_dimension_numbers<[1], [0], [0], [1], [0, 0, 1, 1], [], []>} : vector<64x9xbf16>, vector<9x8xbf16>, vector<64x8xf32> -> vector<64x8xf32>
    %296 = arith.addf %289, %295 : vector<64x8xf32>
    %c1_249 = arith.constant 1 : index
    %c2_250 = arith.constant 2 : index
    %c0_251 = arith.constant 0 : index
    %297 = vector.load %arg26[%c1_249, %c2_250, %c0_251] : memref<10x10x9xf32, #tpu.memory_space<vmem>>, vector<8x8x9xf32>
    %298 = vector.shape_cast %297 : vector<8x8x9xf32> to vector<64x9xf32>
    %299 = arith.truncf %298 : vector<64x9xf32> to vector<64x9xbf16>
    %c5_252 = arith.constant 5 : index
    %c0_253 = arith.constant 0 : index
    %c0_254 = arith.constant 0 : index
    %300 = vector.load %arg13[%c5_252, %c0_253, %c0_254] : memref<9x9x8xbf16, #tpu.memory_space<vmem>>, vector<1x9x8xbf16>
    %301 = vector.shape_cast %300 : vector<1x9x8xbf16> to vector<9x8xbf16>
    %cst_255 = arith.constant dense<0.000000e+00> : vector<64x8xf32>
    %302 = tpu.matmul %299, %301, %cst_255 {dimension_numbers = #tpu.dot_dimension_numbers<[1], [0], [0], [1], [0, 0, 1, 1], [], []>} : vector<64x9xbf16>, vector<9x8xbf16>, vector<64x8xf32> -> vector<64x8xf32>
    %303 = arith.addf %296, %302 : vector<64x8xf32>
    %c2_256 = arith.constant 2 : index
    %c0_257 = arith.constant 0 : index
    %c0_258 = arith.constant 0 : index
    %304 = vector.load %arg26[%c2_256, %c0_257, %c0_258] : memref<10x10x9xf32, #tpu.memory_space<vmem>>, vector<8x8x9xf32>
    %305 = vector.shape_cast %304 : vector<8x8x9xf32> to vector<64x9xf32>
    %306 = arith.truncf %305 : vector<64x9xf32> to vector<64x9xbf16>
    %c6_259 = arith.constant 6 : index
    %c0_260 = arith.constant 0 : index
    %c0_261 = arith.constant 0 : index
    %307 = vector.load %arg13[%c6_259, %c0_260, %c0_261] : memref<9x9x8xbf16, #tpu.memory_space<vmem>>, vector<1x9x8xbf16>
    %308 = vector.shape_cast %307 : vector<1x9x8xbf16> to vector<9x8xbf16>
    %cst_262 = arith.constant dense<0.000000e+00> : vector<64x8xf32>
    %309 = tpu.matmul %306, %308, %cst_262 {dimension_numbers = #tpu.dot_dimension_numbers<[1], [0], [0], [1], [0, 0, 1, 1], [], []>} : vector<64x9xbf16>, vector<9x8xbf16>, vector<64x8xf32> -> vector<64x8xf32>
    %310 = arith.addf %303, %309 : vector<64x8xf32>
    %c2_263 = arith.constant 2 : index
    %c1_264 = arith.constant 1 : index
    %c0_265 = arith.constant 0 : index
    %311 = vector.load %arg26[%c2_263, %c1_264, %c0_265] : memref<10x10x9xf32, #tpu.memory_space<vmem>>, vector<8x8x9xf32>
    %312 = vector.shape_cast %311 : vector<8x8x9xf32> to vector<64x9xf32>
    %313 = arith.truncf %312 : vector<64x9xf32> to vector<64x9xbf16>
    %c7_266 = arith.constant 7 : index
    %c0_267 = arith.constant 0 : index
    %c0_268 = arith.constant 0 : index
    %314 = vector.load %arg13[%c7_266, %c0_267, %c0_268] : memref<9x9x8xbf16, #tpu.memory_space<vmem>>, vector<1x9x8xbf16>
    %315 = vector.shape_cast %314 : vector<1x9x8xbf16> to vector<9x8xbf16>
    %cst_269 = arith.constant dense<0.000000e+00> : vector<64x8xf32>
    %316 = tpu.matmul %313, %315, %cst_269 {dimension_numbers = #tpu.dot_dimension_numbers<[1], [0], [0], [1], [0, 0, 1, 1], [], []>} : vector<64x9xbf16>, vector<9x8xbf16>, vector<64x8xf32> -> vector<64x8xf32>
    %317 = arith.addf %310, %316 : vector<64x8xf32>
    %c2_270 = arith.constant 2 : index
    %c2_271 = arith.constant 2 : index
    %c0_272 = arith.constant 0 : index
    %318 = vector.load %arg26[%c2_270, %c2_271, %c0_272] : memref<10x10x9xf32, #tpu.memory_space<vmem>>, vector<8x8x9xf32>
    %319 = vector.shape_cast %318 : vector<8x8x9xf32> to vector<64x9xf32>
    %320 = arith.truncf %319 : vector<64x9xf32> to vector<64x9xbf16>
    %c8_273 = arith.constant 8 : index
    %c0_274 = arith.constant 0 : index
    %c0_275 = arith.constant 0 : index
    %321 = vector.load %arg13[%c8_273, %c0_274, %c0_275] : memref<9x9x8xbf16, #tpu.memory_space<vmem>>, vector<1x9x8xbf16>
    %322 = vector.shape_cast %321 : vector<1x9x8xbf16> to vector<9x8xbf16>
    %cst_276 = arith.constant dense<0.000000e+00> : vector<64x8xf32>
    %323 = tpu.matmul %320, %322, %cst_276 {dimension_numbers = #tpu.dot_dimension_numbers<[1], [0], [0], [1], [0, 0, 1, 1], [], []>} : vector<64x9xbf16>, vector<9x8xbf16>, vector<64x8xf32> -> vector<64x8xf32>
    %324 = arith.addf %317, %323 : vector<64x8xf32>
    %c0_277 = arith.constant 0 : index
    %c0_278 = arith.constant 0 : index
    %325 = vector.load %arg14[%c0_277, %c0_278] : memref<1x8xf32, #tpu.memory_space<vmem>>, vector<1x8xf32>
    %326 = vector.broadcast %325 : vector<1x8xf32> to vector<64x8xf32>
    %327 = arith.addf %324, %326 : vector<64x8xf32>
    %cst_279 = arith.constant 0.000000e+00 : f32
    %328 = vector.broadcast %cst_279 : f32 to vector<64x8xf32>
    %329 = arith.maximumf %327, %328 : vector<64x8xf32>
    %330 = vector.shape_cast %329 : vector<64x8xf32> to vector<8x8x8xf32>
    %c1_280 = arith.constant 1 : index
    %c1_281 = arith.constant 1 : index
    %c0_282 = arith.constant 0 : index
    %331 = vector.load %arg26[%c1_280, %c1_281, %c0_282] : memref<10x10x9xf32, #tpu.memory_space<vmem>>, vector<8x8x8xf32>
    tpu.vector_store %arg26[%c1_280, %c1_281, %c0_282], %330 {strides = array<i32>} : memref<10x10x9xf32, #tpu.memory_space<vmem>>, vector<8x8x8xf32>,
    %cst_283 = arith.constant 0.000000e+00 : f32
    %332 = vector.broadcast %cst_283 : f32 to vector<64x8xf32>
    %c0_284 = arith.constant 0 : index
    %c0_285 = arith.constant 0 : index
    %c0_286 = arith.constant 0 : index
    %333 = vector.load %arg26[%c0_284, %c0_285, %c0_286] : memref<10x10x9xf32, #tpu.memory_space<vmem>>, vector<8x8x8xf32>
    %334 = vector.shape_cast %333 : vector<8x8x8xf32> to vector<64x8xf32>
    %335 = arith.truncf %334 : vector<64x8xf32> to vector<64x8xbf16>
    %c0_287 = arith.constant 0 : index
    %c0_288 = arith.constant 0 : index
    %c0_289 = arith.constant 0 : index
    %336 = vector.load %arg15[%c0_287, %c0_288, %c0_289] : memref<9x8x8xbf16, #tpu.memory_space<vmem>>, vector<1x8x8xbf16>
    %337 = vector.shape_cast %336 : vector<1x8x8xbf16> to vector<8x8xbf16>
    %cst_290 = arith.constant dense<0.000000e+00> : vector<64x8xf32>
    %338 = tpu.matmul %335, %337, %cst_290 {dimension_numbers = #tpu.dot_dimension_numbers<[1], [0], [0], [1], [0, 0, 1, 1], [], []>} : vector<64x8xbf16>, vector<8x8xbf16>, vector<64x8xf32> -> vector<64x8xf32>
    %339 = arith.addf %332, %338 : vector<64x8xf32>
    %c0_291 = arith.constant 0 : index
    %c1_292 = arith.constant 1 : index
    %c0_293 = arith.constant 0 : index
    %340 = vector.load %arg26[%c0_291, %c1_292, %c0_293] : memref<10x10x9xf32, #tpu.memory_space<vmem>>, vector<8x8x8xf32>
    %341 = vector.shape_cast %340 : vector<8x8x8xf32> to vector<64x8xf32>
    %342 = arith.truncf %341 : vector<64x8xf32> to vector<64x8xbf16>
    %c1_294 = arith.constant 1 : index
    %c0_295 = arith.constant 0 : index
    %c0_296 = arith.constant 0 : index
    %343 = vector.load %arg15[%c1_294, %c0_295, %c0_296] : memref<9x8x8xbf16, #tpu.memory_space<vmem>>, vector<1x8x8xbf16>
    %344 = vector.shape_cast %343 : vector<1x8x8xbf16> to vector<8x8xbf16>
    %cst_297 = arith.constant dense<0.000000e+00> : vector<64x8xf32>
    %345 = tpu.matmul %342, %344, %cst_297 {dimension_numbers = #tpu.dot_dimension_numbers<[1], [0], [0], [1], [0, 0, 1, 1], [], []>} : vector<64x8xbf16>, vector<8x8xbf16>, vector<64x8xf32> -> vector<64x8xf32>
    %346 = arith.addf %339, %345 : vector<64x8xf32>
    %c0_298 = arith.constant 0 : index
    %c2_299 = arith.constant 2 : index
    %c0_300 = arith.constant 0 : index
    %347 = vector.load %arg26[%c0_298, %c2_299, %c0_300] : memref<10x10x9xf32, #tpu.memory_space<vmem>>, vector<8x8x8xf32>
    %348 = vector.shape_cast %347 : vector<8x8x8xf32> to vector<64x8xf32>
    %349 = arith.truncf %348 : vector<64x8xf32> to vector<64x8xbf16>
    %c2_301 = arith.constant 2 : index
    %c0_302 = arith.constant 0 : index
    %c0_303 = arith.constant 0 : index
    %350 = vector.load %arg15[%c2_301, %c0_302, %c0_303] : memref<9x8x8xbf16, #tpu.memory_space<vmem>>, vector<1x8x8xbf16>
    %351 = vector.shape_cast %350 : vector<1x8x8xbf16> to vector<8x8xbf16>
    %cst_304 = arith.constant dense<0.000000e+00> : vector<64x8xf32>
    %352 = tpu.matmul %349, %351, %cst_304 {dimension_numbers = #tpu.dot_dimension_numbers<[1], [0], [0], [1], [0, 0, 1, 1], [], []>} : vector<64x8xbf16>, vector<8x8xbf16>, vector<64x8xf32> -> vector<64x8xf32>
    %353 = arith.addf %346, %352 : vector<64x8xf32>
    %c1_305 = arith.constant 1 : index
    %c0_306 = arith.constant 0 : index
    %c0_307 = arith.constant 0 : index
    %354 = vector.load %arg26[%c1_305, %c0_306, %c0_307] : memref<10x10x9xf32, #tpu.memory_space<vmem>>, vector<8x8x8xf32>
    %355 = vector.shape_cast %354 : vector<8x8x8xf32> to vector<64x8xf32>
    %356 = arith.truncf %355 : vector<64x8xf32> to vector<64x8xbf16>
    %c3_308 = arith.constant 3 : index
    %c0_309 = arith.constant 0 : index
    %c0_310 = arith.constant 0 : index
    %357 = vector.load %arg15[%c3_308, %c0_309, %c0_310] : memref<9x8x8xbf16, #tpu.memory_space<vmem>>, vector<1x8x8xbf16>
    %358 = vector.shape_cast %357 : vector<1x8x8xbf16> to vector<8x8xbf16>
    %cst_311 = arith.constant dense<0.000000e+00> : vector<64x8xf32>
    %359 = tpu.matmul %356, %358, %cst_311 {dimension_numbers = #tpu.dot_dimension_numbers<[1], [0], [0], [1], [0, 0, 1, 1], [], []>} : vector<64x8xbf16>, vector<8x8xbf16>, vector<64x8xf32> -> vector<64x8xf32>
    %360 = arith.addf %353, %359 : vector<64x8xf32>
    %c1_312 = arith.constant 1 : index
    %c1_313 = arith.constant 1 : index
    %c0_314 = arith.constant 0 : index
    %361 = vector.load %arg26[%c1_312, %c1_313, %c0_314] : memref<10x10x9xf32, #tpu.memory_space<vmem>>, vector<8x8x8xf32>
    %362 = vector.shape_cast %361 : vector<8x8x8xf32> to vector<64x8xf32>
    %363 = arith.truncf %362 : vector<64x8xf32> to vector<64x8xbf16>
    %c4_315 = arith.constant 4 : index
    %c0_316 = arith.constant 0 : index
    %c0_317 = arith.constant 0 : index
    %364 = vector.load %arg15[%c4_315, %c0_316, %c0_317] : memref<9x8x8xbf16, #tpu.memory_space<vmem>>, vector<1x8x8xbf16>
    %365 = vector.shape_cast %364 : vector<1x8x8xbf16> to vector<8x8xbf16>
    %cst_318 = arith.constant dense<0.000000e+00> : vector<64x8xf32>
    %366 = tpu.matmul %363, %365, %cst_318 {dimension_numbers = #tpu.dot_dimension_numbers<[1], [0], [0], [1], [0, 0, 1, 1], [], []>} : vector<64x8xbf16>, vector<8x8xbf16>, vector<64x8xf32> -> vector<64x8xf32>
    %367 = arith.addf %360, %366 : vector<64x8xf32>
    %c1_319 = arith.constant 1 : index
    %c2_320 = arith.constant 2 : index
    %c0_321 = arith.constant 0 : index
    %368 = vector.load %arg26[%c1_319, %c2_320, %c0_321] : memref<10x10x9xf32, #tpu.memory_space<vmem>>, vector<8x8x8xf32>
    %369 = vector.shape_cast %368 : vector<8x8x8xf32> to vector<64x8xf32>
    %370 = arith.truncf %369 : vector<64x8xf32> to vector<64x8xbf16>
    %c5_322 = arith.constant 5 : index
    %c0_323 = arith.constant 0 : index
    %c0_324 = arith.constant 0 : index
    %371 = vector.load %arg15[%c5_322, %c0_323, %c0_324] : memref<9x8x8xbf16, #tpu.memory_space<vmem>>, vector<1x8x8xbf16>
    %372 = vector.shape_cast %371 : vector<1x8x8xbf16> to vector<8x8xbf16>
    %cst_325 = arith.constant dense<0.000000e+00> : vector<64x8xf32>
    %373 = tpu.matmul %370, %372, %cst_325 {dimension_numbers = #tpu.dot_dimension_numbers<[1], [0], [0], [1], [0, 0, 1, 1], [], []>} : vector<64x8xbf16>, vector<8x8xbf16>, vector<64x8xf32> -> vector<64x8xf32>
    %374 = arith.addf %367, %373 : vector<64x8xf32>
    %c2_326 = arith.constant 2 : index
    %c0_327 = arith.constant 0 : index
    %c0_328 = arith.constant 0 : index
    %375 = vector.load %arg26[%c2_326, %c0_327, %c0_328] : memref<10x10x9xf32, #tpu.memory_space<vmem>>, vector<8x8x8xf32>
    %376 = vector.shape_cast %375 : vector<8x8x8xf32> to vector<64x8xf32>
    %377 = arith.truncf %376 : vector<64x8xf32> to vector<64x8xbf16>
    %c6_329 = arith.constant 6 : index
    %c0_330 = arith.constant 0 : index
    %c0_331 = arith.constant 0 : index
    %378 = vector.load %arg15[%c6_329, %c0_330, %c0_331] : memref<9x8x8xbf16, #tpu.memory_space<vmem>>, vector<1x8x8xbf16>
    %379 = vector.shape_cast %378 : vector<1x8x8xbf16> to vector<8x8xbf16>
    %cst_332 = arith.constant dense<0.000000e+00> : vector<64x8xf32>
    %380 = tpu.matmul %377, %379, %cst_332 {dimension_numbers = #tpu.dot_dimension_numbers<[1], [0], [0], [1], [0, 0, 1, 1], [], []>} : vector<64x8xbf16>, vector<8x8xbf16>, vector<64x8xf32> -> vector<64x8xf32>
    %381 = arith.addf %374, %380 : vector<64x8xf32>
    %c2_333 = arith.constant 2 : index
    %c1_334 = arith.constant 1 : index
    %c0_335 = arith.constant 0 : index
    %382 = vector.load %arg26[%c2_333, %c1_334, %c0_335] : memref<10x10x9xf32, #tpu.memory_space<vmem>>, vector<8x8x8xf32>
    %383 = vector.shape_cast %382 : vector<8x8x8xf32> to vector<64x8xf32>
    %384 = arith.truncf %383 : vector<64x8xf32> to vector<64x8xbf16>
    %c7_336 = arith.constant 7 : index
    %c0_337 = arith.constant 0 : index
    %c0_338 = arith.constant 0 : index
    %385 = vector.load %arg15[%c7_336, %c0_337, %c0_338] : memref<9x8x8xbf16, #tpu.memory_space<vmem>>, vector<1x8x8xbf16>
    %386 = vector.shape_cast %385 : vector<1x8x8xbf16> to vector<8x8xbf16>
    %cst_339 = arith.constant dense<0.000000e+00> : vector<64x8xf32>
    %387 = tpu.matmul %384, %386, %cst_339 {dimension_numbers = #tpu.dot_dimension_numbers<[1], [0], [0], [1], [0, 0, 1, 1], [], []>} : vector<64x8xbf16>, vector<8x8xbf16>, vector<64x8xf32> -> vector<64x8xf32>
    %388 = arith.addf %381, %387 : vector<64x8xf32>
    %c2_340 = arith.constant 2 : index
    %c2_341 = arith.constant 2 : index
    %c0_342 = arith.constant 0 : index
    %389 = vector.load %arg26[%c2_340, %c2_341, %c0_342] : memref<10x10x9xf32, #tpu.memory_space<vmem>>, vector<8x8x8xf32>
    %390 = vector.shape_cast %389 : vector<8x8x8xf32> to vector<64x8xf32>
    %391 = arith.truncf %390 : vector<64x8xf32> to vector<64x8xbf16>
    %c8_343 = arith.constant 8 : index
    %c0_344 = arith.constant 0 : index
    %c0_345 = arith.constant 0 : index
    %392 = vector.load %arg15[%c8_343, %c0_344, %c0_345] : memref<9x8x8xbf16, #tpu.memory_space<vmem>>, vector<1x8x8xbf16>
    %393 = vector.shape_cast %392 : vector<1x8x8xbf16> to vector<8x8xbf16>
    %cst_346 = arith.constant dense<0.000000e+00> : vector<64x8xf32>
    %394 = tpu.matmul %391, %393, %cst_346 {dimension_numbers = #tpu.dot_dimension_numbers<[1], [0], [0], [1], [0, 0, 1, 1], [], []>} : vector<64x8xbf16>, vector<8x8xbf16>, vector<64x8xf32> -> vector<64x8xf32>
    %395 = arith.addf %388, %394 : vector<64x8xf32>
    %c0_347 = arith.constant 0 : index
    %c0_348 = arith.constant 0 : index
    %396 = vector.load %arg16[%c0_347, %c0_348] : memref<1x8xf32, #tpu.memory_space<vmem>>, vector<1x8xf32>
    %397 = vector.broadcast %396 : vector<1x8xf32> to vector<64x8xf32>
    %398 = arith.addf %395, %397 : vector<64x8xf32>
    %cst_349 = arith.constant 0.000000e+00 : f32
    %399 = vector.broadcast %cst_349 : f32 to vector<64x8xf32>
    %400 = arith.maximumf %398, %399 : vector<64x8xf32>
    %c0_350 = arith.constant 0 : index
    %c0_351 = arith.constant 0 : index
    %401 = vector.load %arg18[%c0_350, %c0_351] : memref<128x1xf32, #tpu.memory_space<vmem>>, vector<128x1xf32>
    %402 = vector.extract_strided_slice %400 {offsets = [0, 0], sizes = [64, 1], strides = [1, 1]} : vector<64x8xf32> to vector<64x1xf32>
    %403 = arith.truncf %402 : vector<64x1xf32> to vector<64x1xbf16>
    %c0_352 = arith.constant 0 : index
    %c0_353 = arith.constant 0 : index
    %c0_354 = arith.constant 0 : index
    %404 = vector.load %arg17[%c0_352, %c0_353, %c0_354] : memref<8x128x64xbf16, #tpu.memory_space<vmem>>, vector<1x128x64xbf16>
    %405 = vector.shape_cast %404 : vector<1x128x64xbf16> to vector<128x64xbf16>
    %cst_355 = arith.constant dense<0.000000e+00> : vector<128x1xf32>
    %406 = tpu.matmul %405, %403, %cst_355 {dimension_numbers = #tpu.dot_dimension_numbers<[1], [0], [0], [1], [0, 0, 1, 1], [], []>} : vector<128x64xbf16>, vector<64x1xbf16>, vector<128x1xf32> -> vector<128x1xf32>
    %407 = arith.addf %401, %406 : vector<128x1xf32>
    %408 = vector.extract_strided_slice %400 {offsets = [0, 1], sizes = [64, 1], strides = [1, 1]} : vector<64x8xf32> to vector<64x1xf32>
    %409 = arith.truncf %408 : vector<64x1xf32> to vector<64x1xbf16>
    %c1_356 = arith.constant 1 : index
    %c0_357 = arith.constant 0 : index
    %c0_358 = arith.constant 0 : index
    %410 = vector.load %arg17[%c1_356, %c0_357, %c0_358] : memref<8x128x64xbf16, #tpu.memory_space<vmem>>, vector<1x128x64xbf16>
    %411 = vector.shape_cast %410 : vector<1x128x64xbf16> to vector<128x64xbf16>
    %cst_359 = arith.constant dense<0.000000e+00> : vector<128x1xf32>
    %412 = tpu.matmul %411, %409, %cst_359 {dimension_numbers = #tpu.dot_dimension_numbers<[1], [0], [0], [1], [0, 0, 1, 1], [], []>} : vector<128x64xbf16>, vector<64x1xbf16>, vector<128x1xf32> -> vector<128x1xf32>
    %413 = arith.addf %407, %412 : vector<128x1xf32>
    %414 = vector.extract_strided_slice %400 {offsets = [0, 2], sizes = [64, 1], strides = [1, 1]} : vector<64x8xf32> to vector<64x1xf32>
    %415 = arith.truncf %414 : vector<64x1xf32> to vector<64x1xbf16>
    %c2_360 = arith.constant 2 : index
    %c0_361 = arith.constant 0 : index
    %c0_362 = arith.constant 0 : index
    %416 = vector.load %arg17[%c2_360, %c0_361, %c0_362] : memref<8x128x64xbf16, #tpu.memory_space<vmem>>, vector<1x128x64xbf16>
    %417 = vector.shape_cast %416 : vector<1x128x64xbf16> to vector<128x64xbf16>
    %cst_363 = arith.constant dense<0.000000e+00> : vector<128x1xf32>
    %418 = tpu.matmul %417, %415, %cst_363 {dimension_numbers = #tpu.dot_dimension_numbers<[1], [0], [0], [1], [0, 0, 1, 1], [], []>} : vector<128x64xbf16>, vector<64x1xbf16>, vector<128x1xf32> -> vector<128x1xf32>
    %419 = arith.addf %413, %418 : vector<128x1xf32>
    %420 = vector.extract_strided_slice %400 {offsets = [0, 3], sizes = [64, 1], strides = [1, 1]} : vector<64x8xf32> to vector<64x1xf32>
    %421 = arith.truncf %420 : vector<64x1xf32> to vector<64x1xbf16>
    %c3_364 = arith.constant 3 : index
    %c0_365 = arith.constant 0 : index
    %c0_366 = arith.constant 0 : index
    %422 = vector.load %arg17[%c3_364, %c0_365, %c0_366] : memref<8x128x64xbf16, #tpu.memory_space<vmem>>, vector<1x128x64xbf16>
    %423 = vector.shape_cast %422 : vector<1x128x64xbf16> to vector<128x64xbf16>
    %cst_367 = arith.constant dense<0.000000e+00> : vector<128x1xf32>
    %424 = tpu.matmul %423, %421, %cst_367 {dimension_numbers = #tpu.dot_dimension_numbers<[1], [0], [0], [1], [0, 0, 1, 1], [], []>} : vector<128x64xbf16>, vector<64x1xbf16>, vector<128x1xf32> -> vector<128x1xf32>
    %425 = arith.addf %419, %424 : vector<128x1xf32>
    %426 = vector.extract_strided_slice %400 {offsets = [0, 4], sizes = [64, 1], strides = [1, 1]} : vector<64x8xf32> to vector<64x1xf32>
    %427 = arith.truncf %426 : vector<64x1xf32> to vector<64x1xbf16>
    %c4_368 = arith.constant 4 : index
    %c0_369 = arith.constant 0 : index
    %c0_370 = arith.constant 0 : index
    %428 = vector.load %arg17[%c4_368, %c0_369, %c0_370] : memref<8x128x64xbf16, #tpu.memory_space<vmem>>, vector<1x128x64xbf16>
    %429 = vector.shape_cast %428 : vector<1x128x64xbf16> to vector<128x64xbf16>
    %cst_371 = arith.constant dense<0.000000e+00> : vector<128x1xf32>
    %430 = tpu.matmul %429, %427, %cst_371 {dimension_numbers = #tpu.dot_dimension_numbers<[1], [0], [0], [1], [0, 0, 1, 1], [], []>} : vector<128x64xbf16>, vector<64x1xbf16>, vector<128x1xf32> -> vector<128x1xf32>
    %431 = arith.addf %425, %430 : vector<128x1xf32>
    %432 = vector.extract_strided_slice %400 {offsets = [0, 5], sizes = [64, 1], strides = [1, 1]} : vector<64x8xf32> to vector<64x1xf32>
    %433 = arith.truncf %432 : vector<64x1xf32> to vector<64x1xbf16>
    %c5_372 = arith.constant 5 : index
    %c0_373 = arith.constant 0 : index
    %c0_374 = arith.constant 0 : index
    %434 = vector.load %arg17[%c5_372, %c0_373, %c0_374] : memref<8x128x64xbf16, #tpu.memory_space<vmem>>, vector<1x128x64xbf16>
    %435 = vector.shape_cast %434 : vector<1x128x64xbf16> to vector<128x64xbf16>
    %cst_375 = arith.constant dense<0.000000e+00> : vector<128x1xf32>
    %436 = tpu.matmul %435, %433, %cst_375 {dimension_numbers = #tpu.dot_dimension_numbers<[1], [0], [0], [1], [0, 0, 1, 1], [], []>} : vector<128x64xbf16>, vector<64x1xbf16>, vector<128x1xf32> -> vector<128x1xf32>
    %437 = arith.addf %431, %436 : vector<128x1xf32>
    %438 = vector.extract_strided_slice %400 {offsets = [0, 6], sizes = [64, 1], strides = [1, 1]} : vector<64x8xf32> to vector<64x1xf32>
    %439 = arith.truncf %438 : vector<64x1xf32> to vector<64x1xbf16>
    %c6_376 = arith.constant 6 : index
    %c0_377 = arith.constant 0 : index
    %c0_378 = arith.constant 0 : index
    %440 = vector.load %arg17[%c6_376, %c0_377, %c0_378] : memref<8x128x64xbf16, #tpu.memory_space<vmem>>, vector<1x128x64xbf16>
    %441 = vector.shape_cast %440 : vector<1x128x64xbf16> to vector<128x64xbf16>
    %cst_379 = arith.constant dense<0.000000e+00> : vector<128x1xf32>
    %442 = tpu.matmul %441, %439, %cst_379 {dimension_numbers = #tpu.dot_dimension_numbers<[1], [0], [0], [1], [0, 0, 1, 1], [], []>} : vector<128x64xbf16>, vector<64x1xbf16>, vector<128x1xf32> -> vector<128x1xf32>
    %443 = arith.addf %437, %442 : vector<128x1xf32>
    %444 = vector.extract_strided_slice %400 {offsets = [0, 7], sizes = [64, 1], strides = [1, 1]} : vector<64x8xf32> to vector<64x1xf32>
    %445 = arith.truncf %444 : vector<64x1xf32> to vector<64x1xbf16>
    %c7_380 = arith.constant 7 : index
    %c0_381 = arith.constant 0 : index
    %c0_382 = arith.constant 0 : index
    %446 = vector.load %arg17[%c7_380, %c0_381, %c0_382] : memref<8x128x64xbf16, #tpu.memory_space<vmem>>, vector<1x128x64xbf16>
    %447 = vector.shape_cast %446 : vector<1x128x64xbf16> to vector<128x64xbf16>
    %cst_383 = arith.constant dense<0.000000e+00> : vector<128x1xf32>
    %448 = tpu.matmul %447, %445, %cst_383 {dimension_numbers = #tpu.dot_dimension_numbers<[1], [0], [0], [1], [0, 0, 1, 1], [], []>} : vector<128x64xbf16>, vector<64x1xbf16>, vector<128x1xf32> -> vector<128x1xf32>
    %449 = arith.addf %443, %448 : vector<128x1xf32>
    %cst_384 = arith.constant 0.000000e+00 : f32
    %450 = vector.broadcast %cst_384 : f32 to vector<128x1xf32>
    %451 = arith.maximumf %449, %450 : vector<128x1xf32>
    %c0_385 = arith.constant 0 : index
    %c0_386 = arith.constant 0 : index
    %452 = vector.load %arg19[%c0_385, %c0_386] : memref<128x128xbf16, #tpu.memory_space<vmem>>, vector<128x128xbf16>
    %453 = arith.truncf %451 : vector<128x1xf32> to vector<128x1xbf16>
    %cst_387 = arith.constant dense<0.000000e+00> : vector<128x1xf32>
    %454 = tpu.matmul %452, %453, %cst_387 {dimension_numbers = #tpu.dot_dimension_numbers<[1], [0], [0], [1], [0, 0, 1, 1], [], []>} : vector<128x128xbf16>, vector<128x1xbf16>, vector<128x1xf32> -> vector<128x1xf32>
    %c0_388 = arith.constant 0 : index
    %c0_389 = arith.constant 0 : index
    %455 = vector.load %arg20[%c0_388, %c0_389] : memref<128x1xf32, #tpu.memory_space<vmem>>, vector<128x1xf32>
    %456 = arith.addf %454, %455 : vector<128x1xf32>
    %cst_390 = arith.constant 0.000000e+00 : f32
    %457 = vector.broadcast %cst_390 : f32 to vector<128x1xf32>
    %458 = arith.maximumf %456, %457 : vector<128x1xf32>
    %c0_391 = arith.constant 0 : index
    %c0_392 = arith.constant 0 : index
    %459 = vector.load %arg21[%c0_391, %c0_392] : memref<4x128xbf16, #tpu.memory_space<vmem>>, vector<4x128xbf16>
    %460 = arith.truncf %458 : vector<128x1xf32> to vector<128x1xbf16>
    %cst_393 = arith.constant dense<0.000000e+00> : vector<4x1xf32>
    %461 = tpu.matmul %459, %460, %cst_393 {dimension_numbers = #tpu.dot_dimension_numbers<[1], [0], [0], [1], [0, 0, 1, 1], [], []>} : vector<4x128xbf16>, vector<128x1xbf16>, vector<4x1xf32> -> vector<4x1xf32>
    %c0_394 = arith.constant 0 : index
    %c0_395 = arith.constant 0 : index
    %462 = vector.load %arg22[%c0_394, %c0_395] : memref<4x1xf32, #tpu.memory_space<vmem>>, vector<4x1xf32>
    %463 = arith.addf %461, %462 : vector<4x1xf32>
    %cst_396 = arith.constant dense<0.000000e+00> : vector<1x1xf32>
    %464 = tpu.matmul %157, %463, %cst_396 {dimension_numbers = #tpu.dot_dimension_numbers<[1], [0], [0], [1], [0, 0, 1, 1], [], []>} : vector<1x4xf32>, vector<4x1xf32>, vector<1x1xf32> -> vector<1x1xf32>
    %465 = vector.shape_cast %464 : vector<1x1xf32> to vector<1x1x1xf32>
    %c0_397 = arith.constant 0 : index
    %c0_398 = arith.constant 0 : index
    %c0_399 = arith.constant 0 : index
    %466 = vector.load %arg25[%c0_397, %c0_398, %c0_399] : memref<1x1x1xf32, #tpu.memory_space<vmem>>, vector<1x1x1xf32>
    tpu.vector_store %arg25[%c0_397, %c0_398, %c0_399], %465 {strides = array<i32>} : memref<1x1x1xf32, #tpu.memory_space<vmem>>, vector<1x1x1xf32>,
    return
  }
  func.func @transform_0(%arg0: i32, %arg1: memref<6xi32, #tpu.memory_space<smem>>, %arg2: memref<6xi32, #tpu.memory_space<smem>>) -> (i32, i32, i32) {
    %0 = arith.index_cast %arg0 : i32 to index
    %1 = memref.load %arg1[%0] : memref<6xi32, #tpu.memory_space<smem>>
    %c0_i32 = arith.constant 0 : i32
    %c0_i32_0 = arith.constant 0 : i32
    %c0_i32_1 = arith.constant 0 : i32
    return %1, %c0_i32, %c0_i32_0 : i32, i32, i32
  }
  func.func @transform_1(%arg0: i32, %arg1: memref<6xi32, #tpu.memory_space<smem>>, %arg2: memref<6xi32, #tpu.memory_space<smem>>) -> (i32, i32, i32) {
    %c0_i32 = arith.constant 0 : i32
    %c0_i32_0 = arith.constant 0 : i32
    %c0_i32_1 = arith.constant 0 : i32
    return %arg0, %c0_i32, %c0_i32_0 : i32, i32, i32
  }
  func.func @transform_2(%arg0: i32, %arg1: memref<6xi32, #tpu.memory_space<smem>>, %arg2: memref<6xi32, #tpu.memory_space<smem>>) -> (i32, i32, i32) {
    %c0_i32 = arith.constant 0 : i32
    %c0_i32_0 = arith.constant 0 : i32
    %c0_i32_1 = arith.constant 0 : i32
    %c0_i32_2 = arith.constant 0 : i32
    return %c0_i32, %c0_i32_0, %c0_i32_1 : i32, i32, i32
  }
  func.func @transform_3(%arg0: i32, %arg1: memref<6xi32, #tpu.memory_space<smem>>, %arg2: memref<6xi32, #tpu.memory_space<smem>>) -> (i32, i32) {
    %c0_i32 = arith.constant 0 : i32
    %c0_i32_0 = arith.constant 0 : i32
    %c0_i32_1 = arith.constant 0 : i32
    return %c0_i32, %c0_i32_0 : i32, i32
  }
  func.func @transform_4(%arg0: i32, %arg1: memref<6xi32, #tpu.memory_space<smem>>, %arg2: memref<6xi32, #tpu.memory_space<smem>>) -> (i32, i32, i32) {
    %c0_i32 = arith.constant 0 : i32
    %c0_i32_0 = arith.constant 0 : i32
    %c0_i32_1 = arith.constant 0 : i32
    %c0_i32_2 = arith.constant 0 : i32
    return %c0_i32, %c0_i32_0, %c0_i32_1 : i32, i32, i32
  }
  func.func @transform_5(%arg0: i32, %arg1: memref<6xi32, #tpu.memory_space<smem>>, %arg2: memref<6xi32, #tpu.memory_space<smem>>) -> (i32, i32) {
    %c0_i32 = arith.constant 0 : i32
    %c0_i32_0 = arith.constant 0 : i32
    %c0_i32_1 = arith.constant 0 : i32
    return %c0_i32, %c0_i32_0 : i32, i32
  }
  func.func @transform_6(%arg0: i32, %arg1: memref<6xi32, #tpu.memory_space<smem>>, %arg2: memref<6xi32, #tpu.memory_space<smem>>) -> (i32, i32, i32) {
    %c0_i32 = arith.constant 0 : i32
    %c0_i32_0 = arith.constant 0 : i32
    %c0_i32_1 = arith.constant 0 : i32
    %c0_i32_2 = arith.constant 0 : i32
    return %c0_i32, %c0_i32_0, %c0_i32_1 : i32, i32, i32
  }
  func.func @transform_7(%arg0: i32, %arg1: memref<6xi32, #tpu.memory_space<smem>>, %arg2: memref<6xi32, #tpu.memory_space<smem>>) -> (i32, i32) {
    %c0_i32 = arith.constant 0 : i32
    %c0_i32_0 = arith.constant 0 : i32
    %c0_i32_1 = arith.constant 0 : i32
    return %c0_i32, %c0_i32_0 : i32, i32
  }
  func.func @transform_8(%arg0: i32, %arg1: memref<6xi32, #tpu.memory_space<smem>>, %arg2: memref<6xi32, #tpu.memory_space<smem>>) -> (i32, i32) {
    %c0_i32 = arith.constant 0 : i32
    %c0_i32_0 = arith.constant 0 : i32
    %c0_i32_1 = arith.constant 0 : i32
    return %c0_i32, %c0_i32_0 : i32, i32
  }
  func.func @transform_9(%arg0: i32, %arg1: memref<6xi32, #tpu.memory_space<smem>>, %arg2: memref<6xi32, #tpu.memory_space<smem>>) -> (i32, i32) {
    %c0_i32 = arith.constant 0 : i32
    %c0_i32_0 = arith.constant 0 : i32
    %c0_i32_1 = arith.constant 0 : i32
    return %c0_i32, %c0_i32_0 : i32, i32
  }
  func.func @transform_10(%arg0: i32, %arg1: memref<6xi32, #tpu.memory_space<smem>>, %arg2: memref<6xi32, #tpu.memory_space<smem>>) -> (i32, i32, i32) {
    %c0_i32 = arith.constant 0 : i32
    %c0_i32_0 = arith.constant 0 : i32
    %c0_i32_1 = arith.constant 0 : i32
    %c0_i32_2 = arith.constant 0 : i32
    return %c0_i32, %c0_i32_0, %c0_i32_1 : i32, i32, i32
  }
  func.func @transform_11(%arg0: i32, %arg1: memref<6xi32, #tpu.memory_space<smem>>, %arg2: memref<6xi32, #tpu.memory_space<smem>>) -> (i32, i32) {
    %c0_i32 = arith.constant 0 : i32
    %c0_i32_0 = arith.constant 0 : i32
    %c0_i32_1 = arith.constant 0 : i32
    return %c0_i32, %c0_i32_0 : i32, i32
  }
  func.func @transform_12(%arg0: i32, %arg1: memref<6xi32, #tpu.memory_space<smem>>, %arg2: memref<6xi32, #tpu.memory_space<smem>>) -> (i32, i32, i32) {
    %c0_i32 = arith.constant 0 : i32
    %c0_i32_0 = arith.constant 0 : i32
    %c0_i32_1 = arith.constant 0 : i32
    %c0_i32_2 = arith.constant 0 : i32
    return %c0_i32, %c0_i32_0, %c0_i32_1 : i32, i32, i32
  }
  func.func @transform_13(%arg0: i32, %arg1: memref<6xi32, #tpu.memory_space<smem>>, %arg2: memref<6xi32, #tpu.memory_space<smem>>) -> (i32, i32) {
    %c0_i32 = arith.constant 0 : i32
    %c0_i32_0 = arith.constant 0 : i32
    %c0_i32_1 = arith.constant 0 : i32
    return %c0_i32, %c0_i32_0 : i32, i32
  }
  func.func @transform_14(%arg0: i32, %arg1: memref<6xi32, #tpu.memory_space<smem>>, %arg2: memref<6xi32, #tpu.memory_space<smem>>) -> (i32, i32, i32) {
    %c0_i32 = arith.constant 0 : i32
    %c0_i32_0 = arith.constant 0 : i32
    %c0_i32_1 = arith.constant 0 : i32
    %c0_i32_2 = arith.constant 0 : i32
    return %c0_i32, %c0_i32_0, %c0_i32_1 : i32, i32, i32
  }
  func.func @transform_15(%arg0: i32, %arg1: memref<6xi32, #tpu.memory_space<smem>>, %arg2: memref<6xi32, #tpu.memory_space<smem>>) -> (i32, i32) {
    %c0_i32 = arith.constant 0 : i32
    %c0_i32_0 = arith.constant 0 : i32
    %c0_i32_1 = arith.constant 0 : i32
    return %c0_i32, %c0_i32_0 : i32, i32
  }
  func.func @transform_16(%arg0: i32, %arg1: memref<6xi32, #tpu.memory_space<smem>>, %arg2: memref<6xi32, #tpu.memory_space<smem>>) -> (i32, i32) {
    %c0_i32 = arith.constant 0 : i32
    %c0_i32_0 = arith.constant 0 : i32
    %c0_i32_1 = arith.constant 0 : i32
    return %c0_i32, %c0_i32_0 : i32, i32
  }
  func.func @transform_17(%arg0: i32, %arg1: memref<6xi32, #tpu.memory_space<smem>>, %arg2: memref<6xi32, #tpu.memory_space<smem>>) -> (i32, i32) {
    %c0_i32 = arith.constant 0 : i32
    %c0_i32_0 = arith.constant 0 : i32
    %c0_i32_1 = arith.constant 0 : i32
    return %c0_i32, %c0_i32_0 : i32, i32
  }
  func.func @transform_18(%arg0: i32, %arg1: memref<6xi32, #tpu.memory_space<smem>>, %arg2: memref<6xi32, #tpu.memory_space<smem>>) -> (i32, i32) {
    %c0_i32 = arith.constant 0 : i32
    %c0_i32_0 = arith.constant 0 : i32
    %c0_i32_1 = arith.constant 0 : i32
    return %c0_i32, %c0_i32_0 : i32, i32
  }
  func.func @transform_19(%arg0: i32, %arg1: memref<6xi32, #tpu.memory_space<smem>>, %arg2: memref<6xi32, #tpu.memory_space<smem>>) -> (i32, i32) {
    %c0_i32 = arith.constant 0 : i32
    %c0_i32_0 = arith.constant 0 : i32
    %c0_i32_1 = arith.constant 0 : i32
    return %c0_i32, %c0_i32_0 : i32, i32
  }
  func.func @transform_20(%arg0: i32, %arg1: memref<6xi32, #tpu.memory_space<smem>>, %arg2: memref<6xi32, #tpu.memory_space<smem>>) -> (i32, i32, i32) {
    %c0_i32 = arith.constant 0 : i32
    %c0_i32_0 = arith.constant 0 : i32
    %c0_i32_1 = arith.constant 0 : i32
    return %arg0, %c0_i32, %c0_i32_0 : i32, i32, i32
  }
  func.func @transform_21(%arg0: i32, %arg1: memref<6xi32, #tpu.memory_space<smem>>, %arg2: memref<6xi32, #tpu.memory_space<smem>>) -> (i32, i32, i32, i32, i32) {
    %c0_i32 = arith.constant 0 : i32
    %c0_i32_0 = arith.constant 0 : i32
    %c0_i32_1 = arith.constant 0 : i32
    %c0_i32_2 = arith.constant 0 : i32
    %c0_i32_3 = arith.constant 0 : i32
    return %arg0, %c0_i32, %c0_i32_0, %c0_i32_1, %c0_i32_2 : i32, i32, i32, i32, i32
  }
  func.func @transform_22(%arg0: i32, %arg1: memref<6xi32, #tpu.memory_space<smem>>, %arg2: memref<6xi32, #tpu.memory_space<smem>>) -> (i32, i32, i32) {
    %c0_i32 = arith.constant 0 : i32
    %c0_i32_0 = arith.constant 0 : i32
    %c0_i32_1 = arith.constant 0 : i32
    return %arg0, %c0_i32, %c0_i32_0 : i32, i32, i32
  }
}

</mosaic_0001>

<bundles_post_ra>
// kernel: tpu_custom_call.1
= control target key start
LH: loop header
LB: loop body
LE: loop exit
PB: predicated region body
PF: predicated region fallthrough
CT: control target
= control target key end

     0   :  { %s12212_s0 = inlined_call_operand.vmem [shape: s32[6], index: 0, kind: input, shape index: {}]   ;;  %s12213_s2 = inlined_call_operand.vmem [shape: f32[2,256,8], index: 2, kind: input, shape index: {}]   ;;  %s12214_s3 = inlined_call_operand.vmem [shape: f32[6,64,256], index: 3, kind: input, shape index: {}]   ;;  %s12215_s4 = inlined_call_operand.vmem [shape: bf16[9,8,8], index: 4, kind: input, shape index: {}]   ;;  %s12216_s5 = inlined_call_operand.vmem [shape: f32[1,8], index: 5, kind: input, shape index: {}]   ;;  %s12217_s6 = inlined_call_operand.vmem [shape: bf16[9,8,8], index: 6, kind: input, shape index: {}]   ;;  %s12218_s7 = inlined_call_operand.vmem [shape: f32[1,8], index: 7, kind: input, shape index: {}]   ;;  %s12219_s8 = inlined_call_operand.vmem [shape: bf16[4,8,8], index: 8, kind: input, shape index: {}]   ;;  %s12220_s9 = inlined_call_operand.vmem [shape: f32[1,8], index: 9, kind: input, shape index: {}]   ;;  %s12221_s10 = inlined_call_operand.vmem [shape: f32[8,4], index: 10, kind: input, shape index: {}]   ;;  %s12222_s11 = inlined_call_operand.vmem [shape: f32[1,4], index: 11, kind: input, shape index: {}]   ;;  %s12223_s12 = inlined_call_operand.vmem [shape: bf16[9,9,8], index: 12, kind: input, shape index: {}]   ;;  %s12224_s13 = inlined_call_operand.vmem [shape: f32[1,8], index: 13, kind: input, shape index: {}]   ;;  %s12225_s14 = inlined_call_operand.vmem [shape: bf16[9,8,8], index: 14, kind: input, shape index: {}]   ;;  %s12226_s15 = inlined_call_operand.vmem [shape: f32[1,8], index: 15, kind: input, shape index: {}]   ;;  %s12227_s16 = inlined_call_operand.vmem [shape: bf16[8,128,64], index: 16, kind: input, shape index: {}]   ;;  %s12228_s17 = inlined_call_operand.vmem [shape: f32[128,1], index: 17, kind: input, shape index: {}]   ;;  %s12229_s18 = inlined_call_operand.vmem [shape: bf16[128,128], index: 18, kind: input, shape index: {}]   ;;  %s12230_s19 = inlined_call_operand.vmem [shape: f32[128,1], index: 19, kind: input, shape index: {}]   ;;  %s12231_s20 = inlined_call_operand.vmem [shape: bf16[4,128], index: 20, kind: input, shape index: {}]   ;;  %s12232_s21 = inlined_call_operand.vmem [shape: f32[4,1], index: 21, kind: input, shape index: {}]   ;;  %s12233_s22 = inlined_call_operand.vmem [shape: f32[6,64,8], index: 22, kind: output, shape index: {0}]   ;;  %s12234_s23 = inlined_call_operand.vmem [shape: f32[6,8,2,8,2], index: 23, kind: output, shape index: {1}]   ;;  %s12235_s24 = inlined_call_operand.vmem [shape: f32[6,1,1], index: 24, kind: output, shape index: {2}]   ;;  %s12236_s1 = inlined_call_operand.vmem [shape: s32[6], index: 1, kind: input, shape index: {}]  }
   0x1   :  { %12289 = sst [smem:[#allocation35_spill]] %s12212_s0 }
   0x2   :  { %12290 = sst [smem:[#allocation36_spill]] %s12213_s2 }
   0x3   :  { %12291 = sst [smem:[#allocation37_spill]] %s12214_s3  ;;  %s34_s3 = sshll.u32 %s12236_s1, 4  ;;  %s35_s3 = int_to_ptr.vmem [resolvable:$true] %s34_s3 }
   0x4   :  { %12292 = sst [smem:[#allocation38_spill]] %s12215_s4 }
   0x5   :  { %12293 = sst [smem:[#allocation39_spill]] %s12216_s5 }
   0x6   :  { %12294 = sst [smem:[#allocation40_spill]] %s12217_s6 }
   0x7   :  { %12295 = sst [smem:[#allocation41_spill]] %s12218_s7 }
   0x8   :  { %12296 = sst [smem:[#allocation42_spill]] %s12219_s8 }
   0x9   :  { %12297 = sst [smem:[#allocation43_spill]] %s12220_s9 }
   0xa   :  { %12298 = sst [smem:[#allocation44_spill]] %s12230_s19 }
   0xb   :  { %s12299_s27 = sld [smem:[#allocation35_spill]] }
  0x11   :  { %s30_s19 = sshll.u32 %s12299_s27, 4  ;;  %s31_s19 = int_to_ptr.vmem [resolvable:$true] %s30_s19 }
  0x12   :  { %s10153_s29 = scalar_lea.vmem %s31_s19, 16  ;;  %p10158_p1 = scmp.lt.s32.totalorder %s31_s19, %s31_s19 }
  0x13   :  { %p10154_p0 = scmp.ne.s32.totalorder %s31_s19, %s10153_s29  ;;  %p10159_p2 = scmp.lt.s32.totalorder %s10153_s29, %s10153_s29 }
  0x15   :  { %p10160_p3 = por %p10159_p2, %p10158_p1 }
  0x17   :  { %p10161_p4 = pnand %p10160_p3, %p10154_p0 }
  0x19   :  { %10164 = shalt.err (!%p10161_p4)  }
  0x1a   :  { %s10187_s0 = smov [#allocation4]   ;;  %s10165_s8 = scalar_lea.vmem %s35_s3, 16 }
  0x1b   :  { %33 = dma.vmem_to_smem %s31_s19, 16, %s10187_s0, [#allocation3] }
  0x1c   :  { %p10166_p5 = scmp.ne.s32.totalorder %s35_s3, %s10165_s8  ;;  %p10170_p6 = scmp.lt.s32.totalorder %s35_s3, %s35_s3 }
  0x1d   :  { %p10171_p7 = scmp.lt.s32.totalorder %s10165_s8, %s10165_s8 }
  0x1f   :  { %p10172_p8 = por %p10171_p7, %p10170_p6 }
  0x21   :  { %p10173_p9 = pnand %p10172_p8, %p10166_p5 }
  0x23   :  { %10176 = shalt.err (!%p10173_p9)  }
  0x24   :  { %s10188_s30 = smov [#allocation5]  }
  0x25   :  { %37 = dma.vmem_to_smem %s35_s3, 16, %s10188_s30, [#allocation3] }
  0x26   :  { %10181 = dma.done.wait [#allocation3], 32 }
  0x27   :  { %10182 = vsyncadd [#allocation3], 4294967264 }
  0x28   :  { %39 = sfence }
  0x29   :  { %s10332_s1 = smov 0  }
  0x2a LB: > { %s10338_s19 = sadd.s32 4294967295, %s10185_s1   ;;  %p8190_p10 = scmp.ge.s32.totalorder %s10185_s1, 1  ;;  %s10185_s1 = sphi %s10332_s1, %s45_s1  }
  0x2b   : > { %p643_p11 = scmp.lt.s32.totalorder %s10185_s1, 7 }
  0x2d   : > { %p644_p12 = pnand %p8190_p10, %p643_p11 }
  0x2f   : > { %647 = sbr.rel (%p644_p12) target bundleno = 3207 (0xc87), region = 100 }
  0x34   : > { %s719_s4 = sld [smem:[#allocation4 + %s10338_s19]]  ;;  %p726_p13 = scmp.lt.s32.totalorder %s10338_s19, 5  ;;  %vm746_vm0 = vcmask 72704   ;;  %vm748_vm1 = vcmask 66560   ;;  %v12241_v48 = vmov 0.0   ;;  %vm978_vm2 = vcmask 1043456  }
  0x35   : > { %s12300_s6 = sld [smem:[#allocation37_spill]]  ;;  %750 = vst.msk [vmem:[#allocation2 + $0x10] sm:$0xff] %vm746_vm0, %v12241_v48  ;;  %747 = vst.msk [vmem:[#allocation2] sm:$0xff] %vm746_vm0, %v12241_v48  ;;  %vm921_vm3 = vcmask 64512   ;;  %vm10190_vm5 = vmmov 0   ;;  %vm2809_vm6 = vcmask 31744  }
  0x36   : > { %s10345_s25 = scalar_select %p726_p13, %s10338_s19, 5  ;;  %751 = vst.msk [vmem:[#allocation2 + $0x18] sm:$0x3] %vm748_vm1, %v12241_v48  ;;  %749 = vst.msk [vmem:[#allocation2 + $0x8] sm:$0x3] %vm748_vm1, %v12241_v48  ;;  %vm2888_vm8 = vcmask 24576  }
  0x37   : > { %s12301_s3 = sld [smem:[#allocation36_spill]]  ;;  %752 = vst.msk [vmem:[#allocation2 + $0x20] sm:$0xff] %vm746_vm0, %v12241_v48  ;;  %754 = vst.msk [vmem:[#allocation2 + $0x30] sm:$0xff] %vm746_vm0, %v12241_v48  ;;  %vm3177_vm9 = vcmask 7168   ;;  %vm4189_vm10 = vcmask 1044480   ;;  %s10192_s5 = smov 8  }
  0x38   : > { %s8756_s9 = sshll.u32 %s10345_s25, 7  ;;  %753 = vst.msk [vmem:[#allocation2 + $0x28] sm:$0x3] %vm748_vm1, %v12241_v48  ;;  %755 = vst.msk [vmem:[#allocation2 + $0x38] sm:$0x3] %vm748_vm1, %v12241_v48  ;;  %s12302_s30 = sld [smem:[#allocation38_spill]] }
  0x39   : > { %756 = vst.msk [vmem:[#allocation2 + $0x40] sm:$0xff] %vm746_vm0, %v12241_v48  ;;  %758 = vst.msk [vmem:[#allocation2 + $0x50] sm:$0xff] %vm746_vm0, %v12241_v48  ;;  %s8757_s28 = sshll.u32 %s10345_s25, 6  ;;  %s12317_s0 = sld [smem:[#allocation40_spill]]  ;;  %vm4134_vm11 = vcmask 72768   ;;  %vm6132_vm12 = vcmask 523264  }
  0x3a   : > { %p720_p0 = scmp.lt.s32.totalorder %s719_s4, 1  ;;  %757 = vst.msk [vmem:[#allocation2 + $0x48] sm:$0x3] %vm748_vm1, %v12241_v48  ;;  %759 = vst.msk [vmem:[#allocation2 + $0x58] sm:$0x3] %vm748_vm1, %v12241_v48  ;;  %s12324_s7 = sld [smem:[#allocation39_spill]] }
  0x3b   : > { %s10353_s26 = scalar_lea.vmem %s12300_s6, %s8756_s9  ;;  %760 = vst.msk [vmem:[#allocation2 + $0x60] sm:$0xff] %vm746_vm0, %v12241_v48  ;;  %762 = vst.msk [vmem:[#allocation2 + $0x70] sm:$0xff] %vm746_vm0, %v12241_v48  ;;  %s10195_s8 = smov 125   ;;  %vm3488_vm13 = vcmask 15368   ;;  %vm8059_vm14 = vcmask 0  }
  0x3c   : > { %v801_v0 = vld [vmem:[%s10353_s26 + $0x8] sm:$0xff]  ;;  %s12458_s4 = smov (!%p720_p0, %s719_s4), 1  ;;  %v800_v33 = vld [vmem:[%s10353_s26] sm:$0xff]  ;;  %v803_v34 = vld [vmem:[%s10353_s26 + $0x18] sm:$0xff]  ;;  %761 = vst.msk [vmem:[#allocation2 + $0x68] sm:$0x3] %vm748_vm1, %v12241_v48 }
  0x3d   : > { %880 = vmatprep.mubr.f32.mxu0 %v801_v0  ;;  %s8755_s27 = sshll.u32 %s12458_s4, 8  ;;  %v802_v35 = vld [vmem:[%s10353_s26 + $0x10] sm:$0xff]  ;;  %v805_v36 = vld [vmem:[%s10353_s26 + $0x28] sm:$0xff]  ;;  %v804_v37 = vld [vmem:[%s10353_s26 + $0x20] sm:$0xff]  ;;  %763 = vst.msk [vmem:[#allocation2 + $0x78] sm:$0x3] %vm748_vm1, %v12241_v48 }
  0x3e   : > { %s10359_s29 = scalar_lea.vmem %s12301_s3, %s8755_s27  ;;  %v807_v38 = vld [vmem:[%s10353_s26 + $0x38] sm:$0xff]  ;;  %v806_v39 = vld [vmem:[%s10353_s26 + $0x30] sm:$0xff]  ;;  %v809_v40 = vld [vmem:[%s10353_s26 + $0x48] sm:$0xff]  ;;  %764 = vst.msk [vmem:[#allocation2 + $0x80] sm:$0xff] %vm746_vm0, %v12241_v48  ;;  %s12346_s4 = sld [smem:[#allocation42_spill]] }
  0x3f   : > { %v799_v1 = vld [vmem:[%s10359_s29 + $0xf8] sm:$0xff]  ;;  %v798_v3 = vld [vmem:[%s10359_s29 + $0xf0] sm:$0xff]  ;;  %v797_v5 = vld [vmem:[%s10359_s29 + $0xe8] sm:$0xff]  ;;  %765 = vst.msk [vmem:[#allocation2 + $0x88] sm:$0x3] %vm748_vm1, %v12241_v48  ;;  %s12355_s27 = sld [smem:[#allocation41_spill]]  ;;  %s11089_s3 = scalar_lea.vmem %s12234_s23, %s8756_s9 }
  0x40   : > { %v783_v2 = vld [vmem:[%s10359_s29 + $0x78] sm:$0xff]  ;;  %8759 = vmatprep.subr.mxu0 %v799_v1  ;;  %v782_v4 = vld [vmem:[%s10359_s29 + $0x70] sm:$0xff]  ;;  %v781_v6 = vld [vmem:[%s10359_s29 + $0x68] sm:$0xff]  ;;  %766 = vst.msk [vmem:[#allocation2 + $0x90] sm:$0xff] %vm746_vm0, %v12241_v48  ;;  %s10198_s9 = smov 122   ;;  %s10199_s2 = smov 121  }
  0x41   : > { %8760 = vmatpush3.msra.mxu0 %v783_v2  ;;  %v796_v7 = vld [vmem:[%s10359_s29 + $0xe0] sm:$0xff]  ;;  %v795_v9 = vld [vmem:[%s10359_s29 + $0xd8] sm:$0xff]  ;;  %v794_v11 = vld [vmem:[%s10359_s29 + $0xd0] sm:$0xff]  ;;  %767 = vst.msk [vmem:[#allocation2 + $0x98] sm:$0x3] %vm748_vm1, %v12241_v48 }
  0x42   : > { %8761 = vmatprep.subr.mxu0 %v798_v3  ;;  %v780_v8 = vld [vmem:[%s10359_s29 + $0x60] sm:$0xff]  ;;  %v779_v10 = vld [vmem:[%s10359_s29 + $0x58] sm:$0xff]  ;;  %v778_v12 = vld [vmem:[%s10359_s29 + $0x50] sm:$0xff] }
  0x43   : > { %8762 = vmatpush3.msra.mxu0 %v782_v4  ;;  %v793_v13 = vld [vmem:[%s10359_s29 + $0xc8] sm:$0xff]  ;;  %v792_v15 = vld [vmem:[%s10359_s29 + $0xc0] sm:$0xff]  ;;  %v791_v17 = vld [vmem:[%s10359_s29 + $0xb8] sm:$0xff] }
  0x44   : > { %8763 = vmatprep.subr.mxu0 %v797_v5  ;;  %v777_v14 = vld [vmem:[%s10359_s29 + $0x48] sm:$0xff]  ;;  %v776_v16 = vld [vmem:[%s10359_s29 + $0x40] sm:$0xff]  ;;  %v775_v18 = vld [vmem:[%s10359_s29 + $0x38] sm:$0xff] }
  0x45   : > { %8764 = vmatpush3.msra.mxu0 %v781_v6  ;;  %v790_v19 = vld [vmem:[%s10359_s29 + $0xb0] sm:$0xff]  ;;  %v789_v21 = vld [vmem:[%s10359_s29 + $0xa8] sm:$0xff]  ;;  %v788_v23 = vld [vmem:[%s10359_s29 + $0xa0] sm:$0xff] }
  0x46   : > { %8765 = vmatprep.subr.mxu0 %v796_v7  ;;  %v774_v20 = vld [vmem:[%s10359_s29 + $0x30] sm:$0xff]  ;;  %v773_v22 = vld [vmem:[%s10359_s29 + $0x28] sm:$0xff]  ;;  %v772_v24 = vld [vmem:[%s10359_s29 + $0x20] sm:$0xff] }
  0x47   : > { %8766 = vmatpush3.msra.mxu0 %v780_v8  ;;  %v787_v25 = vld [vmem:[%s10359_s29 + $0x98] sm:$0xff]  ;;  %v786_v27 = vld [vmem:[%s10359_s29 + $0x90] sm:$0xff]  ;;  %v785_v29 = vld [vmem:[%s10359_s29 + $0x88] sm:$0xff] }
  0x48   : > { %8767 = vmatprep.subr.mxu0 %v795_v9  ;;  %v771_v26 = vld [vmem:[%s10359_s29 + $0x18] sm:$0xff]  ;;  %v770_v28 = vld [vmem:[%s10359_s29 + $0x10] sm:$0xff]  ;;  %v769_v30 = vld [vmem:[%s10359_s29 + $0x8] sm:$0xff] }
  0x49   : > { %8768 = vmatpush3.msra.mxu0 %v779_v10  ;;  %v784_v31 = vld [vmem:[%s10359_s29 + $0x80] sm:$0xff]  ;;  %v811_v42 = vld [vmem:[%s10353_s26 + $0x58] sm:$0xff]  ;;  %v810_v43 = vld [vmem:[%s10353_s26 + $0x50] sm:$0xff] }
  0x4a   : > { %8769 = vmatprep.subr.mxu0 %v794_v11  ;;  %v768_v32 = vld [vmem:[%s10359_s29] sm:$0xff]  ;;  %v813_v44 = vld [vmem:[%s10353_s26 + $0x68] sm:$0xff]  ;;  %v815_v46 = vld [vmem:[%s10353_s26 + $0x78] sm:$0xff]  ;;  %s10477_s29 = scalar_lea.vmem %s12233_s22, %s8757_s28  ;;  %s10193_s28 = smov 127  }
  0x4b   : > { %8770 = vmatpush3.msra.mxu0 %v778_v12  ;;  %v808_v41 = vld [vmem:[%s10353_s26 + $0x40] sm:$0xff]  ;;  %v814_v47 = vld [vmem:[%s10353_s26 + $0x70] sm:$0xff]  ;;  %v8228_v53 = vld [vmem:[%s12302_s30 + $0x18] sm:$0xf] }
  0x4c   : > { %8771 = vmatprep.subr.mxu0 %v793_v13  ;;  %v812_v45 = vld [vmem:[%s10353_s26 + $0x60] sm:$0xff]  ;;  %v10456_v51 = vld [vmem:[%s12302_s30 + $0x10] sm:$0xf]  ;;  %s12362_s26 = sld [smem:[#allocation43_spill]] }
  0x4d   : > { %8772 = vmatpush3.msra.mxu0 %v777_v14  ;;  %v8199_v49 = vld [vmem:[%s12302_s30 + $0x4] sm:$0xf]  ;;  %v10462_v52 = vsel %vm978_vm2, %v10456_v51, 0  ;;  %v951_v54 = vld [vmem:[%s12302_s30] sm:$0xf] }
  0x4e   : > { %8773 = vmatprep.subr.mxu0 %v792_v15  ;;  %9888 = vmatprep.subr.msk.bf16.mxu1 %vm978_vm2, %v8199_v49  ;;  %v980_v50 = vsel %vm978_vm2, %v8199_v49, 0  ;;  %v10493_v63 = vld [vmem:[#allocation2 + $0x1] sm:$0xff]  ;;  %v1060_v14 = vsel %vm978_vm2, %v951_v54, 0 }
  0x4f   : > { %8774 = vmatpush3.msra.mxu0 %v776_v16  ;;  %9177 = vmatpush3.bf16.msra.mxu1 %v980_v50  ;;  %12305 = vst [vmem:[#allocation9_spill] sm:$0xff] %v10493_v63  ;;  %v8208_v16 = vld [vmem:[%s12302_s30 + $0x8] sm:$0xf] }
  0x50   : > { %8775 = vmatprep.subr.mxu0 %v791_v17  ;;  %9889 = vmatprep.subr.msk.bf16.mxu1 %vm978_vm2, %v951_v54 }
  0x51   : > { %8776 = vmatpush3.msra.mxu0 %v775_v18 }
  0x52   : > { %8777 = vmatprep.subr.mxu0 %v790_v19 }
  0x53   : > { %8778 = vmatpush3.msra.mxu0 %v774_v20 }
  0x54   : > { %8779 = vmatprep.subr.mxu0 %v789_v21 }
  0x55   : > { %8780 = vmatpush3.msra.mxu0 %v773_v22 }
  0x56   : > { %8781 = vmatprep.subr.mxu0 %v788_v23  ;;  %v1563_v23 = vsel %vm978_vm2, %v8228_v53, 0 }
  0x57   : > { %8782 = vmatpush3.msra.mxu0 %v772_v24 }
  0x58   : > { %8783 = vmatprep.subr.mxu0 %v787_v25 }
  0x59   : > { %8784 = vmatpush3.msra.mxu0 %v771_v26  ;;  %v8238_v26 = vld [vmem:[%s12302_s30 + $0x20] sm:$0xf] }
  0x5a   : > { %8785 = vmatprep.subr.mxu0 %v786_v27 }
  0x5b   : > { %8786 = vmatpush3.msra.mxu0 %v770_v28 }
  0x5c   : > { %8787 = vmatprep.subr.mxu0 %v785_v29 }
  0x5d   : > { %8788 = vmatpush3.msra.mxu0 %v769_v30 }
  0x5e   : > { %8789 = vmatprep.subr.mxu0 %v784_v31 }
  0x5f   : > { %8790 = vmatpush3.msra.mxu0 %v768_v32 }
  0x60   : > { %881 = vmatmul.mubr.f32.vlgmr.msra.gmra.mxu0 %v800_v33  ;;  %9892 = vmatprep.subr.msk.bf16.mxu0 %vm978_vm2, %v10456_v51 }
  0x61   : > { %885 = vmatprep.mubr.f32.mxu0 %v803_v34  ;;  %9217 = vmatpush3.bf16.msra.mxu0 %v10462_v52 }
  0x62   : > { %9895 = vmatprep.subr.msk.bf16.mxu0 %vm978_vm2, %v8228_v53 }
  0x64   : > { %886 = vmatmul.mubr.f32.gmra.mxu0 %v802_v35 }
  0x65   : > { %890 = vmatprep.mubr.f32.mxu0 %v805_v36  ;;  %v1767_v36 = vsel %vm978_vm2, %v8238_v26, 0 }
  0x68   : > { %891 = vmatmul.mubr.f32.gmra.mxu0 %v804_v37 }
  0x69   : > { %895 = vmatprep.mubr.f32.mxu0 %v807_v38  ;;  %v10576_v38 = vld [vmem:[#allocation2] sm:$0xff] }
  0x6a   : > { %12312 = vst [vmem:[#allocation16_spill] sm:$0xff] %v10576_v38 }
  0x6c   : > { %896 = vmatmul.mubr.f32.gmra.mxu0 %v806_v39 }
  0x6d   : > { %900 = vmatprep.mubr.f32.mxu0 %v809_v40 }
  0x70   : > { %901 = vmatmul.mubr.f32.gmra.mxu0 %v808_v41 }
  0x71   : > { %905 = vmatprep.mubr.f32.mxu0 %v811_v42 }
  0x74   : > { %906 = vmatmul.mubr.f32.gmra.mxu0 %v810_v43 }
  0x75   : > { %910 = vmatprep.mubr.f32.mxu0 %v813_v44 }
  0x78   : > { %911 = vmatmul.mubr.f32.gmra.mxu0 %v812_v45 }
  0x79   : > { %915 = vmatprep.mubr.f32.mxu0 %v815_v46  ;;  %v10585_v46 = vld [vmem:[#allocation2 + $0x90] sm:$0xff] }
  0x7a   : > { %12313 = vst [vmem:[#allocation17_spill] sm:$0xff] %v10585_v46 }
  0x7c   : > { %916 = vmatmul.mubr.f32.gmra.mxu0 %v814_v47 }
 0x120   : > { %v8791_v55 = vpop.f32.mrf.mxu0 }
 0x122   : > { %v8792_v56 = vpop.f32.mrf.mxu0 }
 0x123   : > { %v10479_v57 = vadd.f32 %v8792_v56, %v8791_v55  ;;  %v1154_v55 = vsel %vm978_vm2, %v8208_v16, 0 }
 0x124   : > { %v8794_v58 = vpop.f32.mrf.mxu0 }
 0x125   : > { %12303 = vst [vmem:[#allocation7_spill] sm:$0xff] %v10479_v57  ;;  %922 = vst.msk [vmem:[%s10477_s29] sm:$0xff] %vm921_vm3, %v10479_v57 }
 0x126   : > { %931 = vst.msk [vmem:[#allocation2 + $0x11] sm:$0xff] %vm921_vm3, %v10479_v57  ;;  %v8795_v59 = vpop.f32.mrf.mxu0 }
 0x127   : > { %v10486_v60 = vadd.f32 %v8795_v59, %v8794_v58  ;;  %v8213_v58 = vld [vmem:[%s12302_s30 + $0xc] sm:$0xf] }
 0x128   : > { %v8797_v61 = vpop.f32.mrf.mxu0 }
 0x129   : > { %12304 = vst [vmem:[#allocation8_spill] sm:$0xff] %v10486_v60  ;;  %923 = vst.msk [vmem:[%s10477_s29 + $0x8] sm:$0xff] %vm921_vm3, %v10486_v60 }
 0x12a   : > { %932 = vst.msk [vmem:[#allocation2 + $0x21] sm:$0xff] %vm921_vm3, %v10486_v60  ;;  %v8798_v62 = vpop.f32.mrf.mxu0 }
 0x12b   : > { %v10495_v0 = vadd.f32 %v8798_v62, %v8797_v61 }
 0x12c   : > { %v8800_v1 = vpop.f32.mrf.mxu0 }
 0x12d   : > { %12306 = vst [vmem:[#allocation10_spill] sm:$0xff] %v10495_v0  ;;  %v953_v2 = vld [vmem:[#allocation2 + $0x11] sm:$0xff]  ;;  %924 = vst.msk [vmem:[%s10477_s29 + $0x10] sm:$0xff] %vm921_vm3, %v10495_v0 }
 0x12e   : > { %933 = vst.msk [vmem:[#allocation2 + $0x31] sm:$0xff] %vm921_vm3, %v10495_v0  ;;  %v960_v3 = vpack.c.bf16 %v953_v2, %v10493_v63  ;;  %v8801_v4 = vpop.f32.mrf.mxu0  ;;  %v940_v39 = vld [vmem:[#allocation2 + $0x10] sm:$0xff] }
 0x12f   : > { %v10503_v5 = vadd.f32 %v8801_v4, %v8800_v1  ;;  %v947_v45 = vpack.c.bf16 %v940_v39, %v10576_v38  ;;  %v1128_v4 = vld [vmem:[#allocation2 + $0x12] sm:$0xff] }
 0x130   : > { %9178 = vmatprep.mubr.msk.bf16.mxu1 %vm921_vm3, %v960_v3  ;;  %v8803_v6 = vpop.f32.mrf.mxu0  ;;  %v10605_v3 = vld [vmem:[#allocation2 + $0x2] sm:$0xff] }
 0x131   : > { %12307 = vst [vmem:[#allocation11_spill] sm:$0xff] %v10503_v5  ;;  %v1332_v7 = vld [vmem:[#allocation2 + $0x21] sm:$0xff]  ;;  %925 = vst.msk [vmem:[%s10477_s29 + $0x18] sm:$0xff] %vm921_vm3, %v10503_v5 }
 0x132   : > { %934 = vst.msk [vmem:[#allocation2 + $0x41] sm:$0xff] %vm921_vm3, %v10503_v5  ;;  %v1339_v8 = vpack.c.bf16 %v1332_v7, %v953_v2  ;;  %v8804_v9 = vpop.f32.mrf.mxu0  ;;  %v10536_v22 = vld [vmem:[#allocation2 + $0x20] sm:$0xff]  ;;  %12314 = vst [vmem:[#allocation18_spill] sm:$0xff] %v10605_v3 }
 0x133   : > { %v10511_v10 = vadd.f32 %v8804_v9, %v8803_v6  ;;  %v1740_v53 = vld [vmem:[#allocation2 + $0x22] sm:$0xff]  ;;  %v10608_v6 = vld [vmem:[#allocation2 + $0x92] sm:$0xff] }
 0x134   : > { %9218 = vmatprep.mubr.msk.bf16.mxu0 %vm921_vm3, %v1339_v8  ;;  %v8806_v11 = vpop.f32.mrf.mxu0  ;;  %12315 = vst [vmem:[#allocation19_spill] sm:$0xff] %v10608_v6 }
 0x135   : > { %12308 = vst [vmem:[#allocation12_spill] sm:$0xff] %v10511_v10  ;;  %v955_v12 = vld [vmem:[#allocation2 + $0x31] sm:$0xff]  ;;  %926 = vst.msk [vmem:[%s10477_s29 + $0x20] sm:$0xff] %vm921_vm3, %v10511_v10 }
 0x136   : > { %935 = vst.msk [vmem:[#allocation2 + $0x51] sm:$0xff] %vm921_vm3, %v10511_v10  ;;  %v10519_v13 = vpack.c.bf16 %v955_v12, %v1332_v7  ;;  %v8807_v15 = vpop.f32.mrf.mxu0  ;;  %v10529_v18 = vld [vmem:[#allocation2 + $0x30] sm:$0xff]  ;;  %v1135_v7 = vpack.c.bf16 %v1128_v4, %v10605_v3 }
 0x137   : > { %v10525_v17 = vadd.f32 %v8807_v15, %v8806_v11  ;;  %v1544_v25 = vpack.c.bf16 %v10529_v18, %v10536_v22  ;;  %v10590_v47 = vld [vmem:[#allocation2 + $0x32] sm:$0xff]  ;;  %v1256_v11 = vsel %vm978_vm2, %v8213_v58, 0 }
 0x138   : > { %9179 = vmatmul.mubr.msk.bf16.vlgmr.msra.gmra.mxu1 %vm921_vm3, %v10519_v13  ;;  %v8809_v19 = vpop.f32.mrf.mxu0  ;;  %v1748_v54 = vpack.c.bf16 %v10590_v47, %v1740_v53 }
 0x139   : > { %12309 = vst [vmem:[#allocation13_spill] sm:$0xff] %v10525_v17  ;;  %v1334_v20 = vld [vmem:[#allocation2 + $0x41] sm:$0xff]  ;;  %9187 = vmatpush3.bf16.msra.mxu1 %v1060_v14  ;;  %927 = vst.msk [vmem:[%s10477_s29 + $0x28] sm:$0xff] %vm921_vm3, %v10525_v17 }
 0x13a   : > { %936 = vst.msk [vmem:[#allocation2 + $0x61] sm:$0xff] %vm921_vm3, %v10525_v17  ;;  %v1340_v21 = vpack.c.bf16 %v1334_v20, %v955_v12  ;;  %9890 = vmatprep.subr.msk.bf16.mxu1 %vm978_vm2, %v8208_v16  ;;  %v8810_v24 = vpop.f32.mrf.mxu0  ;;  %v1538_v34 = vld [vmem:[#allocation2 + $0x40] sm:$0xff]  ;;  %v1237_v12 = vpack.c.bf16 %v10536_v22, %v940_v39  ;;  %v8223_v16 = vld [vmem:[%s12302_s30 + $0x14] sm:$0xf]  ;;  %v1441_v22 = vpack.c.bf16 %v1740_v53, %v1128_v4 }
 0x13b   : > { %v10545_v27 = vadd.f32 %v8810_v24, %v8809_v19  ;;  %v1742_v61 = vld [vmem:[#allocation2 + $0x42] sm:$0xff]  ;;  %v1238_v14 = vpack.c.bf16 %v1538_v34, %v10529_v18 }
 0x13c   : > { %9219 = vmatmul.mubr.msk.bf16.vlgmr.msra.gmra.mxu0 %vm921_vm3, %v1340_v21  ;;  %v8812_v28 = vpop.f32.mrf.mxu0  ;;  %v1460_v21 = vsel %vm978_vm2, %v8223_v16, 0 }
 0x13d   : > { %12310 = vst [vmem:[#allocation14_spill] sm:$0xff] %v10545_v27  ;;  %9238 = vmatprep.mubr.msk.bf16.mxu0 %vm921_vm3, %v1544_v25  ;;  %v10549_v29 = vld [vmem:[#allocation2 + $0x51] sm:$0xff]  ;;  %9237 = vmatpush3.bf16.msra.mxu0 %v1563_v23  ;;  %928 = vst.msk [vmem:[%s10477_s29 + $0x30] sm:$0xff] %vm921_vm3, %v10545_v27  ;;  %v1442_v23 = vpack.c.bf16 %v1742_v61, %v10590_v47 }
 0x13e   : > { %937 = vst.msk [vmem:[#allocation2 + $0x71] sm:$0xff] %vm921_vm3, %v10545_v27  ;;  %v10557_v30 = vpack.c.bf16 %v10549_v29, %v1334_v20  ;;  %9897 = vmatprep.subr.msk.bf16.mxu0 %vm978_vm2, %v8238_v26  ;;  %v8813_v31 = vpop.f32.mrf.mxu0  ;;  %v10560_v32 = vld [vmem:[#allocation2 + $0x50] sm:$0xff] }
 0x13f   : > { %v10562_v33 = vadd.f32 %v8813_v31, %v8812_v28  ;;  %v1545_v35 = vpack.c.bf16 %v10560_v32, %v1538_v34  ;;  %v1743_v56 = vld [vmem:[#allocation2 + $0x52] sm:$0xff]  ;;  %v8244_v31 = vld [vmem:[%s12317_s0 + $0x4] sm:$0xf]  ;;  %v10672_v34 = vld [vmem:[%s12317_s0 + $0x8] sm:$0xf] }
 0x140   : > { %9182 = vmatprep.mubr.msk.bf16.mxu1 %vm921_vm3, %v10557_v30  ;;  %v1749_v62 = vpack.c.bf16 %v1743_v56, %v1742_v61  ;;  %v10655_v28 = vld [vmem:[#allocation2 + $0x91] sm:$0xff]  ;;  %12318 = vst [vmem:[#allocation21_spill] sm:$0xff] %v10672_v34 }
 0x141   : > { %12311 = vst [vmem:[#allocation15_spill] sm:$0xff] %v10562_v33  ;;  %929 = vst.msk [vmem:[%s10477_s29 + $0x38] sm:$0xff] %vm921_vm3, %v10562_v33  ;;  %v10574_v37 = vld [vmem:[#allocation2 + $0x61] sm:$0xff]  ;;  %s10196_s29 = smov 124  }
 0x142   : > { %938 = vst.msk [vmem:[#allocation2 + $0x81] sm:$0xff] %vm921_vm3, %v10562_v33  ;;  %v1540_v41 = vld [vmem:[#allocation2 + $0x60] sm:$0xff]  ;;  %v1341_v19 = vpack.c.bf16 %v10574_v37, %v10549_v29  ;;  %12316 = vst [vmem:[#allocation20_spill] sm:$0xff] %v10655_v28 }
 0x143   : > { %v1744_v1 = vld [vmem:[#allocation2 + $0x62] sm:$0xff]  ;;  %v1239_v15 = vpack.c.bf16 %v1540_v41, %v10560_v32 }
 0x144   : > { %9239 = vmatmul.mubr.msk.bf16.vlgmr.msra.gmra.mxu0 %vm921_vm3, %v1545_v35 }
 0x145   : > { %v10578_v40 = vld [vmem:[#allocation2 + $0x71] sm:$0xff]  ;;  %9257 = vmatpush3.bf16.msra.mxu0 %v1767_v36  ;;  %v10679_v36 = vld [vmem:[%s12317_s0 + $0xc] sm:$0xf] }
 0x146   : > { %v1541_v42 = vld [vmem:[#allocation2 + $0x70] sm:$0xff]  ;;  %v10582_v43 = vpack.c.bf16 %v10578_v40, %v10574_v37  ;;  %12319 = vst [vmem:[#allocation22_spill] sm:$0xff] %v10679_v36 }
 0x147   : > { %v1546_v44 = vpack.c.bf16 %v1541_v42, %v1540_v41  ;;  %v1745_v59 = vld [vmem:[#allocation2 + $0x72] sm:$0xff] }
 0x148   : > { %9183 = vmatmul.mubr.msk.bf16.gmra.mxu1 %vm921_vm3, %v10582_v43  ;;  %v1750_v2 = vpack.c.bf16 %v1745_v59, %v1744_v1 }
 0x149   : > { %9242 = vmatprep.mubr.msk.bf16.mxu0 %vm921_vm3, %v1546_v44  ;;  %9188 = vmatprep.mubr.msk.bf16.mxu1 %vm921_vm3, %v947_v45  ;;  %v1542_v49 = vld [vmem:[#allocation2 + $0x80] sm:$0xff] }
 0x14a   : > { %v1547_v50 = vpack.c.bf16 %v10585_v46, %v1542_v49  ;;  %v1746_v8 = vld [vmem:[#allocation2 + $0x82] sm:$0xff] }
 0x14b   : > { %v1751_v9 = vpack.c.bf16 %v10608_v6, %v1746_v8  ;;  %v1338_v18 = vld [vmem:[#allocation2 + $0x81] sm:$0xff]  ;;  %v1444_v26 = vpack.c.bf16 %v1746_v8, %v1745_v59 }
 0x14c   : > { %9243 = vmatmul.mubr.msk.bf16.gmra.mxu0 %vm921_vm3, %v1547_v50  ;;  %v1342_v20 = vpack.c.bf16 %v1338_v18, %v10578_v40  ;;  %v1649_v29 = vpack.c.bf16 %v10655_v28, %v1338_v18 }
 0x14d   : > { %9258 = vmatprep.mubr.msk.bf16.mxu0 %vm921_vm3, %v1748_v54 }
 0x150   : > { %9189 = vmatmul.mubr.msk.bf16.vlgmr.msra.gmra.mxu1 %vm921_vm3, %v1544_v25  ;;  %v1443_v25 = vpack.c.bf16 %v1744_v1, %v1743_v56 }
 0x151   : > { %9192 = vmatprep.mubr.msk.bf16.mxu1 %vm921_vm3, %v1545_v35  ;;  %9197 = vmatpush3.bf16.msra.mxu1 %v1154_v55 }
 0x152   : > { %9891 = vmatprep.subr.msk.bf16.mxu1 %vm978_vm2, %v8213_v58 }
 0x154   : > { %9259 = vmatmul.mubr.msk.bf16.vlgmr.msra.gmra.mxu0 %vm921_vm3, %v1749_v62 }
 0x155   : > { %9262 = vmatprep.mubr.msk.bf16.mxu0 %vm921_vm3, %v1750_v2 }
 0x158   : > { %9193 = vmatmul.mubr.msk.bf16.gmra.mxu1 %vm921_vm3, %v1546_v44 }
 0x159   : > { %9198 = vmatprep.mubr.msk.bf16.mxu1 %vm921_vm3, %v1135_v7 }
 0x15c   : > { %9263 = vmatmul.mubr.msk.bf16.gmra.mxu0 %vm921_vm3, %v1751_v9 }
 0x160   : > { %9199 = vmatmul.mubr.msk.bf16.vlgmr.msra.gmra.mxu1 %vm921_vm3, %v1748_v54 }
 0x161   : > { %9202 = vmatprep.mubr.msk.bf16.mxu1 %vm921_vm3, %v1749_v62  ;;  %9207 = vmatpush3.bf16.msra.mxu1 %v1256_v11 }
 0x162   : > { %9893 = vmatprep.subr.msk.bf16.mxu1 %vm978_vm2, %v10456_v51  ;;  %v1240_v51 = vpack.c.bf16 %v1542_v49, %v1541_v42 }
 0x168   : > { %9203 = vmatmul.mubr.msk.bf16.gmra.mxu1 %vm921_vm3, %v1750_v2 }
 0x169   : > { %9208 = vmatprep.mubr.msk.bf16.mxu1 %vm921_vm3, %v1237_v12 }
 0x170   : > { %9209 = vmatmul.mubr.msk.bf16.vlgmr.msra.gmra.mxu1 %vm921_vm3, %v1238_v14 }
 0x171   : > { %9212 = vmatprep.mubr.msk.bf16.mxu1 %vm921_vm3, %v1239_v15  ;;  %9887 = vmatpush3.bf16.msra.mxu1 %v10462_v52  ;;  %v8233_v52 = vld [vmem:[%s12302_s30 + $0x1c] sm:$0xf] }
 0x172   : > { %9894 = vmatprep.subr.msk.bf16.mxu1 %vm978_vm2, %v8223_v16  ;;  %v1665_v24 = vsel %vm978_vm2, %v8233_v52, 0 }
 0x178   : > { %9213 = vmatmul.mubr.msk.bf16.gmra.mxu1 %vm921_vm3, %v1240_v51 }
 0x179   : > { %9222 = vmatprep.mubr.msk.bf16.mxu1 %vm921_vm3, %v1341_v19 }
 0x180   : > { %9223 = vmatmul.mubr.msk.bf16.vlgmr.msra.gmra.mxu1 %vm921_vm3, %v1342_v20 }
 0x181   : > { %9228 = vmatprep.mubr.msk.bf16.mxu1 %vm921_vm3, %v1441_v22  ;;  %9227 = vmatpush3.bf16.msra.mxu1 %v1460_v21 }
 0x182   : > { %9896 = vmatprep.subr.msk.bf16.mxu1 %vm978_vm2, %v8233_v52 }
 0x188   : > { %9229 = vmatmul.mubr.msk.bf16.vlgmr.msra.gmra.mxu1 %vm921_vm3, %v1442_v23 }
 0x189   : > { %9232 = vmatprep.mubr.msk.bf16.mxu1 %vm921_vm3, %v1443_v25  ;;  %9247 = vmatpush3.bf16.msra.mxu1 %v1665_v24 }
 0x18a   : > { %9898 = vmatprep.subr.msk.bf16.mxu1 %vm978_vm2, %v8244_v31 }
 0x190   : > { %9233 = vmatmul.mubr.msk.bf16.gmra.mxu1 %vm921_vm3, %v1444_v26 }
 0x191   : > { %9248 = vmatprep.mubr.msk.bf16.mxu1 %vm921_vm3, %v10519_v13  ;;  %v1885_v13 = vld [vmem:[%s12317_s0] sm:$0xf] }
 0x192   : > { %9899 = vmatprep.subr.msk.bf16.mxu0 %vm978_vm2, %v1885_v13  ;;  %v1993_v32 = vsel %vm978_vm2, %v1885_v13, 0 }
 0x193   : > { %9277 = vmatpush3.bf16.msra.mxu0 %v1993_v32 }
 0x194   : > { %9901 = vmatprep.subr.msk.bf16.mxu0 %vm978_vm2, %v10679_v36 }
 0x198   : > { %9249 = vmatmul.mubr.msk.bf16.vlgmr.msra.gmra.mxu1 %vm921_vm3, %v10557_v30  ;;  %v1913_v30 = vsel %vm978_vm2, %v8244_v31, 0 }
 0x199   : > { %9252 = vmatprep.mubr.msk.bf16.mxu1 %vm921_vm3, %v10582_v43  ;;  %9267 = vmatpush3.bf16.msra.mxu1 %v1913_v30 }
 0x19a   : > { %9900 = vmatprep.subr.msk.bf16.mxu1 %vm978_vm2, %v10672_v34 }
 0x1a0   : > { %9253 = vmatmul.mubr.msk.bf16.gmra.mxu1 %vm921_vm3, %v1649_v29 }
 0x1f8   : > { %v9180_v35 = vpop.f32.mrf.mxu1 }
 0x1fa   : > { %v1016_v37 = vpop.f32.mrf.mxu1 }
 0x1fc   : > { %v9181_v39 = vpop.f32.mrf.mxu1  ;;  %v9220_v56 = vpop.f32.mrf.mxu0 }
 0x1fe   : > { %v1019_v40 = vpop.f32.mrf.mxu1  ;;  %v1394_v61 = vpop.f32.mrf.mxu0 }
 0x200   : > { %v9221_v2 = vpop.f32.mrf.mxu0 }
 0x202   : > { %v1397_v8 = vpop.f32.mrf.mxu0 }
 0x204   : > { %v9240_v12 = vpop.f32.mrf.mxu0 }
 0x206   : > { %v1599_v16 = vpop.f32.mrf.mxu0 }
 0x208   : > { %v10683_v41 = vpop.f32.mrf.mxu1  ;;  %v10697_v18 = vpop.f32.mrf.mxu0 }
 0x20a   : > { %v10685_v42 = vpop.f32.mrf.mxu1  ;;  %v10699_v22 = vpop.f32.mrf.mxu0 }
 0x20c   : > { %v10687_v43 = vpop.f32.mrf.mxu1  ;;  %v10701_v24 = vpop.f32.mrf.mxu0 }
 0x20d   : > { %12320 = vst [vmem:[#allocation23_spill] sm:$0xff] %v10701_v24 }
 0x20e   : > { %v10689_v44 = vpop.f32.mrf.mxu1  ;;  %v10705_v29 = vpop.f32.mrf.mxu0 }
 0x20f   : > { %12321 = vst [vmem:[#allocation24_spill] sm:$0xff] %v10705_v29 }
 0x210   : > { %v9190_v45 = vpop.f32.mrf.mxu1  ;;  %v10707_v30 = vpop.f32.mrf.mxu0 }
 0x211   : > { %12322 = vst [vmem:[#allocation25_spill] sm:$0xff] %v10707_v30  ;;  %v1105_v6 = vadd.f32 %v9190_v45, %v9180_v35 }
 0x212   : > { %v1096_v47 = vpop.f32.mrf.mxu1  ;;  %v10711_v28 = vpop.f32.mrf.mxu0 }
 0x213   : > { %12323 = vst [vmem:[#allocation26_spill] sm:$0xff] %v10711_v28  ;;  %v1097_v3 = vadd.f32 %v1096_v47, %v1016_v37 }
 0x214   : > { %v9191_v49 = vpop.f32.mrf.mxu1  ;;  %v9260_v36 = vpop.f32.mrf.mxu0 }
 0x215   : > { %v1108_v10 = vadd.f32 %v9191_v49, %v9181_v39 }
 0x216   : > { %v1099_v50 = vpop.f32.mrf.mxu1  ;;  %v1803_v24 = vpop.f32.mrf.mxu0 }
 0x217   : > { %v1100_v5 = vadd.f32 %v1099_v50, %v1019_v40 }
 0x218   : > { %v9194_v53 = vpop.f32.mrf.mxu1  ;;  %v9261_v40 = vpop.f32.mrf.mxu0 }
 0x219   : > { %v1121_v35 = vadd.f32 %v9194_v53, %v10683_v41 }
 0x21a   : > { %v1112_v54 = vpop.f32.mrf.mxu1 }
 0x21b   : > { %v1113_v39 = vadd.f32 %v1112_v54, %v10685_v42 }
 0x21c   : > { %v10691_v55 = vpop.f32.mrf.mxu1 }
 0x21e   : > { %v10693_v58 = vpop.f32.mrf.mxu1 }
 0x220   : > { %v9200_v59 = vpop.f32.mrf.mxu1 }
 0x221   : > { %v1223_v17 = vadd.f32 %v9200_v59, %v1105_v6  ;;  %v1806_v59 = vpop.f32.mrf.mxu0 }
 0x222   : > { %v1190_v62 = vpop.f32.mrf.mxu1 }
 0x223   : > { %v1221_v27 = vadd.f32 %v1190_v62, %v1097_v3 }
 0x224   : > { %v9201_v1 = vpop.f32.mrf.mxu1 }
 0x225   : > { %v1224_v57 = vadd.f32 %v9201_v1, %v1108_v10  ;;  %v1124_v10 = vadd.f32 %v10691_v55, %v10687_v43 }
 0x226   : > { %v1193_v4 = vpop.f32.mrf.mxu1 }
 0x227   : > { %v1222_v0 = vadd.f32 %v1193_v4, %v1100_v5 }
 0x228   : > { %v9204_v7 = vpop.f32.mrf.mxu1 }
 0x229   : > { %v1227_v3 = vadd.f32 %v9204_v7, %v1121_v35 }
 0x22a   : > { %v1206_v9 = vpop.f32.mrf.mxu1 }
 0x22b   : > { %v1225_v5 = vadd.f32 %v1206_v9, %v1113_v39 }
 0x22c   : > { %v9205_v11 = vpop.f32.mrf.mxu1 }
 0x22e   : > { %v10695_v14 = vpop.f32.mrf.mxu1 }
 0x230   : > { %v9210_v15 = vpop.f32.mrf.mxu1 }
 0x231   : > { %v1325_v60 = vadd.f32 %v9210_v15, %v1223_v17 }
 0x232   : > { %v1292_v51 = vpop.f32.mrf.mxu1 }
 0x233   : > { %v1323_v38 = vadd.f32 %v1292_v51, %v1221_v27  ;;  %v1427_v29 = vadd.f32 %v9220_v56, %v1325_v60 }
 0x234   : > { %v9211_v19 = vpop.f32.mrf.mxu1 }
 0x235   : > { %v1326_v30 = vadd.f32 %v9211_v19, %v1224_v57  ;;  %v1425_v6 = vadd.f32 %v1394_v61, %v1323_v38 }
 0x236   : > { %v1295_v20 = vpop.f32.mrf.mxu1 }
 0x237   : > { %v1324_v28 = vadd.f32 %v1295_v20, %v1222_v0  ;;  %v1428_v49 = vadd.f32 %v9221_v2, %v1326_v30  ;;  %v1228_v0 = vadd.f32 %v9205_v11, %v1124_v10  ;;  %v9264_v2 = vpop.f32.mrf.mxu0 }
 0x238   : > { %v9214_v21 = vpop.f32.mrf.mxu1 }
 0x239   : > { %v1329_v57 = vadd.f32 %v9214_v21, %v1227_v3  ;;  %v1426_v50 = vadd.f32 %v1397_v8, %v1324_v28 }
 0x23a   : > { %v1308_v52 = vpop.f32.mrf.mxu1 }
 0x23b   : > { %v1327_v38 = vadd.f32 %v1308_v52, %v1225_v5  ;;  %v1819_v52 = vpop.f32.mrf.mxu0 }
 0x23c   : > { %v9215_v23 = vpop.f32.mrf.mxu1 }
 0x23d   : > { %v1330_v43 = vadd.f32 %v9215_v23, %v1228_v0  ;;  %v9265_v3 = vpop.f32.mrf.mxu0 }
 0x23e   : > { %v10703_v25 = vpop.f32.mrf.mxu1 }
 0x23f   : > { %v1822_v0 = vpop.f32.mrf.mxu0 }
 0x240   : > { %v9224_v26 = vpop.f32.mrf.mxu1 }
 0x241   : > { %v1431_v42 = vadd.f32 %v9224_v26, %v1329_v57  ;;  %v12326_v26 = vld [vmem:[#allocation24_spill] sm:$0xff] }
 0x242   : > { %v1410_v31 = vpop.f32.mrf.mxu1 }
 0x243   : > { %v1429_v55 = vadd.f32 %v1410_v31, %v1327_v38 }
 0x244   : > { %v9225_v13 = vpop.f32.mrf.mxu1 }
 0x245   : > { %v1432_v4 = vadd.f32 %v9225_v13, %v1330_v43 }
 0x246   : > { %v10709_v32 = vpop.f32.mrf.mxu1 }
 0x248   : > { %v9230_v48 = vpop.f32.mrf.mxu1 }
 0x249   : > { %v1529_v37 = vadd.f32 %v9230_v48, %v1427_v29  ;;  %v1116_v48 = vadd.f32 %v10693_v58, %v10689_v44 }
 0x24a   : > { %v1496_v46 = vpop.f32.mrf.mxu1 }
 0x24b   : > { %v1527_v47 = vadd.f32 %v1496_v46, %v1425_v6  ;;  %v1632_v41 = vadd.f32 %v9240_v12, %v1529_v37  ;;  %v1226_v61 = vadd.f32 %v10695_v14, %v1116_v48 }
 0x24c   : > { %v9231_v33 = vpop.f32.mrf.mxu1 }
 0x24d   : > { %v1530_v27 = vadd.f32 %v9231_v33, %v1428_v49  ;;  %v1630_v56 = vadd.f32 %v1599_v16, %v1527_v47  ;;  %v10723_v33 = vld [vmem:[%s12324_s7] ss:$0 sm:$0xff]  ;;  %v12328_v47 = vld [vmem:[#allocation26_spill] sm:$0xff]  ;;  %s10910_s7 = sld [smem:[#allocation5 + %s10338_s19]]  ;;  %s10194_s19 = smov 126  }
 0x24e   : > { %v1499_v34 = vpop.f32.mrf.mxu1 }
 0x24f   : > { %v1528_v54 = vadd.f32 %v1499_v34, %v1426_v50  ;;  %v1633_v1 = vadd.f32 %v10697_v18, %v1530_v27  ;;  %v1328_v34 = vadd.f32 %v10703_v25, %v1226_v61 }
 0x250   : > { %v9234_v63 = vpop.f32.mrf.mxu1 }
 0x251   : > { %v1533_v62 = vadd.f32 %v9234_v63, %v1431_v42  ;;  %v1631_v12 = vadd.f32 %v10699_v22, %v1528_v54  ;;  %v1430_v14 = vadd.f32 %v10709_v32, %v1328_v34  ;;  %v12327_v32 = vld [vmem:[#allocation25_spill] sm:$0xff]  ;;  %v12332_v34 = vld [vmem:[#allocation7_spill] sm:$0xff] }
 0x252   : > { %v1512_v45 = vpop.f32.mrf.mxu1 }
 0x253   : > { %v1531_v7 = vadd.f32 %v1512_v45, %v1429_v55 }
 0x254   : > { %v9235_v17 = vpop.f32.mrf.mxu1 }
 0x255   : > { %v1534_v15 = vadd.f32 %v9235_v17, %v1432_v4  ;;  %v1634_v29 = vadd.f32 %v12326_v26, %v1531_v7  ;;  %v12337_v26 = vld [vmem:[#allocation14_spill] sm:$0xff] }
 0x256   : > { %v1515_v60 = vpop.f32.mrf.mxu1 }
 0x257   : > { %v1532_v23 = vadd.f32 %v1515_v60, %v1430_v14  ;;  %v1637_v35 = vadd.f32 %v12327_v32, %v1534_v15 }
 0x258   : > { %v9250_v53 = vpop.f32.mrf.mxu1 }
 0x259   : > { %v1734_v46 = vadd.f32 %v9250_v53, %v1632_v41  ;;  %v1635_v49 = vadd.f32 %v12328_v47, %v1532_v23 }
 0x25a   : > { %v1701_v28 = vpop.f32.mrf.mxu1 }
 0x25b   : > { %v1836_v44 = vadd.f32 %v9260_v36, %v1734_v46  ;;  %v1732_v58 = vadd.f32 %v1701_v28, %v1630_v56  ;;  %v12325_v36 = vld [vmem:[#allocation23_spill] sm:$0xff] }
 0x25c   : > { %v9251_v8 = vpop.f32.mrf.mxu1  ;;  %v1636_v51 = vadd.f32 %v12325_v36, %v1533_v62 }
 0x25d   : > { %v1851_v9 = vadd.f32 %v10723_v33, %v1836_v44  ;;  %v1834_v11 = vadd.f32 %v1803_v24, %v1732_v58  ;;  %v1735_v63 = vadd.f32 %v9251_v8, %v1633_v1  ;;  %v12330_v44 = vld [vmem:[#allocation9_spill] sm:$0xff]  ;;  %v12331_v1 = vld [vmem:[#allocation16_spill] sm:$0xff] }
 0x25e   : > { %v1704_v16 = vpop.f32.mrf.mxu1 }
 0x25f   : > { %v1859_v19 = vmax.f32 %v1851_v9, 0.0  ;;  %v1849_v18 = vadd.f32 %v10723_v33, %v1834_v11  ;;  %v1837_v20 = vadd.f32 %v9261_v40, %v1735_v63  ;;  %v1733_v21 = vadd.f32 %v1704_v16, %v1631_v12  ;;  %v12334_v16 = vld [vmem:[#allocation21_spill] sm:$0xff] }
 0x260   : > { %v9254_v25 = vpop.f32.mrf.mxu1  ;;  %v2087_v36 = vsel %vm978_vm2, %v12334_v16, 0  ;;  %v2903_v16 = vld [vmem:[%s12346_s4] sm:$0xf] }
 0x261   : > { %1867 = vst.msk [vmem:[#allocation2 + $0x31] sm:$0xff] %vm921_vm3, %v1859_v19  ;;  %v1857_v24 = vmax.f32 %v1849_v18, 0.0  ;;  %v1852_v22 = vadd.f32 %v10723_v33, %v1837_v20  ;;  %v1835_v31 = vadd.f32 %v1806_v59, %v1733_v21  ;;  %v1738_v13 = vadd.f32 %v9254_v25, %v1636_v51  ;;  %v12329_v59 = vld [vmem:[#allocation10_spill] sm:$0xff]  ;;  %v8263_v18 = vld [vmem:[%s12317_s0 + $0x10] sm:$0xf]  ;;  %v12336_v21 = vld [vmem:[#allocation8_spill] sm:$0xff] }
 0x262   : > { %v1717_v30 = vpop.f32.mrf.mxu1  ;;  %v12335_v51 = vld [vmem:[#allocation22_spill] sm:$0xff]  ;;  %v8268_v20 = vld [vmem:[%s12317_s0 + $0x14] sm:$0xf] }
 0x263   : > { %1865 = vst.msk [vmem:[#allocation2 + $0x11] sm:$0xff] %vm921_vm3, %v1857_v24  ;;  %v1860_v45 = vmax.f32 %v1852_v22, 0.0  ;;  %v1850_v37 = vadd.f32 %v10723_v33, %v1835_v31  ;;  %v1840_v6 = vadd.f32 %v9264_v2, %v1738_v13  ;;  %v1736_v39 = vadd.f32 %v1717_v30, %v1634_v29  ;;  %v12338_v30 = vld [vmem:[#allocation12_spill] sm:$0xff] }
 0x264   : > { %v9255_v17 = vpop.f32.mrf.mxu1  ;;  %v2189_v19 = vsel %vm978_vm2, %v12335_v51, 0  ;;  %v10932_v51 = vld [vmem:[%s12346_s4 + $0x4] sm:$0xf] }
 0x265   : > { %1868 = vst.msk [vmem:[#allocation2 + $0x41] sm:$0xff] %vm921_vm3, %v1860_v45  ;;  %v1858_v40 = vmax.f32 %v1850_v37, 0.0  ;;  %v1855_v10 = vadd.f32 %v10723_v33, %v1840_v6  ;;  %v1838_v5 = vadd.f32 %v1819_v52, %v1736_v39  ;;  %v1739_v57 = vadd.f32 %v9255_v17, %v1637_v35  ;;  %v12339_v37 = vld [vmem:[#allocation15_spill] sm:$0xff]  ;;  %12347 = vst [vmem:[#allocation23_spill] sm:$0xff] %v10932_v51 }
 0x266   : > { %v1720_v60 = vpop.f32.mrf.mxu1 }
 0x267   : > { %1866 = vst.msk [vmem:[#allocation2 + $0x21] sm:$0xff] %vm921_vm3, %v1858_v40  ;;  %v1863_v27 = vmax.f32 %v1855_v10, 0.0  ;;  %v1853_v50 = vadd.f32 %v10723_v33, %v1838_v5  ;;  %v1841_v41 = vadd.f32 %v9265_v3, %v1739_v57  ;;  %v1737_v48 = vadd.f32 %v1720_v60, %v1635_v49  ;;  %v12340_v49 = vld [vmem:[#allocation13_spill] sm:$0xff]  ;;  %v12341_v40 = vld [vmem:[#allocation18_spill] sm:$0xff] }
 0x268   : > { %v10743_v38 = vld [vmem:[#allocation2 + $0x31] sm:$0xff] }
 0x269   : > { %v10745_v42 = vld [vmem:[#allocation2 + $0x30] sm:$0xff]  ;;  %1871 = vst.msk [vmem:[#allocation2 + $0x71] sm:$0xff] %vm921_vm3, %v1863_v27  ;;  %v1861_v54 = vmax.f32 %v1853_v50, 0.0  ;;  %v1856_v46 = vadd.f32 %v10723_v33, %v1841_v41  ;;  %v1839_v56 = vadd.f32 %v1822_v0, %v1737_v48  ;;  %v2291_v41 = vsel %vm978_vm2, %v8263_v18, 0  ;;  %v8273_v0 = vld [vmem:[%s12317_s0 + $0x18] sm:$0xf] }
 0x26a   : > { %v10747_v53 = vld [vmem:[#allocation2 + $0x32] sm:$0xff]  ;;  %v2393_v48 = vsel %vm978_vm2, %v8268_v20, 0 }
 0x26b   : > { %4096 = vst.msk [vmem:[#allocation2 + $0x31] sm:$0xff] %vm921_vm3, %v12329_v59  ;;  %v10753_v61 = vld [vmem:[#allocation2 + $0x11] sm:$0xff]  ;;  %1869 = vst.msk [vmem:[#allocation2 + $0x51] sm:$0xff] %vm921_vm3, %v1861_v54  ;;  %v1864_v62 = vmax.f32 %v1856_v46, 0.0  ;;  %v1854_v28 = vadd.f32 %v10723_v33, %v1839_v56  ;;  %v12333_v33 = vld [vmem:[#allocation11_spill] sm:$0xff] }
 0x26c   : > { %v1874_v43 = vld [vmem:[#allocation2 + $0x10] sm:$0xff]  ;;  %v1894_v58 = vpack.c.bf16 %v10753_v61, %v12330_v44  ;;  %v10764_v4 = vld [vmem:[#allocation2 + $0x41] sm:$0xff]  ;;  %v8278_v54 = vld [vmem:[%s12317_s0 + $0x1c] sm:$0xf] }
 0x26d   : > { %v10755_v55 = vld [vmem:[#allocation2 + $0x12] sm:$0xff]  ;;  %v1881_v2 = vpack.c.bf16 %v1874_v43, %v12331_v1  ;;  %v1877_v7 = vld [vmem:[#allocation2 + $0x40] sm:$0xff]  ;;  %1872 = vst.msk [vmem:[#allocation2 + $0x81] sm:$0xff] %vm921_vm3, %v1864_v62  ;;  %v1862_v9 = vmax.f32 %v1854_v28, 0.0 }
 0x26e   : > { %4094 = vst.msk [vmem:[#allocation2 + $0x11] sm:$0xff] %vm921_vm3, %v12332_v34  ;;  %v10766_v8 = vld [vmem:[#allocation2 + $0x42] sm:$0xff]  ;;  %9268 = vmatprep.mubr.msk.bf16.mxu1 %vm921_vm3, %v1894_v58  ;;  %v2068_v10 = vpack.c.bf16 %v10755_v55, %v12341_v40  ;;  %v2171_v60 = vpack.c.bf16 %v1877_v7, %v10745_v42  ;;  %v12343_v34 = vld [vmem:[#allocation17_spill] sm:$0xff] }
 0x26f   : > { %9278 = vmatprep.mubr.msk.bf16.mxu0 %vm921_vm3, %v1881_v2  ;;  %4097 = vst.msk [vmem:[#allocation2 + $0x41] sm:$0xff] %vm921_vm3, %v12333_v33  ;;  %v10773_v11 = vld [vmem:[#allocation2 + $0x21] sm:$0xff]  ;;  %1870 = vst.msk [vmem:[#allocation2 + $0x61] sm:$0xff] %vm921_vm3, %v1862_v9  ;;  %v2375_v62 = vpack.c.bf16 %v10766_v8, %v10747_v53 }
 0x270   : > { %v1875_v63 = vld [vmem:[#allocation2 + $0x20] sm:$0xff]  ;;  %v10780_v14 = vpack.c.bf16 %v10743_v38, %v10773_v11  ;;  %v10797_v52 = vld [vmem:[#allocation2 + $0x71] sm:$0xff]  ;;  %v2272_v56 = vpack.c.bf16 %v10773_v11, %v10753_v61  ;;  %v2495_v61 = vsel %vm978_vm2, %v8273_v0, 0  ;;  %v12260_v11 = vlaneseq }
 0x271   : > { %v10775_v12 = vld [vmem:[#allocation2 + $0x22] sm:$0xff]  ;;  %v10783_v15 = vpack.c.bf16 %v10745_v42, %v1875_v63  ;;  %v1880_v23 = vld [vmem:[#allocation2 + $0x70] sm:$0xff]  ;;  %v2170_v5 = vpack.c.bf16 %v1875_v63, %v1874_v43  ;;  %v2273_v43 = vpack.c.bf16 %v10764_v4, %v10743_v38  ;;  %v12342_v38 = vmov 0.0  }
 0x272   : > { %4095 = vst.msk [vmem:[#allocation2 + $0x21] sm:$0xff] %vm921_vm3, %v12336_v21  ;;  %v10799_v25 = vld [vmem:[#allocation2 + $0x72] sm:$0xff]  ;;  %9269 = vmatmul.mubr.msk.bf16.vlgmr.msra.gmra.mxu1 %vm921_vm3, %v10780_v14  ;;  %v2069_v57 = vpack.c.bf16 %v10747_v53, %v10775_v12  ;;  %v2374_v59 = vpack.c.bf16 %v10775_v12, %v10755_v55  ;;  %v2597_v55 = vsel %vm978_vm2, %v8278_v54, 0  ;;  %v8283_v58 = vld [vmem:[%s12317_s0 + $0x20] sm:$0xf]  ;;  %v2804_v63 = vshrl.u32 %v12260_v11, 7 }
 0x273   : > { %9279 = vmatmul.mubr.msk.bf16.vlgmr.msra.gmra.mxu0 %vm921_vm3, %v10783_v15  ;;  %4100 = vst.msk [vmem:[#allocation2 + $0x71] sm:$0xff] %vm921_vm3, %v12337_v26  ;;  %v1891_v29 = vld [vmem:[#allocation2 + $0x51] sm:$0xff]  ;;  %9287 = vmatpush3.bf16.msra.mxu1 %v2087_v36  ;;  %v2699_v2 = vsel %vm978_vm2, %v8283_v58, 0  ;;  %v12345_v9 = vld [vmem:[#allocation19_spill] sm:$0xff]  ;;  %v12259_v12 = vstv %s10910_s7  ;;  %v2924_v36 = vsel %vm978_vm2, %v2903_v16, 0 }
 0x274   : > { %v1878_v24 = vld [vmem:[#allocation2 + $0x50] sm:$0xff]  ;;  %9297 = vmatpush3.bf16.msra.mxu0 %v2189_v19  ;;  %v10808_v31 = vpack.c.bf16 %v1891_v29, %v10764_v4  ;;  %9902 = vmatprep.subr.msk.bf16.mxu1 %vm978_vm2, %v8263_v18  ;;  %v10816_v32 = vld [vmem:[#allocation2 + $0x80] sm:$0xff]  ;;  %vm2805_vm4 = vcmp.eq.s32.totalorder %v2804_v63, %v12259_v12 }
 0x275   : > { %v2065_v22 = vld [vmem:[#allocation2 + $0x52] sm:$0xff]  ;;  %v10810_v13 = vpack.c.bf16 %v1878_v24, %v1877_v7  ;;  %9903 = vmatprep.subr.msk.bf16.mxu0 %vm978_vm2, %v8268_v20  ;;  %v10818_v35 = vld [vmem:[#allocation2 + $0x81] sm:$0xff]  ;;  %v2173_v46 = vpack.c.bf16 %v10816_v32, %v1880_v23  ;;  %v2479_v4 = vpack.c.bf16 %v12343_v34, %v10816_v32 }
 0x276   : > { %4098 = vst.msk [vmem:[#allocation2 + $0x51] sm:$0xff] %vm921_vm3, %v12338_v30  ;;  %v10820_v45 = vld [vmem:[#allocation2 + $0x82] sm:$0xff]  ;;  %9272 = vmatprep.mubr.msk.bf16.mxu1 %vm921_vm3, %v10808_v31  ;;  %v2070_v27 = vpack.c.bf16 %v2065_v22, %v10766_v8  ;;  %v2275_v53 = vpack.c.bf16 %v10818_v35, %v10797_v52 }
 0x277   : > { %9282 = vmatprep.mubr.msk.bf16.mxu0 %vm921_vm3, %v10810_v13  ;;  %4101 = vst.msk [vmem:[#allocation2 + $0x81] sm:$0xff] %vm921_vm3, %v12339_v37  ;;  %v1892_v6 = vld [vmem:[#allocation2 + $0x61] sm:$0xff]  ;;  %v2377_v1 = vpack.c.bf16 %v10820_v45, %v10799_v25  ;;  %v2683_v33 = vpack.c.bf16 %v12345_v9, %v10820_v45 }
 0x278   : > { %v1879_v39 = vld [vmem:[#allocation2 + $0x60] sm:$0xff]  ;;  %v1897_v17 = vpack.c.bf16 %v10797_v52, %v1892_v6  ;;  %v2274_v28 = vpack.c.bf16 %v1892_v6, %v1891_v29  ;;  %v12344_v7 = vld [vmem:[#allocation20_spill] sm:$0xff] }
 0x279   : > { %v2066_v3 = vld [vmem:[#allocation2 + $0x62] sm:$0xff]  ;;  %v1884_v47 = vpack.c.bf16 %v1880_v23, %v1879_v39  ;;  %v2172_v50 = vpack.c.bf16 %v1879_v39, %v1878_v24  ;;  %v2581_v8 = vpack.c.bf16 %v12344_v7, %v10818_v35 }
 0x27a   : > { %4099 = vst.msk [vmem:[#allocation2 + $0x61] sm:$0xff] %vm921_vm3, %v12340_v49  ;;  %9273 = vmatmul.mubr.msk.bf16.gmra.mxu1 %vm921_vm3, %v1897_v17  ;;  %v2071_v42 = vpack.c.bf16 %v10799_v25, %v2066_v3  ;;  %v2376_v44 = vpack.c.bf16 %v2066_v3, %v2065_v22 }
 0x27b   : > { %9283 = vmatmul.mubr.msk.bf16.gmra.mxu0 %vm921_vm3, %v1884_v47  ;;  %9288 = vmatprep.mubr.msk.bf16.mxu1 %vm921_vm3, %v2068_v10 }
 0x27c   : > { %9298 = vmatprep.mubr.msk.bf16.mxu0 %vm921_vm3, %v2170_v5 }
 0x282   : > { %9289 = vmatmul.mubr.msk.bf16.vlgmr.msra.gmra.mxu1 %vm921_vm3, %v2069_v57 }
 0x283   : > { %9299 = vmatmul.mubr.msk.bf16.vlgmr.msra.gmra.mxu0 %vm921_vm3, %v2171_v60  ;;  %9292 = vmatprep.mubr.msk.bf16.mxu1 %vm921_vm3, %v2070_v27 }
 0x284   : > { %9302 = vmatprep.mubr.msk.bf16.mxu0 %vm921_vm3, %v2172_v50  ;;  %9307 = vmatpush3.bf16.msra.mxu1 %v2291_v41 }
 0x285   : > { %9317 = vmatpush3.bf16.msra.mxu0 %v2393_v48  ;;  %9904 = vmatprep.subr.msk.bf16.mxu1 %vm978_vm2, %v8273_v0 }
 0x286   : > { %9905 = vmatprep.subr.msk.bf16.mxu0 %vm978_vm2, %v8278_v54 }
 0x28a   : > { %9293 = vmatmul.mubr.msk.bf16.gmra.mxu1 %vm921_vm3, %v2071_v42 }
 0x28b   : > { %9303 = vmatmul.mubr.msk.bf16.gmra.mxu0 %vm921_vm3, %v2173_v46  ;;  %9308 = vmatprep.mubr.msk.bf16.mxu1 %vm921_vm3, %v2272_v56 }
 0x28c   : > { %9318 = vmatprep.mubr.msk.bf16.mxu0 %vm921_vm3, %v2374_v59 }
 0x292   : > { %9309 = vmatmul.mubr.msk.bf16.vlgmr.msra.gmra.mxu1 %vm921_vm3, %v2273_v43 }
 0x293   : > { %9319 = vmatmul.mubr.msk.bf16.vlgmr.msra.gmra.mxu0 %vm921_vm3, %v2375_v62  ;;  %9312 = vmatprep.mubr.msk.bf16.mxu1 %vm921_vm3, %v2274_v28 }
 0x294   : > { %9322 = vmatprep.mubr.msk.bf16.mxu0 %vm921_vm3, %v2376_v44  ;;  %9327 = vmatpush3.bf16.msra.mxu1 %v2495_v61 }
 0x295   : > { %9337 = vmatpush3.bf16.msra.mxu0 %v2597_v55  ;;  %9906 = vmatprep.subr.msk.bf16.mxu1 %vm978_vm2, %v8283_v58 }
 0x296   : > { %9356 = vmatprep.subr.mxu0 %v12342_v38 }
 0x29a   : > { %9313 = vmatmul.mubr.msk.bf16.gmra.mxu1 %vm921_vm3, %v2275_v53 }
 0x29b   : > { %9323 = vmatmul.mubr.msk.bf16.gmra.mxu0 %vm921_vm3, %v2377_v1  ;;  %9328 = vmatprep.mubr.msk.bf16.mxu1 %vm921_vm3, %v10783_v15  ;;  %v2808_v15 = vld [vmem:[%s12221_s10] sm:$0xff] }
 0x29c   : > { %9338 = vmatprep.mubr.msk.bf16.mxu0 %vm921_vm3, %v10780_v14  ;;  %v8290_v14 = vsel %vm2805_vm4, 1.0, %v12342_v38 }
 0x2a2   : > { %9329 = vmatmul.mubr.msk.bf16.vlgmr.msra.gmra.mxu1 %vm921_vm3, %v10810_v13 }
 0x2a3   : > { %9339 = vmatmul.mubr.msk.bf16.vlgmr.msra.gmra.mxu0 %vm921_vm3, %v10808_v31  ;;  %9332 = vmatprep.mubr.msk.bf16.mxu1 %vm921_vm3, %v1884_v47 }
 0x2a4   : > { %9342 = vmatprep.mubr.msk.bf16.mxu0 %vm921_vm3, %v1897_v17  ;;  %9347 = vmatpush3.bf16.msra.mxu1 %v2699_v2 }
 0x2a5   : > { %9357 = vmatpush3.msk.msra.mxu0 %vm978_vm2, %v8290_v14 }
 0x2a6   : > { %9907 = vmatprep.subr.msk.bf16.mxu0 %vm978_vm2, %v2903_v16 }
 0x2aa   : > { %9333 = vmatmul.mubr.msk.bf16.gmra.mxu1 %vm921_vm3, %v2479_v4 }
 0x2ab   : > { %9343 = vmatmul.mubr.msk.bf16.gmra.mxu0 %vm921_vm3, %v2581_v8  ;;  %9348 = vmatprep.mubr.msk.bf16.mxu1 %vm921_vm3, %v2069_v57 }
 0x2ac   : > { %9358 = vmatprep.mubr.msk.f32.mxu0 %vm10190_vm5, %v12342_v38 }
 0x2b2   : > { %9349 = vmatmul.mubr.msk.bf16.vlgmr.msra.gmra.mxu1 %vm921_vm3, %v2070_v27 }
 0x2b3   : > { %9352 = vmatprep.mubr.msk.bf16.mxu1 %vm921_vm3, %v2071_v42  ;;  %9359 = vmatmul.mubr.msk.f32.vlgmr.msra.gmra.mxu0 %vm2809_vm6, %v2808_v15 }
 0x2b4   : > { %9362 = vmatpush3.bf16.msra.mxu0 %v2924_v36 }
 0x2b5   : > { %9908 = vmatprep.subr.msk.bf16.mxu0 %vm978_vm2, %v10932_v51 }
 0x2ba   : > { %9353 = vmatmul.mubr.msk.bf16.gmra.mxu1 %vm921_vm3, %v2683_v33 }
 0x332   : > { %v9270_v19 = vpop.f32.mrf.mxu1 }
 0x333   : > { %v9280_v18 = vpop.f32.mrf.mxu0 }
 0x334   : > { %v1949_v20 = vpop.f32.mrf.mxu1  ;;  %v2038_v34 = vadd.f32 %v9280_v18, %v9270_v19 }
 0x335   : > { %v2029_v21 = vpop.f32.mrf.mxu0 }
 0x336   : > { %v9271_v52 = vpop.f32.mrf.mxu1  ;;  %v2030_v2 = vadd.f32 %v2029_v21, %v1949_v20 }
 0x337   : > { %v9281_v23 = vpop.f32.mrf.mxu0 }
 0x338   : > { %v1952_v25 = vpop.f32.mrf.mxu1  ;;  %v2041_v8 = vadd.f32 %v9281_v23, %v9271_v52 }
 0x339   : > { %v2032_v26 = vpop.f32.mrf.mxu0 }
 0x33a   : > { %v9274_v29 = vpop.f32.mrf.mxu1  ;;  %v2033_v14 = vadd.f32 %v2032_v26, %v1952_v25 }
 0x33b   : > { %v9284_v24 = vpop.f32.mrf.mxu0 }
 0x33c   : > { %v1965_v22 = vpop.f32.mrf.mxu1 }
 0x33d   : > { %v2045_v31 = vpop.f32.mrf.mxu0 }
 0x33e   : > { %v9275_v13 = vpop.f32.mrf.mxu1 }
 0x33f   : > { %v9285_v30 = vpop.f32.mrf.mxu0 }
 0x340   : > { %v1968_v32 = vpop.f32.mrf.mxu1  ;;  %v2057_v21 = vadd.f32 %v9285_v30, %v9275_v13 }
 0x341   : > { %v2048_v35 = vpop.f32.mrf.mxu0 }
 0x342   : > { %v9290_v45 = vpop.f32.mrf.mxu1 }
 0x343   : > { %v9300_v37 = vpop.f32.mrf.mxu0  ;;  %v2156_v33 = vadd.f32 %v9290_v45, %v2038_v34 }
 0x344   : > { %v2123_v6 = vpop.f32.mrf.mxu1 }
 0x345   : > { %v2225_v39 = vpop.f32.mrf.mxu0  ;;  %v2154_v9 = vadd.f32 %v2123_v6, %v2030_v2  ;;  %v2258_v38 = vadd.f32 %v9300_v37, %v2156_v33  ;;  %v2049_v6 = vadd.f32 %v2048_v35, %v1968_v32 }
 0x346   : > { %v9291_v3 = vpop.f32.mrf.mxu1 }
 0x347   : > { %v9301_v17 = vpop.f32.mrf.mxu0  ;;  %v2157_v15 = vadd.f32 %v9291_v3, %v2041_v8  ;;  %v2256_v12 = vadd.f32 %v2225_v39, %v2154_v9 }
 0x348   : > { %v2126_v47 = vpop.f32.mrf.mxu1 }
 0x349   : > { %v2228_v49 = vpop.f32.mrf.mxu0  ;;  %v2155_v11 = vadd.f32 %v2126_v47, %v2033_v14 }
 0x34a   : > { %v9294_v40 = vpop.f32.mrf.mxu1 }
 0x34b   : > { %v10936_v10 = vpop.f32.mrf.mxu0  ;;  %v2257_v52 = vadd.f32 %v2228_v49, %v2155_v11 }
 0x34c   : > { %v2139_v5 = vpop.f32.mrf.mxu1 }
 0x34d   : > { %v2241_v57 = vpop.f32.mrf.mxu0 }
 0x34e   : > { %v9295_v60 = vpop.f32.mrf.mxu1 }
 0x34f   : > { %v9305_v27 = vpop.f32.mrf.mxu0  ;;  %v2161_v3 = vadd.f32 %v9295_v60, %v2057_v21 }
 0x350   : > { %v2142_v50 = vpop.f32.mrf.mxu1 }
 0x351   : > { %v10938_v41 = vpop.f32.mrf.mxu0  ;;  %v2159_v47 = vadd.f32 %v2142_v50, %v2049_v6  ;;  %v2263_v11 = vadd.f32 %v9305_v27, %v2161_v3 }
 0x352   : > { %12348 = vst [vmem:[#allocation24_spill] sm:$0xff] %v10938_v41  ;;  %v9310_v48 = vpop.f32.mrf.mxu1 }
 0x353   : > { %v9320_v0 = vpop.f32.mrf.mxu0  ;;  %v2360_v20 = vadd.f32 %v9310_v48, %v2258_v38 }
 0x354   : > { %v2327_v54 = vpop.f32.mrf.mxu1 }
 0x355   : > { %v2429_v42 = vpop.f32.mrf.mxu0  ;;  %v2358_v41 = vadd.f32 %v2327_v54, %v2256_v12  ;;  %v2462_v37 = vadd.f32 %v9320_v0, %v2360_v20 }
 0x356   : > { %v9311_v46 = vpop.f32.mrf.mxu1 }
 0x357   : > { %v9321_v56 = vpop.f32.mrf.mxu0  ;;  %v2460_v2 = vadd.f32 %v2429_v42, %v2358_v41 }
 0x358   : > { %v2330_v59 = vpop.f32.mrf.mxu1 }
 0x359   : > { %v2432_v43 = vpop.f32.mrf.mxu0  ;;  %v2359_v39 = vadd.f32 %v2330_v59, %v2257_v52  ;;  %v12352_v35 = vld [vmem:[#allocation24_spill] sm:$0xff] }
 0x35a   : > { %v9314_v62 = vpop.f32.mrf.mxu1  ;;  %v2261_v49 = vadd.f32 %v12352_v35, %v2159_v47 }
 0x35b   : > { %v10940_v28 = vpop.f32.mrf.mxu0  ;;  %v2461_v30 = vadd.f32 %v2432_v43, %v2359_v39 }
 0x35c   : > { %12349 = vst [vmem:[#allocation25_spill] sm:$0xff] %v10940_v28  ;;  %v2343_v44 = vpop.f32.mrf.mxu1  ;;  %v2259_v28 = vadd.f32 %v9301_v17, %v2157_v15 }
 0x35d   : > { %v2445_v61 = vpop.f32.mrf.mxu0 }
 0x35e   : > { %v9315_v55 = vpop.f32.mrf.mxu1  ;;  %v2361_v45 = vadd.f32 %v9311_v46, %v2259_v28 }
 0x35f   : > { %v10942_v58 = vpop.f32.mrf.mxu0  ;;  %v2365_v50 = vadd.f32 %v9315_v55, %v2263_v11  ;;  %v8288_v55 = vld [vmem:[%s12355_s27] ss:$0 sm:$0xff]  ;;  %v8336_v11 = vld [vmem:[%s12346_s4 + $0x8] sm:$0xf] }
 0x360   : > { %12350 = vst [vmem:[#allocation26_spill] sm:$0xff] %v10942_v58  ;;  %v2346_v53 = vpop.f32.mrf.mxu1  ;;  %v2046_v58 = vadd.f32 %v2045_v31, %v1965_v22  ;;  %v2463_v12 = vadd.f32 %v9321_v56, %v2361_v45 }
 0x361   : > { %v10944_v1 = vpop.f32.mrf.mxu0  ;;  %v2363_v0 = vadd.f32 %v2346_v53, %v2261_v49 }
 0x362   : > { %12351 = vst [vmem:[#allocation10_spill] sm:$0xff] %v10944_v1  ;;  %v9330_v4 = vpop.f32.mrf.mxu1  ;;  %v2054_v1 = vadd.f32 %v9284_v24, %v9274_v29  ;;  %v2158_v23 = vadd.f32 %v2139_v5, %v2046_v58 }
 0x363   : > { %v9340_v7 = vpop.f32.mrf.mxu0  ;;  %v2564_v24 = vadd.f32 %v9330_v4, %v2462_v37  ;;  %v12353_v56 = vld [vmem:[#allocation25_spill] sm:$0xff] }
 0x364   : > { %v2531_v63 = vpop.f32.mrf.mxu1  ;;  %v2160_v25 = vadd.f32 %v9294_v40, %v2054_v1  ;;  %v2260_v31 = vadd.f32 %v2241_v57, %v2158_v23 }
 0x365   : > { %v2633_v16 = vpop.f32.mrf.mxu0  ;;  %v2562_v29 = vadd.f32 %v2531_v63, %v2460_v2  ;;  %v2666_v57 = vadd.f32 %v9340_v7, %v2564_v24 }
 0x366   : > { %v9331_v36 = vpop.f32.mrf.mxu1  ;;  %v2262_v38 = vadd.f32 %v10936_v10, %v2160_v25  ;;  %v2362_v17 = vadd.f32 %v2343_v44, %v2260_v31 }
 0x367   : > { %v9341_v19 = vpop.f32.mrf.mxu0  ;;  %v2565_v32 = vadd.f32 %v9331_v36, %v2463_v12  ;;  %v2664_v41 = vadd.f32 %v2633_v16, %v2562_v29  ;;  %v12354_v44 = vld [vmem:[#allocation26_spill] sm:$0xff]  ;;  %v12357_v12 = vld [vmem:[#allocation23_spill] sm:$0xff] }
 0x368   : > { %v2534_v51 = vpop.f32.mrf.mxu1  ;;  %v2364_v40 = vadd.f32 %v9314_v62, %v2262_v38  ;;  %v2464_v42 = vadd.f32 %v2445_v61, %v2362_v17  ;;  %v2467_v58 = vadd.f32 %v12354_v44, %v2365_v50  ;;  %v3204_v29 = vsel %vm978_vm2, %v12357_v12, 0  ;;  %v11000_v44 = vld [vmem:[%s12362_s26] ss:$0 sm:$0xff] }
 0x369   : > { %v2636_v34 = vpop.f32.mrf.mxu0  ;;  %v2563_v48 = vadd.f32 %v2534_v51, %v2461_v30  ;;  %v2667_v46 = vadd.f32 %v9341_v19, %v2565_v32  ;;  %v12356_v53 = vld [vmem:[#allocation10_spill] sm:$0xff]  ;;  %v3515_v50 = vsel %vm978_vm2, %v8336_v11, 0 }
 0x36a   : > { %v9334_v18 = vpop.f32.mrf.mxu1  ;;  %v2466_v59 = vadd.f32 %v12353_v56, %v2364_v40  ;;  %v2465_v4 = vadd.f32 %v12356_v53, %v2363_v0 }
 0x36b   : > { %v9344_v5 = vpop.f32.mrf.mxu0  ;;  %v2665_v1 = vadd.f32 %v2636_v34, %v2563_v48 }
 0x36c   : > { %v2547_v26 = vpop.f32.mrf.mxu1  ;;  %v2568_v7 = vadd.f32 %v9334_v18, %v2466_v59  ;;  %v2886_v59 = vld [vmem:[%s12222_s11] sm:$0x1] }
 0x36d   : > { %v2649_v27 = vpop.f32.mrf.mxu0  ;;  %v2566_v62 = vadd.f32 %v2547_v26, %v2464_v42 }
 0x36e   : > { %v9335_v22 = vpop.f32.mrf.mxu1  ;;  %v2670_v21 = vadd.f32 %v9344_v5, %v2568_v7 }
 0x36f   : > { %v2569_v8 = vadd.f32 %v9335_v22, %v2467_v58  ;;  %v9345_v14 = vpop.f32.mrf.mxu0  ;;  %v2668_v36 = vadd.f32 %v2649_v27, %v2566_v62 }
 0x370   : > { %v2550_v13 = vpop.f32.mrf.mxu1 }
 0x371   : > { %v2567_v20 = vadd.f32 %v2550_v13, %v2465_v4  ;;  %v2671_v45 = vadd.f32 %v9345_v14, %v2569_v8  ;;  %v2652_v3 = vpop.f32.mrf.mxu0 }
 0x372   : > { %v9350_v60 = vpop.f32.mrf.mxu1 }
 0x373   : > { %v2768_v43 = vadd.f32 %v9350_v60, %v2666_v57  ;;  %v2669_v47 = vadd.f32 %v2652_v3, %v2567_v20  ;;  %v10982_v0 = vpop.f32.mrf.mxu0 }
 0x374   : > { %v2735_v54 = vpop.f32.mrf.mxu1  ;;  %9371 = vmatprep.subr.mxu1 %v10982_v0 }
 0x375   : > { %v2766_v10 = vadd.f32 %v2735_v54, %v2664_v41  ;;  %v2783_v15 = vadd.f32 %v8288_v55, %v2768_v43  ;;  %v8366_v41 = vld [vmem:[%s12346_s4 + $0xc] sm:$0xf]  ;;  %v9360_v57 = vpop.f32.mrf.mxu0  ;;  %9372 = vmatpush3.msra.mxu1 %v10982_v0  ;;  %v12358_v54 = vlaneseq }
 0x376   : > { %v9351_v28 = vpop.f32.mrf.mxu1  ;;  %v3794_v48 = vsel %vm978_vm2, %v8366_v41, 0  ;;  %9395 = vmatprep.subr.mxu1 %v10982_v0 }
 0x377   : > { %v2769_v51 = vadd.f32 %v9351_v28, %v2667_v46  ;;  %v2781_v9 = vadd.f32 %v8288_v55, %v2766_v10  ;;  %v2791_v18 = vmax.f32 %v2783_v15, 0.0  ;;  %v2798_v42 = vand.u32 127, %v12358_v54 }
 0x378   : > { %v2738_v61 = vpop.f32.mrf.mxu1  ;;  %v12359_v46 = vstv %s10910_s7  ;;  %v12360_v10 = vmov 0.0  }
 0x379   : > { %v2784_v33 = vadd.f32 %v8288_v55, %v2769_v51  ;;  %v2767_v63 = vadd.f32 %v2738_v61, %v2665_v1  ;;  %v2789_v6 = vmax.f32 %v2781_v9, 0.0  ;;  %vm2800_vm7 = vcmp.eq.s32.totalorder %v2798_v42, %v12359_v46 }
 0x37a   : > { %v9354_v16 = vpop.f32.mrf.mxu1  ;;  %v10991_v56 = vsel %vm2800_vm7, 1.0, %v12360_v10 }
 0x37b   : > { %v2782_v19 = vadd.f32 %v8288_v55, %v2767_v63  ;;  %v2792_v52 = vmax.f32 %v2784_v33, 0.0  ;;  %v2772_v2 = vadd.f32 %v9354_v16, %v2670_v21  ;;  %12361 = vst [vmem:[#allocation9_spill] sm:$0xff] %v10991_v56  ;;  %v2887_v27 = vmul.f32 %v10991_v56, %v2886_v59 }
 0x37c   : > { %v2751_v23 = vpop.f32.mrf.mxu1 }
 0x37d   : > { %v2790_v25 = vmax.f32 %v2782_v19, 0.0  ;;  %v2770_v26 = vadd.f32 %v2751_v23, %v2668_v36  ;;  %v2900_v22 = vpack.c.bf16 %v2792_v52, %v2791_v18  ;;  %v2787_v30 = vadd.f32 %v8288_v55, %v2772_v2 }
 0x37e   : > { %v9355_v39 = vpop.f32.mrf.mxu1  ;;  %v2889_v43 = vsel %vm2888_vm8, %v2887_v27, 0.0 }
 0x37f   : > { %v2899_v37 = vpack.c.bf16 %v2790_v25, %v2789_v6  ;;  %v2773_v34 = vadd.f32 %v9355_v39, %v2671_v45  ;;  %v2785_v38 = vadd.f32 %v8288_v55, %v2770_v26  ;;  %v2795_v40 = vmax.f32 %v2787_v30, 0.0  ;;  %2890 = vadd.xlane.f32.xlu0 %v2889_v43 }
 0x380   : > { %v2754_v31 = vpop.f32.mrf.mxu1 }
 0x381   : > { %v2788_v24 = vadd.f32 %v8288_v55, %v2773_v34  ;;  %v2771_v13 = vadd.f32 %v2754_v31, %v2669_v47  ;;  %9363 = vmatprep.mubr.msk.bf16.mxu0 %vm921_vm3, %v2899_v37  ;;  %v2793_v35 = vmax.f32 %v2785_v38, 0.0 }
 0x382   : > { %9364 = vmatmul.mubr.msk.bf16.vlgmr.msra.gmra.mxu0 %vm921_vm3, %v2900_v22 }
 0x383   : > { %v2786_v17 = vadd.f32 %v8288_v55, %v2771_v13  ;;  %9386 = vmatpush3.bf16.msra.mxu0 %v3204_v29  ;;  %v2796_v32 = vmax.f32 %v2788_v24, 0.0 }
 0x384   : > { %9909 = vmatprep.subr.msk.bf16.mxu0 %vm978_vm2, %v8336_v11 }
 0x385   : > { %v2794_v49 = vmax.f32 %v2786_v17, 0.0  ;;  %v2902_v60 = vpack.c.bf16 %v2796_v32, %v2795_v40 }
 0x387   : > { %v2901_v5 = vpack.c.bf16 %v2794_v49, %v2793_v35 }
 0x389   : > { %9367 = vmatprep.mubr.msk.bf16.mxu0 %vm921_vm3, %v2901_v5 }
 0x38a   : > { %9368 = vmatmul.mubr.msk.bf16.gmra.mxu0 %vm921_vm3, %v2902_v60 }
 0x38b   : > { %9387 = vmatprep.mubr.msk.bf16.mxu0 %vm921_vm3, %v2899_v37 }
 0x392   : > { %9388 = vmatmul.mubr.msk.bf16.vlgmr.msra.gmra.mxu0 %vm921_vm3, %v2900_v22 }
 0x393   : > { %9391 = vmatprep.mubr.msk.bf16.mxu0 %vm921_vm3, %v2901_v5  ;;  %9410 = vmatpush3.bf16.msra.mxu0 %v3515_v50 }
 0x394   : > { %9910 = vmatprep.subr.msk.bf16.mxu0 %vm978_vm2, %v8366_v41 }
 0x39a   : > { %9392 = vmatmul.mubr.msk.bf16.gmra.mxu0 %vm921_vm3, %v2902_v60 }
 0x39b   : > { %9411 = vmatprep.mubr.msk.bf16.mxu0 %vm921_vm3, %v2899_v37 }
 0x3a2   : > { %9412 = vmatmul.mubr.msk.bf16.vlgmr.msra.gmra.mxu0 %vm921_vm3, %v2900_v22 }
 0x3a3   : > { %9415 = vmatprep.mubr.msk.bf16.mxu0 %vm921_vm3, %v2901_v5  ;;  %9434 = vmatpush3.bf16.msra.mxu0 %v3794_v48 }
 0x3aa   : > { %9416 = vmatmul.mubr.msk.bf16.gmra.mxu0 %vm921_vm3, %v2902_v60 }
 0x3ab   : > { %9435 = vmatprep.mubr.msk.bf16.mxu0 %vm921_vm3, %v2899_v37 }
 0x3b2   : > { %9436 = vmatmul.mubr.msk.bf16.vlgmr.msra.gmra.mxu0 %vm921_vm3, %v2900_v22 }
 0x3b3   : > { %9439 = vmatprep.mubr.msk.bf16.mxu0 %vm921_vm3, %v2901_v5 }
 0x3ba   : > { %9440 = vmatmul.mubr.msk.bf16.gmra.mxu0 %vm921_vm3, %v2902_v60 }
 0x408   : > { %v2891_v36 = vpop.xlane.xlu0 %2890 }
 0x409   : > { %v2892_v21 = vrot.slane %v2891_v36, 4 }
 0x40b   : > { %v2893_v45 = vadd.f32 %v2892_v21, %v2891_v36 }
 0x40d   : > { %v2894_v18 = vrot.slane %v2893_v45, 2 }
 0x40f   : > { %v2895_v47 = vadd.f32 %v2894_v18, %v2893_v45 }
 0x411   : > { %v2896_v12 = vrot.slane %v2895_v47, 1 }
 0x413   : > { %v2897_v24 = vadd.f32 %v2896_v12, %v2895_v47 }
 0x415   : > { %9920 = vpush %v2897_v24 }
 0x442   : > { %v9365_v28 = vpop.f32.mrf.mxu0 }
 0x443   : > { %v2969_v51 = vadd.f32 %v9365_v28, %v11000_v44 }
 0x444   : > { %v2960_v58 = vpop.f32.mrf.mxu0 }
 0x445   : > { %v2961_v1 = vadd.f32 %v11000_v44, %v2960_v58  ;;  %v2993_v9 = vmax.f32 %v2969_v51, 0.0 }
 0x446   : > { %v9366_v62 = vpop.f32.mrf.mxu0  ;;  %s9921_s7 = spop %9920 }
 0x447   : > { %v2991_v55 = vmax.f32 %v2961_v1, 0.0  ;;  %v2972_v61 = vadd.f32 %v9366_v62, %v11000_v44 }
 0x448   : > { %v2963_v53 = vpop.f32.mrf.mxu0 }
 0x449   : > { %v2964_v4 = vadd.f32 %v11000_v44, %v2963_v53  ;;  %9373 = vmatprep.mubr.msk.f32.mxu1 %vm921_vm3, %v2991_v55  ;;  %v2994_v15 = vmax.f32 %v2972_v61, 0.0 }
 0x44a   : > { %v9369_v7 = vpop.f32.mrf.mxu0 }
 0x44b   : > { %v2992_v8 = vmax.f32 %v2964_v4, 0.0  ;;  %v2985_v20 = vadd.f32 %v9369_v7, %v11000_v44 }
 0x44c   : > { %v2976_v33 = vpop.f32.mrf.mxu0 }
 0x44d   : > { %v2977_v63 = vadd.f32 %v11000_v44, %v2976_v33  ;;  %9374 = vmatmul.mubr.msk.f32.vlgmr.msra.gmra.mxu1 %vm921_vm3, %v2992_v8  ;;  %v2997_v26 = vmax.f32 %v2985_v20, 0.0 }
 0x44e   : > { %9396 = vmatpush3.msra.mxu1 %v10982_v0  ;;  %v9370_v14 = vpop.f32.mrf.mxu0  ;;  %9376 = vmatprep.mubr.msk.f32.mxu1 %vm921_vm3, %v2993_v9 }
 0x44f   : > { %v2995_v16 = vmax.f32 %v2977_v63, 0.0  ;;  %9419 = vmatprep.subr.mxu1 %v10982_v0  ;;  %v2988_v6 = vadd.f32 %v9370_v14, %v11000_v44 }
 0x450   : > { %v2979_v19 = vpop.f32.mrf.mxu0 }
 0x451   : > { %v2980_v52 = vadd.f32 %v11000_v44, %v2979_v19  ;;  %9377 = vmatmul.mubr.msk.f32.gmra.mxu1 %vm921_vm3, %v2994_v15  ;;  %v2998_v37 = vmax.f32 %v2988_v6, 0.0 }
 0x452   : > { %9379 = vmatprep.mubr.msk.f32.mxu1 %vm921_vm3, %v2995_v16  ;;  %v9389_v23 = vpop.f32.mrf.mxu0 }
 0x453   : > { %v2996_v25 = vmax.f32 %v2980_v52, 0.0  ;;  %v3249_v22 = vadd.f32 %v9389_v23, %v11000_v44 }
 0x454   : > { %v3240_v3 = vpop.f32.mrf.mxu0 }
 0x455   : > { %v3241_v2 = vadd.f32 %v11000_v44, %v3240_v3  ;;  %9380 = vmatmul.mubr.msk.f32.gmra.mxu1 %vm921_vm3, %v2996_v25  ;;  %v3273_v30 = vmax.f32 %v3249_v22, 0.0 }
 0x456   : > { %9382 = vmatprep.mubr.msk.f32.mxu1 %vm921_vm3, %v2997_v26  ;;  %v9390_v39 = vpop.f32.mrf.mxu0 }
 0x457   : > { %v3271_v34 = vmax.f32 %v3241_v2, 0.0  ;;  %v3252_v13 = vadd.f32 %v9390_v39, %v11000_v44 }
 0x458   : > { %v3243_v31 = vpop.f32.mrf.mxu0 }
 0x459   : > { %v3244_v29 = vadd.f32 %v11000_v44, %v3243_v31  ;;  %9383 = vmatmul.mubr.msk.f32.gmra.mxu1 %vm921_vm3, %v2998_v37  ;;  %v3274_v49 = vmax.f32 %v3252_v13, 0.0 }
 0x45a   : > { %v9393_v38 = vpop.f32.mrf.mxu0  ;;  %9397 = vmatprep.mubr.msk.f32.mxu1 %vm921_vm3, %v3271_v34 }
 0x45b   : > { %v3272_v11 = vmax.f32 %v3244_v29, 0.0  ;;  %v3265_v5 = vadd.f32 %v9393_v38, %v11000_v44 }
 0x45c   : > { %v3256_v17 = vpop.f32.mrf.mxu0 }
 0x45d   : > { %v3257_v32 = vadd.f32 %v11000_v44, %v3256_v17  ;;  %9398 = vmatmul.mubr.msk.f32.vlgmr.msra.gmra.mxu1 %vm921_vm3, %v3272_v11  ;;  %v3277_v54 = vmax.f32 %v3265_v5, 0.0 }
 0x45e   : > { %9420 = vmatpush3.msra.mxu1 %v10982_v0  ;;  %v9394_v35 = vpop.f32.mrf.mxu0  ;;  %9400 = vmatprep.mubr.msk.f32.mxu1 %vm921_vm3, %v3273_v30  ;;  %v11071_v30 = vstv %s9921_s7 }
 0x45f   : > { %v3275_v40 = vmax.f32 %v3257_v32, 0.0  ;;  %9443 = vmatprep.subr.mxu1 %v10982_v0  ;;  %v3268_v48 = vadd.f32 %v9394_v35, %v11000_v44 }
 0x460   : > { %v3259_v60 = vpop.f32.mrf.mxu0 }
 0x461   : > { %v3260_v50 = vadd.f32 %v11000_v44, %v3259_v60  ;;  %9401 = vmatmul.mubr.msk.f32.gmra.mxu1 %vm921_vm3, %v3274_v49  ;;  %v3278_v27 = vmax.f32 %v3268_v48, 0.0 }
 0x462   : > { %9403 = vmatprep.mubr.msk.f32.mxu1 %vm921_vm3, %v3275_v40  ;;  %v9413_v41 = vpop.f32.mrf.mxu0 }
 0x463   : > { %v3276_v57 = vmax.f32 %v3260_v50, 0.0  ;;  %v3560_v28 = vadd.f32 %v9413_v41, %v11000_v44 }
 0x464   : > { %v3551_v42 = vpop.f32.mrf.mxu0 }
 0x465   : > { %v3552_v46 = vadd.f32 %v11000_v44, %v3551_v42  ;;  %9404 = vmatmul.mubr.msk.f32.gmra.mxu1 %vm921_vm3, %v3276_v57  ;;  %v3584_v53 = vmax.f32 %v3560_v28, 0.0 }
 0x466   : > { %9406 = vmatprep.mubr.msk.f32.mxu1 %vm921_vm3, %v3277_v54  ;;  %v9414_v59 = vpop.f32.mrf.mxu0 }
 0x467   : > { %v3582_v43 = vmax.f32 %v3552_v46, 0.0  ;;  %v3563_v55 = vadd.f32 %v9414_v59, %v11000_v44 }
 0x468   : > { %v3554_v58 = vpop.f32.mrf.mxu0 }
 0x469   : > { %v3555_v1 = vadd.f32 %v11000_v44, %v3554_v58  ;;  %9407 = vmatmul.mubr.msk.f32.gmra.mxu1 %vm921_vm3, %v3278_v27  ;;  %v3585_v8 = vmax.f32 %v3563_v55, 0.0 }
 0x46a   : > { %v9417_v62 = vpop.f32.mrf.mxu0  ;;  %9421 = vmatprep.mubr.msk.f32.mxu1 %vm921_vm3, %v3582_v43 }
 0x46b   : > { %v3583_v51 = vmax.f32 %v3555_v1, 0.0  ;;  %v3576_v33 = vadd.f32 %v9417_v62, %v11000_v44 }
 0x46c   : > { %v3567_v4 = vpop.f32.mrf.mxu0 }
 0x46d   : > { %v3568_v7 = vadd.f32 %v11000_v44, %v3567_v4  ;;  %9422 = vmatmul.mubr.msk.f32.vlgmr.msra.gmra.mxu1 %vm921_vm3, %v3583_v51  ;;  %v3588_v20 = vmax.f32 %v3576_v33, 0.0 }
 0x46e   : > { %9444 = vmatpush3.msra.mxu1 %v10982_v0  ;;  %v9418_v61 = vpop.f32.mrf.mxu0  ;;  %9424 = vmatprep.mubr.msk.f32.mxu1 %vm921_vm3, %v3584_v53 }
 0x46f   : > { %v3586_v9 = vmax.f32 %v3568_v7, 0.0  ;;  %v3579_v16 = vadd.f32 %v9418_v61, %v11000_v44 }
 0x470   : > { %v3570_v63 = vpop.f32.mrf.mxu0 }
 0x471   : > { %v3571_v14 = vadd.f32 %v11000_v44, %v3570_v63  ;;  %9425 = vmatmul.mubr.msk.f32.gmra.mxu1 %vm921_vm3, %v3585_v8  ;;  %v3589_v52 = vmax.f32 %v3579_v16, 0.0 }
 0x472   : > { %9427 = vmatprep.mubr.msk.f32.mxu1 %vm921_vm3, %v3586_v9  ;;  %v9437_v15 = vpop.f32.mrf.mxu0 }
 0x473   : > { %v3587_v36 = vmax.f32 %v3571_v14, 0.0  ;;  %v3839_v45 = vadd.f32 %v9437_v15, %v11000_v44 }
 0x474   : > { %v3830_v0 = vpop.f32.mrf.mxu0 }
 0x475   : > { %v3831_v19 = vadd.f32 %v11000_v44, %v3830_v0  ;;  %9428 = vmatmul.mubr.msk.f32.gmra.mxu1 %vm921_vm3, %v3587_v36  ;;  %v3863_v2 = vmax.f32 %v3839_v45, 0.0 }
 0x476   : > { %9430 = vmatprep.mubr.msk.f32.mxu1 %vm921_vm3, %v3588_v20  ;;  %v9438_v21 = vpop.f32.mrf.mxu0 }
 0x477   : > { %v3861_v23 = vmax.f32 %v3831_v19, 0.0  ;;  %v3842_v3 = vadd.f32 %v9438_v21, %v11000_v44 }
 0x478   : > { %v3833_v6 = vpop.f32.mrf.mxu0 }
 0x479   : > { %v3834_v25 = vadd.f32 %v11000_v44, %v3833_v6  ;;  %9431 = vmatmul.mubr.msk.f32.gmra.mxu1 %vm921_vm3, %v3589_v52  ;;  %v3864_v34 = vmax.f32 %v3842_v3, 0.0 }
 0x47a   : > { %v9441_v26 = vpop.f32.mrf.mxu0  ;;  %9445 = vmatprep.mubr.msk.f32.mxu1 %vm921_vm3, %v3861_v23 }
 0x47b   : > { %v3862_v18 = vmax.f32 %v3834_v25, 0.0  ;;  %v3855_v31 = vadd.f32 %v9441_v26, %v11000_v44 }
 0x47c   : > { %v3846_v39 = vpop.f32.mrf.mxu0 }
 0x47d   : > { %v3847_v47 = vadd.f32 %v11000_v44, %v3846_v39  ;;  %9446 = vmatmul.mubr.msk.f32.vlgmr.msra.gmra.mxu1 %vm921_vm3, %v3862_v18  ;;  %v3867_v13 = vmax.f32 %v3855_v31, 0.0 }
 0x47e   : > { %v9442_v37 = vpop.f32.mrf.mxu0  ;;  %9448 = vmatprep.mubr.msk.f32.mxu1 %vm921_vm3, %v3863_v2 }
 0x47f   : > { %v3865_v22 = vmax.f32 %v3847_v47, 0.0  ;;  %v3858_v38 = vadd.f32 %v9442_v37, %v11000_v44 }
 0x480   : > { %v3849_v12 = vpop.f32.mrf.mxu0 }
 0x481   : > { %v3850_v29 = vadd.f32 %v11000_v44, %v3849_v12  ;;  %9449 = vmatmul.mubr.msk.f32.gmra.mxu1 %vm921_vm3, %v3864_v34  ;;  %v3868_v11 = vmax.f32 %v3858_v38, 0.0 }
 0x482   : > { %9451 = vmatprep.mubr.msk.f32.mxu1 %vm921_vm3, %v3865_v22 }
 0x483   : > { %v3866_v24 = vmax.f32 %v3850_v29, 0.0 }
 0x485   : > { %9452 = vmatmul.mubr.msk.f32.gmra.mxu1 %vm921_vm3, %v3866_v24 }
 0x486   : > { %9454 = vmatprep.mubr.msk.f32.mxu1 %vm921_vm3, %v3867_v13 }
 0x489   : > { %9455 = vmatmul.mubr.msk.f32.gmra.mxu1 %vm921_vm3, %v3868_v11 }
 0x50d   : > { %v9375_v17 = vpop.f32.mrf.mxu1 }
 0x50e   : > { %v3096_v32 = vadd.f32 %v9375_v17, %v11071_v30 }
 0x50f   : > { %v3090_v35 = vpop.f32.mrf.mxu1 }
 0x510   : > { %v8307_v49 = vmul.f32 -1.442695, %v3096_v32  ;;  %v3091_v40 = vadd.f32 %v3090_v35, %v11071_v30 }
 0x511   : > { %v9378_v44 = vpop.f32.mrf.mxu1 }
 0x512   : > { %10025 = vpow2.f32 %v8307_v49  ;;  %v8306_v5 = vmul.f32 -1.442695, %v3091_v40  ;;  %v3106_v60 = vadd.f32 %v9378_v44, %v11071_v30 }
 0x513   : > { %v3100_v50 = vpop.f32.mrf.mxu1 }
 0x514   : > { %10027 = vpow2.f32 %v8306_v5  ;;  %v8309_v41 = vmul.f32 -1.442695, %v3106_v60  ;;  %v3101_v48 = vadd.f32 %v3100_v50, %v11071_v30 }
 0x515   : > { %v9381_v57 = vpop.f32.mrf.mxu1 }
 0x516   : > { %10029 = vpow2.f32 %v8309_v41  ;;  %v8308_v54 = vmul.f32 -1.442695, %v3101_v48  ;;  %v3116_v42 = vadd.f32 %v9381_v57, %v11071_v30 }
 0x517   : > { %v3110_v46 = vpop.f32.mrf.mxu1 }
 0x518   : > { %10031 = vpow2.f32 %v8308_v54  ;;  %v8311_v59 = vmul.f32 -1.442695, %v3116_v42  ;;  %v3111_v27 = vadd.f32 %v3110_v46, %v11071_v30 }
 0x519   : > { %v9384_v43 = vpop.f32.mrf.mxu1 }
 0x51a   : > { %10033 = vpow2.f32 %v8311_v59  ;;  %v8310_v28 = vmul.f32 -1.442695, %v3111_v27  ;;  %v3126_v58 = vadd.f32 %v9384_v43, %v11071_v30 }
 0x51b   : > { %v3120_v1 = vpop.f32.mrf.mxu1 }
 0x51c   : > { %10035 = vpow2.f32 %v8310_v28  ;;  %v8313_v62 = vmul.f32 -1.442695, %v3126_v58  ;;  %v3121_v55 = vadd.f32 %v3120_v1, %v11071_v30 }
 0x51d   : > { %v9399_v51 = vpop.f32.mrf.mxu1 }
 0x51e   : > { %10037 = vpow2.f32 %v8313_v62  ;;  %v8312_v53 = vmul.f32 -1.442695, %v3121_v55  ;;  %v3375_v14 = vadd.f32 %v9399_v51, %v11071_v30 }
 0x51f   : > { %v10026_v4 = vpop.eup %10025  ;;  %v3369_v7 = vpop.f32.mrf.mxu1 }
 0x520   : > { %v3154_v61 = vadd.f32 1.0, %v10026_v4  ;;  %10039 = vpow2.f32 %v8312_v53  ;;  %v3370_v20 = vadd.f32 %v3369_v7, %v11071_v30  ;;  %v8329_v52 = vmul.f32 -1.442695, %v3375_v14 }
 0x521   : > { %v10028_v8 = vpop.eup %10027  ;;  %v9402_v9 = vpop.f32.mrf.mxu1 }
 0x522   : > { %10041 = vrcp.f32 %v3154_v61  ;;  %v3153_v33 = vadd.f32 1.0, %v10028_v8  ;;  %v8328_v25 = vmul.f32 -1.442695, %v3370_v20  ;;  %v3385_v2 = vadd.f32 %v9402_v9, %v11071_v30 }
 0x523   : > { %v10030_v63 = vpop.eup %10029  ;;  %v3379_v15 = vpop.f32.mrf.mxu1 }
 0x524   : > { %10043 = vrcp.f32 %v3153_v33  ;;  %v3156_v16 = vadd.f32 1.0, %v10030_v63  ;;  %v3380_v34 = vadd.f32 %v3379_v15, %v11071_v30  ;;  %v8331_v38 = vmul.f32 -1.442695, %v3385_v2 }
 0x525   : > { %v10032_v36 = vpop.eup %10031  ;;  %v9405_v0 = vpop.f32.mrf.mxu1 }
 0x526   : > { %10045 = vrcp.f32 %v3156_v16  ;;  %v3155_v19 = vadd.f32 1.0, %v10032_v36  ;;  %v3395_v24 = vadd.f32 %v9405_v0, %v11071_v30  ;;  %v8330_v35 = vmul.f32 -1.442695, %v3380_v34 }
 0x527   : > { %v10034_v21 = vpop.eup %10033  ;;  %v3389_v23 = vpop.f32.mrf.mxu1 }
 0x528   : > { %10047 = vrcp.f32 %v3155_v19  ;;  %v3158_v45 = vadd.f32 1.0, %v10034_v21  ;;  %v3390_v49 = vadd.f32 %v3389_v23, %v11071_v30  ;;  %v8333_v50 = vmul.f32 -1.442695, %v3395_v24 }
 0x529   : > { %v10036_v6 = vpop.eup %10035  ;;  %v9408_v26 = vpop.f32.mrf.mxu1 }
 0x52a   : > { %10049 = vrcp.f32 %v3158_v45  ;;  %v3157_v3 = vadd.f32 1.0, %v10036_v6  ;;  %v3405_v41 = vadd.f32 %v9408_v26, %v11071_v30  ;;  %v8332_v46 = vmul.f32 -1.442695, %v3390_v49 }
 0x52b   : > { %v10038_v18 = vpop.eup %10037  ;;  %10051 = vpow2.f32 %v8329_v52  ;;  %v3399_v39 = vpop.f32.mrf.mxu1 }
 0x52c   : > { %10053 = vrcp.f32 %v3157_v3  ;;  %v3160_v47 = vadd.f32 1.0, %v10038_v18  ;;  %v3400_v59 = vadd.f32 %v3399_v39, %v11071_v30  ;;  %v8335_v1 = vmul.f32 -1.442695, %v3405_v41 }
 0x52d   : > { %v10040_v37 = vpop.eup %10039  ;;  %10055 = vpow2.f32 %v8328_v25  ;;  %v9423_v22 = vpop.f32.mrf.mxu1 }
 0x52e   : > { %10057 = vrcp.f32 %v3160_v47  ;;  %v3159_v31 = vadd.f32 1.0, %v10040_v37  ;;  %v3686_v12 = vadd.f32 %v9423_v22, %v11071_v30  ;;  %v8334_v7 = vmul.f32 -1.442695, %v3400_v59 }
 0x52f   : > { %v11093_v29 = vpop.eup %10041  ;;  %v3680_v13 = vpop.f32.mrf.mxu1 }
 0x530   : > { %10059 = vrcp.f32 %v3159_v31  ;;  %v8351_v11 = vmul.f32 -1.442695, %v3686_v12  ;;  %v3681_v17 = vadd.f32 %v3680_v13, %v11071_v30  ;;  %3179 = vst.msk [vmem:[%s11089_s3 + $0x10] sm:$0xff] %vm3177_vm9, %v11093_v29 }
 0x531   : > { %v11100_v32 = vpop.eup %10043  ;;  %v9426_v40 = vpop.f32.mrf.mxu1 }
 0x532   : > { %10061 = vpow2.f32 %v8351_v11  ;;  %v8350_v44 = vmul.f32 -1.442695, %v3681_v17  ;;  %v3696_v5 = vadd.f32 %v9426_v40, %v11071_v30  ;;  %3178 = vst.msk [vmem:[%s11089_s3] sm:$0xff] %vm3177_vm9, %v11100_v32 }
 0x533   : > { %v11107_v60 = vpop.eup %10045  ;;  %10063 = vpow2.f32 %v8331_v38  ;;  %v3690_v48 = vpop.f32.mrf.mxu1 }
 0x534   : > { %10065 = vpow2.f32 %v8350_v44  ;;  %v8353_v57 = vmul.f32 -1.442695, %v3696_v5  ;;  %v3691_v54 = vadd.f32 %v3690_v48, %v11071_v30  ;;  %3181 = vst.msk [vmem:[%s11089_s3 + $0x30] sm:$0xff] %vm3177_vm9, %v11107_v60 }
 0x535   : > { %v11114_v42 = vpop.eup %10047  ;;  %10067 = vpow2.f32 %v8330_v35  ;;  %v9429_v27 = vpop.f32.mrf.mxu1 }
 0x536   : > { %10069 = vpow2.f32 %v8353_v57  ;;  %v8352_v43 = vmul.f32 -1.442695, %v3691_v54  ;;  %v3706_v28 = vadd.f32 %v9429_v27, %v11071_v30  ;;  %3180 = vst.msk [vmem:[%s11089_s3 + $0x20] sm:$0xff] %vm3177_vm9, %v11114_v42 }
 0x537   : > { %v11121_v58 = vpop.eup %10049  ;;  %10071 = vpow2.f32 %v8333_v50  ;;  %v3700_v62 = vpop.f32.mrf.mxu1 }
 0x538   : > { %v10052_v55 = vpop.eup %10051  ;;  %10073 = vpow2.f32 %v8352_v43  ;;  %v8355_v51 = vmul.f32 -1.442695, %v3706_v28  ;;  %v3701_v53 = vadd.f32 %v3700_v62, %v11071_v30  ;;  %3183 = vst.msk [vmem:[%s11089_s3 + $0x50] sm:$0xff] %vm3177_vm9, %v11121_v58 }
 0x539   : > { %v11127_v4 = vpop.eup %10053  ;;  %10075 = vpow2.f32 %v8332_v46  ;;  %v9432_v61 = vpop.f32.mrf.mxu1  ;;  %v3433_v14 = vadd.f32 1.0, %v10052_v55 }
 0x53a   : > { %v10056_v8 = vpop.eup %10055  ;;  %10077 = vpow2.f32 %v8355_v51  ;;  %v8354_v9 = vmul.f32 -1.442695, %v3701_v53  ;;  %v3716_v33 = vadd.f32 %v9432_v61, %v11071_v30  ;;  %3182 = vst.msk [vmem:[%s11089_s3 + $0x40] sm:$0xff] %vm3177_vm9, %v11127_v4 }
 0x53b   : > { %v11133_v63 = vpop.eup %10057  ;;  %10079 = vpow2.f32 %v8335_v1  ;;  %v3710_v15 = vpop.f32.mrf.mxu1  ;;  %v3432_v0 = vadd.f32 1.0, %v10056_v8 }
 0x53c   : > { %10081 = vpow2.f32 %v8354_v9  ;;  %v8357_v16 = vmul.f32 -1.442695, %v3716_v33  ;;  %v3711_v36 = vadd.f32 %v3710_v15, %v11071_v30  ;;  %3185 = vst.msk [vmem:[%s11089_s3 + $0x70] sm:$0xff] %vm3177_vm9, %v11133_v63 }
 0x53d   : > { %v11139_v20 = vpop.eup %10059  ;;  %10083 = vpow2.f32 %v8334_v7  ;;  %v9447_v19 = vpop.f32.mrf.mxu1 }
 0x53e   : > { %10085 = vpow2.f32 %v8357_v16  ;;  %v8356_v21 = vmul.f32 -1.442695, %v3711_v36  ;;  %v3965_v52 = vadd.f32 %v9447_v19, %v11071_v30  ;;  %3184 = vst.msk [vmem:[%s11089_s3 + $0x60] sm:$0xff] %vm3177_vm9, %v11139_v20 }
 0x53f   : > { %v10062_v23 = vpop.eup %10061  ;;  %10087 = vrcp.f32 %v3433_v14  ;;  %v3959_v45 = vpop.f32.mrf.mxu1 }
 0x540   : > { %v10064_v6 = vpop.eup %10063  ;;  %v3744_v25 = vadd.f32 1.0, %v10062_v23  ;;  %10089 = vpow2.f32 %v8356_v21  ;;  %v8381_v26 = vmul.f32 -1.442695, %v3965_v52  ;;  %v3960_v3 = vadd.f32 %v3959_v45, %v11071_v30 }
 0x541   : > { %v10066_v18 = vpop.eup %10065  ;;  %10091 = vrcp.f32 %v3432_v0  ;;  %v9450_v2 = vpop.f32.mrf.mxu1  ;;  %v3435_v62 = vadd.f32 1.0, %v10064_v6 }
 0x542   : > { %v10068_v39 = vpop.eup %10067  ;;  %10093 = vrcp.f32 %v3744_v25  ;;  %v3743_v47 = vadd.f32 1.0, %v10066_v18  ;;  %v8380_v37 = vmul.f32 -1.442695, %v3960_v3  ;;  %v3975_v34 = vadd.f32 %v9450_v2, %v11071_v30 }
 0x543   : > { %v10070_v22 = vpop.eup %10069  ;;  %10095 = vpow2.f32 %v8381_v26  ;;  %v3969_v31 = vpop.f32.mrf.mxu1  ;;  %v3434_v33 = vadd.f32 1.0, %v10068_v39 }
 0x544   : > { %v10072_v12 = vpop.eup %10071  ;;  %10097 = vrcp.f32 %v3743_v47  ;;  %v3746_v38 = vadd.f32 1.0, %v10070_v22  ;;  %v8383_v24 = vmul.f32 -1.442695, %v3975_v34  ;;  %v3970_v13 = vadd.f32 %v3969_v31, %v11071_v30 }
 0x545   : > { %v10074_v11 = vpop.eup %10073  ;;  %10099 = vpow2.f32 %v8380_v37  ;;  %v9453_v17 = vpop.f32.mrf.mxu1  ;;  %v3437_v6 = vadd.f32 1.0, %v10072_v12 }
 0x546   : > { %v11148_v35 = vpop.eup %10075  ;;  %10101 = vrcp.f32 %v3746_v38  ;;  %v3745_v49 = vadd.f32 1.0, %v10074_v11  ;;  %v8382_v40 = vmul.f32 -1.442695, %v3970_v13  ;;  %v3985_v44 = vadd.f32 %v9453_v17, %v11071_v30 }
 0x547   : > { %v10078_v5 = vpop.eup %10077  ;;  %10103 = vpow2.f32 %v8383_v24  ;;  %v3979_v50 = vpop.f32.mrf.mxu1  ;;  %v3436_v47 = vadd.f32 1.0, %v11148_v35  ;;  %v3187_v38 = vmax.f32 %v11093_v29, 0.0  ;;  %v3186_v13 = vmax.f32 %v11100_v32, 0.0 }
 0x548   : > { %v11151_v41 = vpop.eup %10079  ;;  %10105 = vrcp.f32 %v3745_v49  ;;  %v3748_v48 = vadd.f32 1.0, %v10078_v5  ;;  %v8385_v57 = vmul.f32 -1.442695, %v3985_v44  ;;  %v3980_v54 = vadd.f32 %v3979_v50, %v11071_v30 }
 0x549   : > { %v10082_v46 = vpop.eup %10081  ;;  %10107 = vpow2.f32 %v8382_v40  ;;  %v9456_v59 = vpop.f32.mrf.mxu1  ;;  %v3189_v44 = vmax.f32 %v11107_v60, 0.0  ;;  %v3439_v32 = vadd.f32 1.0, %v11151_v41  ;;  %v9944_v60 = vld [vmem:[%s12223_s12 + $0x8] sm:$0x1f]   ;;  %v9945_v41 = vld [vmem:[%s12223_s12] sm:$0x1f]  }
 0x54a   : > { %v10084_v27 = vpop.eup %10083  ;;  %10109 = vrcp.f32 %v3748_v48  ;;  %v3747_v43 = vadd.f32 1.0, %v10082_v46  ;;  %v8384_v28 = vmul.f32 -1.442695, %v3980_v54  ;;  %v3995_v7 = vadd.f32 %v9456_v59, %v11071_v30 }
 0x54b   : > { %v10086_v1 = vpop.eup %10085  ;;  %10111 = vpow2.f32 %v8385_v57  ;;  %v3989_v55 = vpop.f32.mrf.mxu1  ;;  %v3438_v12 = vadd.f32 1.0, %v10084_v27  ;;  %v10191_v54 = vmov 65535  }
 0x54c   : > { %v11154_v51 = vpop.eup %10087  ;;  %10113 = vrcp.f32 %v3747_v43  ;;  %v3750_v53 = vadd.f32 1.0, %v10086_v1  ;;  %v3990_v61 = vadd.f32 %v3989_v55, %v11071_v30  ;;  %v8387_v0 = vmul.f32 -1.442695, %v3995_v7 }
 0x54d   : > { %12363 = vst [vmem:[#allocation16_spill] sm:$0xff] %v11154_v51  ;;  %v10090_v8 = vpop.eup %10089  ;;  %10115 = vpow2.f32 %v8384_v28  ;;  %v3498_v35 = vmax.f32 %v3187_v38, %v11154_v51  ;;  %v4190_v46 = vsel %vm978_vm2, 4294967295, %v10191_v54 }
 0x54e   : > { %v11158_v9 = vpop.eup %10091  ;;  %10117 = vrcp.f32 %v3750_v53  ;;  %v3749_v14 = vadd.f32 1.0, %v10090_v8  ;;  %v8386_v15 = vmul.f32 -1.442695, %v3990_v61  ;;  %v11224_v28 = vsel %vm4189_vm10, %v4190_v46, 0 }
 0x54f   : > { %12364 = vst [vmem:[#allocation7_spill] sm:$0xff] %v11158_v9  ;;  %v11160_v16 = vpop.eup %10093  ;;  %10119 = vrcp.f32 %v3435_v62  ;;  %v3497_v40 = vmax.f32 %v3186_v13, %v11158_v9  ;;  %v4193_v62 = vand.u32 %v9944_v60, %v11224_v28  ;;  %v4278_v55 = vand.u32 %v9945_v41, %v11224_v28  ;;  %v9948_v41 = vld [vmem:[%s12223_s12 + $0x20] sm:$0x1f]  }
 0x550   : > { %v10096_v36 = vpop.eup %10095  ;;  %10121 = vrcp.f32 %v3749_v14  ;;  %8359 = vst.msk [vmem:[%s11089_s3 + $0x18] sm:$0xff] %vm3177_vm9, %v11160_v16  ;;  %v3777_v5 = vmax.f32 %v3498_v35, %v11160_v16  ;;  %v3188_v61 = vmax.f32 %v11114_v42, 0.0 }
 0x551   : > { %v11165_v30 = vpop.eup %10097  ;;  %v4023_v19 = vadd.f32 1.0, %v10096_v36  ;;  %10123 = vpow2.f32 %v8386_v15  ;;  %9457 = vmatprep.subr.bf16.mxu0 %v4193_v62  ;;  %9467 = vmatprep.subr.bf16.mxu1 %v4278_v55 }
 0x552   : > { %v10100_v21 = vpop.eup %10099  ;;  %10125 = vrcp.f32 %v3434_v33  ;;  %8358 = vst.msk [vmem:[%s11089_s3 + $0x8] sm:$0xff] %vm3177_vm9, %v11165_v30  ;;  %v3776_v48 = vmax.f32 %v3497_v40, %v11165_v30  ;;  %9458 = vmatpush3.bf16.msra.mxu0 %v4193_v62  ;;  %9468 = vmatpush3.bf16.msra.mxu1 %v4278_v55 }
 0x553   : > { %v11170_v52 = vpop.eup %10101  ;;  %10127 = vrcp.f32 %v4023_v19  ;;  %v4022_v23 = vadd.f32 1.0, %v10100_v21 }
 0x554   : > { %v10104_v45 = vpop.eup %10103  ;;  %10129 = vpow2.f32 %v8387_v0  ;;  %8361 = vst.msk [vmem:[%s11089_s3 + $0x38] sm:$0xff] %vm3177_vm9, %v11170_v52  ;;  %v3191_v0 = vmax.f32 %v11121_v58, 0.0 }
 0x555   : > { %v11175_v25 = vpop.eup %10105  ;;  %10131 = vrcp.f32 %v4022_v23  ;;  %v4025_v26 = vadd.f32 1.0, %v10104_v45  ;;  %v3190_v45 = vmax.f32 %v11127_v4, 0.0 }
 0x556   : > { %v10108_v3 = vpop.eup %10107  ;;  %8360 = vst.msk [vmem:[%s11089_s3 + $0x28] sm:$0xff] %vm3177_vm9, %v11175_v25 }
 0x557   : > { %v11180_v18 = vpop.eup %10109  ;;  %10133 = vrcp.f32 %v4025_v26  ;;  %v4024_v2 = vadd.f32 1.0, %v10108_v3 }
 0x558   : > { %v10112_v39 = vpop.eup %10111  ;;  %10135 = vrcp.f32 %v3437_v6  ;;  %8363 = vst.msk [vmem:[%s11089_s3 + $0x58] sm:$0xff] %vm3177_vm9, %v11180_v18 }
 0x559   : > { %v11186_v37 = vpop.eup %10113  ;;  %10137 = vrcp.f32 %v4024_v2  ;;  %v4027_v34 = vadd.f32 1.0, %v10112_v39  ;;  %v3192_v2 = vmax.f32 %v11139_v20, 0.0  ;;  %v3193_v20 = vmax.f32 %v11133_v63, 0.0 }
 0x55a   : > { %v10116_v22 = vpop.eup %10115  ;;  %8362 = vst.msk [vmem:[%s11089_s3 + $0x48] sm:$0xff] %vm3177_vm9, %v11186_v37  ;;  %10139 = vrcp.f32 %v3436_v47 }
 0x55b   : > { %v11191_v31 = vpop.eup %10117  ;;  %10141 = vrcp.f32 %v4027_v34  ;;  %v4026_v17 = vadd.f32 1.0, %v10116_v22 }
 0x55c   : > { %v11194_v24 = vpop.eup %10119  ;;  %8365 = vst.msk [vmem:[%s11089_s3 + $0x78] sm:$0xff] %vm3177_vm9, %v11191_v31  ;;  %10143 = vrcp.f32 %v3438_v12  ;;  %v9947_v12 = vld [vmem:[%s12223_s12 + $0x18] sm:$0x1f]  }
 0x55d   : > { %12365 = vst [vmem:[#allocation11_spill] sm:$0xff] %v11194_v24  ;;  %v11200_v11 = vpop.eup %10121  ;;  %v3500_v57 = vmax.f32 %v3189_v44, %v11194_v24  ;;  %10145 = vrcp.f32 %v4026_v17  ;;  %v4486_v35 = vand.u32 %v9947_v12, %v11224_v28 }
 0x55e   : > { %v10124_v49 = vpop.eup %10123  ;;  %8364 = vst.msk [vmem:[%s11089_s3 + $0x68] sm:$0xff] %vm3177_vm9, %v11200_v11  ;;  %10147 = vrcp.f32 %v3439_v32 }
 0x55f   : > { %v11208_v29 = vpop.eup %10125  ;;  %v4028_v27 = vadd.f32 1.0, %v10124_v49  ;;  %v3779_v7 = vmax.f32 %v3500_v57, %v11170_v52  ;;  %9487 = vmatprep.subr.bf16.mxu1 %v4486_v35 }
 0x560   : > { %12366 = vst [vmem:[#allocation21_spill] sm:$0xff] %v11208_v29  ;;  %v11212_v50 = vpop.eup %10127  ;;  %v3499_v16 = vmax.f32 %v3188_v61, %v11208_v29 }
 0x561   : > { %12367 = vst [vmem:[#allocation22_spill] sm:$0xff] %v11212_v50  ;;  %v10130_v59 = vpop.eup %10129  ;;  %v4087_v43 = vmax.f32 %v3777_v5, %v11212_v50  ;;  %10149 = vrcp.f32 %v4028_v27  ;;  %v11292_v5 = vld [vmem:[#allocation2 + $0x1] sm:$0xff] }
 0x562   : > { %v11226_v1 = vpop.eup %10131  ;;  %v4029_v14 = vadd.f32 1.0, %v10130_v59  ;;  %v3778_v42 = vmax.f32 %v3499_v16, %v11175_v25  ;;  %12379 = vst [vmem:[#allocation26_spill] sm:$0xff] %v11292_v5  ;;  %v9949_v59 = vld [vmem:[%s12223_s12 + $0x28] sm:$0x1f]  }
 0x563   : > { %12368 = vst [vmem:[#allocation8_spill] sm:$0xff] %v11226_v1  ;;  %4112 = vrot.lane.b32.xlu1 %v4087_v43, %s10192_s5  ;;  %v4086_v53 = vmax.f32 %v3776_v48, %v11226_v1  ;;  %v11294_v48 = vld [vmem:[#allocation2] sm:$0xff] }
 0x564   : > { %v11234_v8 = vpop.eup %10133  ;;  %10151 = vrcp.f32 %v4029_v14  ;;  %12380 = vst [vmem:[#allocation10_spill] sm:$0xff] %v11294_v48  ;;  %v4594_v14 = vand.u32 %v9948_v41, %v11224_v28 }
 0x565   : > { %12369 = vst [vmem:[#allocation14_spill] sm:$0xff] %v11234_v8  ;;  %v11236_v33 = vpop.eup %10135  ;;  %4110 = vrot.lane.b32.xlu0 %v4086_v53, %s10192_s5  ;;  %v4089_v15 = vmax.f32 %v3779_v7, %v11234_v8 }
 0x566   : > { %12370 = vst [vmem:[#allocation12_spill] sm:$0xff] %v11236_v33  ;;  %v11241_v36 = vpop.eup %10137  ;;  %v3502_v21 = vmax.f32 %v3191_v0, %v11236_v33 }
 0x567   : > { %12371 = vst [vmem:[#allocation15_spill] sm:$0xff] %v11241_v36  ;;  %4116 = vrot.lane.b32.xlu1 %v4089_v15, %s10192_s5  ;;  %v11246_v30 = vpop.eup %10139  ;;  %v4088_v19 = vmax.f32 %v3778_v42, %v11241_v36  ;;  %v4702_v15 = vand.u32 %v9949_v59, %v11224_v28 }
 0x568   : > { %12372 = vst [vmem:[#allocation13_spill] sm:$0xff] %v11246_v30  ;;  %v11250_v52 = vpop.eup %10141  ;;  %v3781_v23 = vmax.f32 %v3502_v21, %v11180_v18  ;;  %v3501_v58 = vmax.f32 %v3190_v45, %v11246_v30  ;;  %v9946_v18 = vld [vmem:[%s12223_s12 + $0x10] sm:$0x1f]  }
 0x569   : > { %12373 = vst [vmem:[#allocation18_spill] sm:$0xff] %v11250_v52  ;;  %v11255_v6 = vpop.eup %10143  ;;  %v4378_v22 = vand.u32 %v9946_v18, %v11224_v28 }
 0x56a   : > { %12374 = vst [vmem:[#allocation17_spill] sm:$0xff] %v11255_v6  ;;  %v4091_v25 = vmax.f32 %v3781_v23, %v11250_v52  ;;  %v11259_v26 = vpop.eup %10145  ;;  %v3780_v3 = vmax.f32 %v3501_v58, %v11186_v37  ;;  %v3503_v47 = vmax.f32 %v3192_v2, %v11255_v6 }
 0x56b   : > { %4114 = vrot.lane.b32.xlu1 %v4088_v19, %s10192_s5  ;;  %12375 = vst [vmem:[#allocation20_spill] sm:$0xff] %v11259_v26  ;;  %v11267_v39 = vpop.eup %10147  ;;  %9477 = vmatprep.subr.bf16.mxu0 %v4378_v22 }
 0x56c   : > { %12376 = vst [vmem:[#allocation19_spill] sm:$0xff] %v11267_v39  ;;  %v4090_v4 = vmax.f32 %v3780_v3, %v11259_v26  ;;  %v3782_v37 = vmax.f32 %v3503_v47, %v11200_v11  ;;  %v3504_v13 = vmax.f32 %v3193_v20, %v11267_v39  ;;  %v11338_v3 = vld [vmem:[#allocation2 + $0x2] sm:$0xff] }
 0x56d   : > { %12381 = vst [vmem:[#allocation23_spill] sm:$0xff] %v11338_v3 }
 0x56e   : > { %v11271_v34 = vpop.eup %10149  ;;  %v3783_v49 = vmax.f32 %v3504_v13, %v11191_v31  ;;  %v9950_v13 = vld [vmem:[%s12223_s12 + $0x30] sm:$0x1f]  }
 0x56f   : > { %4120 = vrot.lane.b32.xlu1 %v4091_v25, %s10192_s5  ;;  %12377 = vst [vmem:[#allocation24_spill] sm:$0xff] %v11271_v34  ;;  %v4092_v38 = vmax.f32 %v3782_v37, %v11271_v34 }
 0x571   : > { %v11282_v17 = vpop.eup %10151 }
 0x572   : > { %12378 = vst [vmem:[#allocation25_spill] sm:$0xff] %v11282_v17  ;;  %v4093_v63 = vmax.f32 %v3783_v49, %v11282_v17 }
 0x573   : > { %4118 = vrot.lane.b32.xlu1 %v4090_v4, %s10192_s5 }
 0x577   : > { %4122 = vrot.lane.b32.xlu1 %v4092_v38, %s10192_s5 }
 0x57b   : > { %4124 = vrot.lane.b32.xlu1 %v4093_v63, %s10192_s5  ;;  %s10197_s5 = smov 123  }
 0x5d5   : > { %v4113_v11 = vpop.permute.xlu1 %4112 }
 0x5d6   : > { %4136 = vst.msk [vmem:[#allocation2 + $0x21] sm:$0xff] %vm4134_vm11, %v4113_v11 }
 0x5d7   : > { %v4111_v40 = vpop.permute.xlu0 %4110 }
 0x5d8   : > { %4135 = vst.msk [vmem:[#allocation2 + $0x11] sm:$0xff] %vm4134_vm11, %v4111_v40 }
 0x5d9   : > { %v4117_v44 = vpop.permute.xlu1 %4116 }
 0x5da   : > { %4138 = vst.msk [vmem:[#allocation2 + $0x41] sm:$0xff] %vm4134_vm11, %v4117_v44 }
 0x5dd   : > { %v4115_v32 = vpop.permute.xlu1 %4114  ;;  %v11311_v27 = vld [vmem:[#allocation2 + $0x21] sm:$0xff] }
 0x5de   : > { %4137 = vst.msk [vmem:[#allocation2 + $0x31] sm:$0xff] %vm4134_vm11, %v4115_v32  ;;  %v4145_v55 = vld [vmem:[#allocation2 + $0x20] sm:$0xff] }
 0x5df   : > { %v11297_v31 = vld [vmem:[#allocation2 + $0x11] sm:$0xff]  ;;  %v4347_v63 = vld [vmem:[#allocation2 + $0x22] sm:$0xff] }
 0x5e0   : > { %v4144_v57 = vld [vmem:[#allocation2 + $0x10] sm:$0xff]  ;;  %v4165_v60 = vpack.c.bf16 %v11297_v31, %v11292_v5 }
 0x5e1   : > { %v4151_v54 = vpack.c.bf16 %v4144_v57, %v11294_v48  ;;  %v4121_v46 = vpop.permute.xlu1 %4120  ;;  %v4161_v42 = vld [vmem:[#allocation2 + $0x41] sm:$0xff]  ;;  %v4346_v2 = vld [vmem:[#allocation2 + $0x12] sm:$0xff]  ;;  %v4461_v12 = vpack.c.bf16 %v4145_v55, %v4144_v57 }
 0x5e2   : > { %4140 = vst.msk [vmem:[#allocation2 + $0x61] sm:$0xff] %vm4134_vm11, %v4121_v46  ;;  %9459 = vmatprep.mubr.msk.bf16.mxu0 %vm746_vm0, %v4165_v60  ;;  %v4147_v21 = vld [vmem:[#allocation2 + $0x40] sm:$0xff]  ;;  %v4353_v20 = vpack.c.bf16 %v4346_v2, %v11338_v3  ;;  %v4810_v60 = vand.u32 %v9950_v13, %v11224_v28 }
 0x5e3   : > { %9469 = vmatprep.mubr.msk.bf16.mxu1 %vm746_vm0, %v4151_v54  ;;  %v4349_v44 = vld [vmem:[#allocation2 + $0x42] sm:$0xff] }
 0x5e5   : > { %v4119_v43 = vpop.permute.xlu1 %4118  ;;  %v11313_v62 = vld [vmem:[#allocation2 + $0x31] sm:$0xff] }
 0x5e6   : > { %v4146_v53 = vld [vmem:[#allocation2 + $0x30] sm:$0xff]  ;;  %4139 = vst.msk [vmem:[#allocation2 + $0x51] sm:$0xff] %vm4134_vm11, %v4119_v43  ;;  %v11318_v7 = vpack.c.bf16 %v11313_v62, %v11311_v27 }
 0x5e7   : > { %v11320_v61 = vpack.c.bf16 %v4146_v53, %v4145_v55  ;;  %v4348_v38 = vld [vmem:[#allocation2 + $0x32] sm:$0xff]  ;;  %v4462_v40 = vpack.c.bf16 %v4147_v21, %v4146_v53  ;;  %v4569_v53 = vpack.c.bf16 %v11311_v27, %v11297_v31 }
 0x5e8   : > { %9460 = vmatmul.mubr.msk.bf16.vlgmr.msra.gmra.mxu0 %vm746_vm0, %v11318_v7  ;;  %v4354_v11 = vpack.c.bf16 %v4348_v38, %v4347_v63 }
 0x5e9   : > { %9470 = vmatmul.mubr.msk.bf16.vlgmr.msra.gmra.mxu1 %vm746_vm0, %v11320_v61  ;;  %v4123_v16 = vpop.permute.xlu1 %4122  ;;  %9478 = vmatpush3.bf16.msra.mxu0 %v4378_v22  ;;  %v4163_v58 = vld [vmem:[#allocation2 + $0x61] sm:$0xff] }
 0x5ea   : > { %9488 = vmatpush3.bf16.msra.mxu1 %v4486_v35  ;;  %4141 = vst.msk [vmem:[#allocation2 + $0x71] sm:$0xff] %vm4134_vm11, %v4123_v16  ;;  %9497 = vmatprep.subr.bf16.mxu0 %v4594_v14  ;;  %v4149_v4 = vld [vmem:[#allocation2 + $0x60] sm:$0xff]  ;;  %v9951_v35 = vld [vmem:[%s12223_s12 + $0x38] sm:$0x1f]   ;;  %v4677_v16 = vpack.c.bf16 %v4347_v63, %v4346_v2 }
 0x5eb   : > { %9507 = vmatprep.subr.bf16.mxu1 %v4702_v15  ;;  %v4918_v54 = vand.u32 %v9951_v35, %v11224_v28  ;;  %v4351_v59 = vld [vmem:[#allocation2 + $0x62] sm:$0xff] }
 0x5ed   : > { %v4125_v0 = vpop.permute.xlu1 %4124  ;;  %v4162_v19 = vld [vmem:[#allocation2 + $0x51] sm:$0xff] }
 0x5ee   : > { %v4148_v23 = vld [vmem:[#allocation2 + $0x50] sm:$0xff]  ;;  %4142 = vst.msk [vmem:[#allocation2 + $0x81] sm:$0xff] %vm4134_vm11, %v4125_v0  ;;  %v11330_v45 = vpack.c.bf16 %v4162_v19, %v4161_v42  ;;  %v4678_v0 = vpack.c.bf16 %v4349_v44, %v4348_v38 }
 0x5ef   : > { %v11332_v25 = vpack.c.bf16 %v4148_v23, %v4147_v21  ;;  %v4350_v49 = vld [vmem:[#allocation2 + $0x52] sm:$0xff]  ;;  %v4463_v57 = vpack.c.bf16 %v4149_v4, %v4148_v23  ;;  %v4571_v21 = vpack.c.bf16 %v4163_v58, %v4162_v19 }
 0x5f0   : > { %9463 = vmatprep.mubr.msk.bf16.mxu0 %vm746_vm0, %v11330_v45  ;;  %v4355_v32 = vpack.c.bf16 %v4350_v49, %v4349_v44  ;;  %v4679_v23 = vpack.c.bf16 %v4351_v59, %v4350_v49  ;;  %v11399_v19 = vld [vmem:[#allocation2 + $0x92] sm:$0xff] }
 0x5f1   : > { %9473 = vmatprep.mubr.msk.bf16.mxu1 %vm746_vm0, %v11332_v25  ;;  %v4164_v18 = vld [vmem:[#allocation2 + $0x71] sm:$0xff]  ;;  %12384 = vst [vmem:[#allocation29_spill] sm:$0xff] %v11399_v19 }
 0x5f2   : > { %v4150_v47 = vld [vmem:[#allocation2 + $0x70] sm:$0xff]  ;;  %v11340_v22 = vpack.c.bf16 %v4164_v18, %v4163_v58  ;;  %v5144_v58 = vld [vmem:[%s12225_s14] sm:$0xf] }
 0x5f3   : > { %v4154_v37 = vpack.c.bf16 %v4150_v47, %v4149_v4  ;;  %v4352_v46 = vld [vmem:[#allocation2 + $0x72] sm:$0xff] }
 0x5f4   : > { %9464 = vmatmul.mubr.msk.bf16.gmra.mxu0 %vm746_vm0, %v11340_v22  ;;  %v4356_v43 = vpack.c.bf16 %v4352_v46, %v4351_v59 }
 0x5f5   : > { %9474 = vmatmul.mubr.msk.bf16.gmra.mxu1 %vm746_vm0, %v4154_v37  ;;  %9479 = vmatprep.mubr.msk.bf16.mxu0 %vm746_vm0, %v4353_v20  ;;  %v4460_v41 = vld [vmem:[#allocation2 + $0x80] sm:$0xff] }
 0x5f6   : > { %9489 = vmatprep.mubr.msk.bf16.mxu1 %vm746_vm0, %v4461_v12  ;;  %v4464_v55 = vpack.c.bf16 %v4460_v41, %v4150_v47  ;;  %v4568_v27 = vld [vmem:[#allocation2 + $0x81] sm:$0xff]  ;;  %v5252_v47 = vsel %vm978_vm2, %v5144_v58, 0 }
 0x5f7   : > { %v4676_v2 = vld [vmem:[#allocation2 + $0x82] sm:$0xff]  ;;  %v4572_v4 = vpack.c.bf16 %v4568_v27, %v4164_v18 }
 0x5fc   : > { %9480 = vmatmul.mubr.msk.bf16.vlgmr.msra.gmra.mxu0 %vm746_vm0, %v4354_v11 }
 0x5fd   : > { %9490 = vmatmul.mubr.msk.bf16.vlgmr.msra.gmra.mxu1 %vm746_vm0, %v4462_v40  ;;  %9483 = vmatprep.mubr.msk.bf16.mxu0 %vm746_vm0, %v4355_v32 }
 0x5fe   : > { %9493 = vmatprep.mubr.msk.bf16.mxu1 %vm746_vm0, %v4463_v57  ;;  %9498 = vmatpush3.bf16.msra.mxu0 %v4594_v14  ;;  %v9952_v14 = vld [vmem:[%s12223_s12 + $0x40] sm:$0x1f]  }
 0x5ff   : > { %9508 = vmatpush3.bf16.msra.mxu1 %v4702_v15  ;;  %9517 = vmatprep.subr.bf16.mxu0 %v4810_v60  ;;  %v4570_v15 = vpack.c.bf16 %v4161_v42, %v11313_v62  ;;  %v5026_v31 = vand.u32 %v9952_v14, %v11224_v28  ;;  %v4680_v62 = vpack.c.bf16 %v4676_v2, %v4352_v46  ;;  %v11388_v28 = vld [vmem:[#allocation2 + $0x90] sm:$0xff] }
 0x600   : > { %9527 = vmatprep.subr.bf16.mxu1 %v4918_v54  ;;  %12382 = vst [vmem:[#allocation27_spill] sm:$0xff] %v11388_v28  ;;  %v11390_v42 = vld [vmem:[#allocation2 + $0x91] sm:$0xff] }
 0x601   : > { %12383 = vst [vmem:[#allocation28_spill] sm:$0xff] %v11390_v42 }
 0x604   : > { %9484 = vmatmul.mubr.msk.bf16.gmra.mxu0 %vm746_vm0, %v4356_v43 }
 0x605   : > { %9494 = vmatmul.mubr.msk.bf16.gmra.mxu1 %vm746_vm0, %v4464_v55  ;;  %9499 = vmatprep.mubr.msk.bf16.mxu0 %vm746_vm0, %v4569_v53 }
 0x606   : > { %9509 = vmatprep.mubr.msk.bf16.mxu1 %vm746_vm0, %v4677_v16 }
 0x60c   : > { %9500 = vmatmul.mubr.msk.bf16.vlgmr.msra.gmra.mxu0 %vm746_vm0, %v4570_v15 }
 0x60d   : > { %9510 = vmatmul.mubr.msk.bf16.vlgmr.msra.gmra.mxu1 %vm746_vm0, %v4678_v0  ;;  %9503 = vmatprep.mubr.msk.bf16.mxu0 %vm746_vm0, %v4571_v21 }
 0x60e   : > { %9513 = vmatprep.mubr.msk.bf16.mxu1 %vm746_vm0, %v4679_v23  ;;  %9518 = vmatpush3.bf16.msra.mxu0 %v4810_v60 }
 0x60f   : > { %9528 = vmatpush3.bf16.msra.mxu1 %v4918_v54  ;;  %9537 = vmatprep.subr.bf16.mxu0 %v5026_v31 }
 0x614   : > { %9504 = vmatmul.mubr.msk.bf16.gmra.mxu0 %vm746_vm0, %v4572_v4 }
 0x615   : > { %9514 = vmatmul.mubr.msk.bf16.gmra.mxu1 %vm746_vm0, %v4680_v62  ;;  %9519 = vmatprep.mubr.msk.bf16.mxu0 %vm746_vm0, %v11320_v61  ;;  %v4788_v61 = vpack.c.bf16 %v11388_v28, %v4460_v41 }
 0x616   : > { %9529 = vmatprep.mubr.msk.bf16.mxu1 %vm746_vm0, %v11318_v7  ;;  %v4896_v7 = vpack.c.bf16 %v11390_v42, %v4568_v27 }
 0x61c   : > { %9520 = vmatmul.mubr.msk.bf16.vlgmr.msra.gmra.mxu0 %vm746_vm0, %v11332_v25  ;;  %v8458_v25 = vld [vmem:[%s12225_s14 + $0x4] sm:$0xf] }
 0x61d   : > { %9530 = vmatmul.mubr.msk.bf16.vlgmr.msra.gmra.mxu1 %vm746_vm0, %v11330_v45  ;;  %9523 = vmatprep.mubr.msk.bf16.mxu0 %vm746_vm0, %v4154_v37  ;;  %v5004_v45 = vpack.c.bf16 %v11399_v19, %v4676_v2  ;;  %v5172_v18 = vsel %vm978_vm2, %v8458_v25, 0  ;;  %v11423_v37 = vld [vmem:[%s12225_s14 + $0xc] sm:$0xf] }
 0x61e   : > { %9533 = vmatprep.mubr.msk.bf16.mxu1 %vm746_vm0, %v11340_v22  ;;  %9538 = vmatpush3.bf16.msra.mxu0 %v5026_v31  ;;  %v11416_v22 = vld [vmem:[%s12225_s14 + $0x8] sm:$0xf]  ;;  %12386 = vst [vmem:[#allocation31_spill] sm:$0xff] %v11423_v37 }
 0x61f   : > { %9911 = vmatprep.subr.msk.bf16.mxu1 %vm978_vm2, %v8458_v25  ;;  %9912 = vmatprep.subr.msk.bf16.mxu0 %vm978_vm2, %v5144_v58  ;;  %12385 = vst [vmem:[#allocation30_spill] sm:$0xff] %v11416_v22 }
 0x620   : > { %9548 = vmatpush3.bf16.msra.mxu1 %v5172_v18 }
 0x621   : > { %9913 = vmatprep.subr.msk.bf16.mxu1 %vm978_vm2, %v11416_v22 }
 0x624   : > { %9524 = vmatmul.mubr.msk.bf16.gmra.mxu0 %vm746_vm0, %v4788_v61 }
 0x625   : > { %9534 = vmatmul.mubr.msk.bf16.gmra.mxu1 %vm746_vm0, %v4896_v7  ;;  %9539 = vmatprep.mubr.msk.bf16.mxu0 %vm746_vm0, %v4354_v11 }
 0x62c   : > { %9540 = vmatmul.mubr.msk.bf16.vlgmr.msra.gmra.mxu0 %vm746_vm0, %v4355_v32 }
 0x62d   : > { %9543 = vmatprep.mubr.msk.bf16.mxu0 %vm746_vm0, %v4356_v43  ;;  %9558 = vmatpush3.bf16.msra.mxu0 %v5252_v47 }
 0x62e   : > { %9914 = vmatprep.subr.msk.bf16.mxu0 %vm978_vm2, %v11423_v37 }
 0x634   : > { %9544 = vmatmul.mubr.msk.bf16.gmra.mxu0 %vm746_vm0, %v5004_v45 }
 0x6a8   : > { %v9461_v20 = vpop.f32.mrf.mxu0 }
 0x6a9   : > { %v9471_v12 = vpop.f32.mrf.mxu1 }
 0x6aa   : > { %v4229_v38 = vpop.f32.mrf.mxu0  ;;  %v4323_v50 = vadd.f32 %v9471_v12, %v9461_v20 }
 0x6ab   : > { %v4314_v13 = vpop.f32.mrf.mxu1 }
 0x6ac   : > { %v9462_v35 = vpop.f32.mrf.mxu0  ;;  %v4315_v6 = vadd.f32 %v4314_v13, %v4229_v38 }
 0x6ad   : > { %v9472_v49 = vpop.f32.mrf.mxu1 }
 0x6ae   : > { %v4232_v63 = vpop.f32.mrf.mxu0  ;;  %v4326_v29 = vadd.f32 %v9472_v49, %v9462_v35 }
 0x6af   : > { %v4317_v11 = vpop.f32.mrf.mxu1 }
 0x6b0   : > { %v4318_v19 = vadd.f32 %v4317_v11, %v4232_v63 }
 0x6b4   : > { %v9465_v40 = vpop.f32.mrf.mxu0 }
 0x6b5   : > { %v9475_v44 = vpop.f32.mrf.mxu1 }
 0x6b6   : > { %v4245_v32 = vpop.f32.mrf.mxu0  ;;  %v4339_v3 = vadd.f32 %v9475_v44, %v9465_v40 }
 0x6b7   : > { %v4330_v57 = vpop.f32.mrf.mxu1 }
 0x6b8   : > { %v9466_v60 = vpop.f32.mrf.mxu0  ;;  %v4331_v20 = vadd.f32 %v4330_v57, %v4245_v32 }
 0x6b9   : > { %v9476_v54 = vpop.f32.mrf.mxu1 }
 0x6ba   : > { %v11427_v46 = vpop.f32.mrf.mxu0 }
 0x6bb   : > { %v4333_v41 = vpop.f32.mrf.mxu1 }
 0x6bc   : > { %v9481_v59 = vpop.f32.mrf.mxu0 }
 0x6bd   : > { %v9491_v43 = vpop.f32.mrf.mxu1  ;;  %v4447_v33 = vadd.f32 %v9481_v59, %v4323_v50  ;;  %v4342_v50 = vadd.f32 %v9476_v54, %v9466_v60 }
 0x6be   : > { %v4414_v55 = vpop.f32.mrf.mxu0 }
 0x6bf   : > { %v4522_v53 = vpop.f32.mrf.mxu1  ;;  %v4445_v51 = vadd.f32 %v4414_v55, %v4315_v6  ;;  %v4555_v42 = vadd.f32 %v9491_v43, %v4447_v33 }
 0x6c0   : > { %v9482_v16 = vpop.f32.mrf.mxu0 }
 0x6c1   : > { %v9492_v14 = vpop.f32.mrf.mxu1  ;;  %v4448_v28 = vadd.f32 %v9482_v16, %v4326_v29  ;;  %v4553_v48 = vadd.f32 %v4522_v53, %v4445_v51  ;;  %v4334_v29 = vadd.f32 %v4333_v41, %v11427_v46 }
 0x6c2   : > { %v4417_v15 = vpop.f32.mrf.mxu0 }
 0x6c3   : > { %v4525_v0 = vpop.f32.mrf.mxu1  ;;  %v4446_v5 = vadd.f32 %v4417_v15, %v4318_v19 }
 0x6c4   : > { %v9485_v21 = vpop.f32.mrf.mxu0 }
 0x6c5   : > { %v9495_v23 = vpop.f32.mrf.mxu1  ;;  %v4451_v12 = vadd.f32 %v9485_v21, %v4339_v3  ;;  %v4554_v6 = vadd.f32 %v4525_v0, %v4446_v5 }
 0x6c6   : > { %v4430_v31 = vpop.f32.mrf.mxu0 }
 0x6c7   : > { %v4538_v27 = vpop.f32.mrf.mxu1  ;;  %v4449_v13 = vadd.f32 %v4430_v31, %v4331_v20  ;;  %v4559_v33 = vadd.f32 %v9495_v23, %v4451_v12 }
 0x6c8   : > { %v9486_v2 = vpop.f32.mrf.mxu0 }
 0x6c9   : > { %v9496_v4 = vpop.f32.mrf.mxu1  ;;  %v4452_v11 = vadd.f32 %v9486_v2, %v4342_v50  ;;  %v4557_v44 = vadd.f32 %v4538_v27, %v4449_v13 }
 0x6ca   : > { %v4433_v62 = vpop.f32.mrf.mxu0 }
 0x6cb   : > { %v11429_v61 = vpop.f32.mrf.mxu1  ;;  %v4450_v3 = vadd.f32 %v4433_v62, %v4334_v29  ;;  %v4560_v54 = vadd.f32 %v9496_v4, %v4452_v11 }
 0x6cc   : > { %v9501_v7 = vpop.f32.mrf.mxu0 }
 0x6cd   : > { %v9511_v45 = vpop.f32.mrf.mxu1  ;;  %v4558_v46 = vadd.f32 %v11429_v61, %v4450_v3 }
 0x6ce   : > { %v4630_v25 = vpop.f32.mrf.mxu0 }
 0x6cf   : > { %v4738_v58 = vpop.f32.mrf.mxu1  ;;  %v4661_v38 = vadd.f32 %v4630_v25, %v4553_v48 }
 0x6d0   : > { %v9502_v18 = vpop.f32.mrf.mxu0 }
 0x6d1   : > { %v9512_v47 = vpop.f32.mrf.mxu1  ;;  %v4769_v51 = vadd.f32 %v4738_v58, %v4661_v38 }
 0x6d2   : > { %v4633_v56 = vpop.f32.mrf.mxu0 }
 0x6d3   : > { %v4741_v10 = vpop.f32.mrf.mxu1  ;;  %v4662_v19 = vadd.f32 %v4633_v56, %v4554_v6 }
 0x6d4   : > { %v9505_v17 = vpop.f32.mrf.mxu0 }
 0x6d5   : > { %v9515_v34 = vpop.f32.mrf.mxu1  ;;  %v4667_v32 = vadd.f32 %v9505_v17, %v4559_v33 }
 0x6d6   : > { %v4646_v52 = vpop.f32.mrf.mxu0 }
 0x6d7   : > { %v11431_v26 = vpop.f32.mrf.mxu1  ;;  %v4665_v43 = vadd.f32 %v4646_v52, %v4557_v44  ;;  %v4775_v41 = vadd.f32 %v9515_v34, %v4667_v32 }
 0x6d8   : > { %12387 = vst [vmem:[#allocation32_spill] sm:$0xff] %v11431_v26  ;;  %v9506_v8 = vpop.f32.mrf.mxu0 }
 0x6d9   : > { %v11433_v36 = vpop.f32.mrf.mxu1  ;;  %v4668_v53 = vadd.f32 %v9506_v8, %v4560_v54 }
 0x6da   : > { %12388 = vst [vmem:[#allocation33_spill] sm:$0xff] %v11433_v36  ;;  %v4649_v1 = vpop.f32.mrf.mxu0  ;;  %v4663_v36 = vadd.f32 %v9501_v7, %v4555_v42 }
 0x6db   : > { %v11435_v39 = vpop.f32.mrf.mxu1  ;;  %v4666_v52 = vadd.f32 %v4649_v1, %v4558_v46 }
 0x6dc   : > { %12389 = vst [vmem:[#allocation34_spill] sm:$0xff] %v11435_v39  ;;  %v9521_v30 = vpop.f32.mrf.mxu0  ;;  %v4556_v39 = vadd.f32 %v9492_v14, %v4448_v28  ;;  %v4771_v49 = vadd.f32 %v9511_v45, %v4663_v36  ;;  %v4770_v36 = vadd.f32 %v4741_v10, %v4662_v19 }
 0x6dd   : > { %v9531_v24 = vpop.f32.mrf.mxu1 }
 0x6de   : > { %v4846_v9 = vpop.f32.mrf.mxu0  ;;  %v4664_v63 = vadd.f32 %v9502_v18, %v4556_v39  ;;  %v4879_v42 = vadd.f32 %v9521_v30, %v4771_v49  ;;  %v8457_v30 = vld [vmem:[%s12224_s13] ss:$0 sm:$0xff] }
 0x6df   : > { %v4954_v37 = vpop.f32.mrf.mxu1  ;;  %v4877_v60 = vadd.f32 %v4846_v9, %v4769_v51  ;;  %v12390_v9 = vld [vmem:[#allocation32_spill] sm:$0xff] }
 0x6e0   : > { %v9522_v22 = vpop.f32.mrf.mxu0  ;;  %v4772_v57 = vadd.f32 %v9512_v47, %v4664_v63  ;;  %v4987_v39 = vadd.f32 %v9531_v24, %v4879_v42  ;;  %v4773_v0 = vadd.f32 %v12390_v9, %v4665_v43  ;;  %v12396_v9 = vld [vmem:[#allocation31_spill] sm:$0xff] }
 0x6e1   : > { %v9532_v59 = vpop.f32.mrf.mxu1  ;;  %v4985_v17 = vadd.f32 %v4954_v37, %v4877_v60  ;;  %v12391_v31 = vld [vmem:[#allocation33_spill] sm:$0xff] }
 0x6e2   : > { %v4849_v26 = vpop.f32.mrf.mxu0  ;;  %v4880_v55 = vadd.f32 %v9522_v22, %v4772_v57  ;;  %v4776_v34 = vadd.f32 %v12391_v31, %v4668_v53 }
 0x6e3   : > { %v4957_v28 = vpop.f32.mrf.mxu1  ;;  %v4878_v14 = vadd.f32 %v4849_v26, %v4770_v36  ;;  %v12392_v37 = vld [vmem:[#allocation34_spill] sm:$0xff] }
 0x6e4   : > { %v9525_v35 = vpop.f32.mrf.mxu0  ;;  %v4988_v24 = vadd.f32 %v9532_v59, %v4880_v55  ;;  %v4774_v26 = vadd.f32 %v12392_v37, %v4666_v52  ;;  %v8477_v52 = vld [vmem:[%s12225_s14 + $0x10] sm:$0xf]  ;;  %v12397_v37 = vld [vmem:[#allocation23_spill] sm:$0xff] }
 0x6e5   : > { %v9535_v16 = vpop.f32.mrf.mxu1  ;;  %v4883_v21 = vadd.f32 %v9525_v35, %v4775_v41  ;;  %v4986_v4 = vadd.f32 %v4957_v28, %v4878_v14  ;;  %v12395_v14 = vld [vmem:[#allocation30_spill] sm:$0xff] }
 0x6e6   : > { %v4862_v40 = vpop.f32.mrf.mxu0 }
 0x6e7   : > { %v4881_v8 = vadd.f32 %v4862_v40, %v4773_v0  ;;  %v4970_v27 = vpop.f32.mrf.mxu1  ;;  %v4991_v45 = vadd.f32 %v9535_v16, %v4883_v21  ;;  %v5448_v0 = vsel %vm978_vm2, %v12396_v9, 0  ;;  %v8482_v21 = vld [vmem:[%s12225_s14 + $0x14] sm:$0xf] }
 0x6e8   : > { %v9526_v48 = vpop.f32.mrf.mxu0 }
 0x6e9   : > { %v4884_v58 = vadd.f32 %v9526_v48, %v4776_v34  ;;  %v4989_v20 = vadd.f32 %v4970_v27, %v4881_v8  ;;  %v9536_v12 = vpop.f32.mrf.mxu1 }
 0x6ea   : > { %v4865_v5 = vpop.f32.mrf.mxu0 }
 0x6eb   : > { %v4882_v50 = vadd.f32 %v4865_v5, %v4774_v26  ;;  %v4992_v49 = vadd.f32 %v9536_v12, %v4884_v58  ;;  %v4973_v11 = vpop.f32.mrf.mxu1  ;;  %v12393_v5 = vld [vmem:[#allocation26_spill] sm:$0xff] }
 0x6ec   : > { %v9541_v56 = vpop.f32.mrf.mxu0 }
 0x6ed   : > { %v5095_v15 = vadd.f32 %v9541_v56, %v4987_v39  ;;  %v4990_v51 = vadd.f32 %v4973_v11, %v4882_v50  ;;  %v12394_v39 = vld [vmem:[#allocation10_spill] sm:$0xff]  ;;  %v5550_v50 = vsel %vm978_vm2, %v8477_v52, 0 }
 0x6ee   : > { %v5062_v10 = vpop.f32.mrf.mxu0 }
 0x6ef   : > { %v5110_v22 = vadd.f32 %v8457_v30, %v5095_v15  ;;  %v5093_v23 = vadd.f32 %v5062_v10, %v4985_v17  ;;  %v5346_v15 = vsel %vm978_vm2, %v12395_v14, 0 }
 0x6f0   : > { %v9542_v2 = vpop.f32.mrf.mxu0 }
 0x6f1   : > { %v5118_v62 = vmax.f32 %v5110_v22, 0.0  ;;  %v5108_v61 = vadd.f32 %v8457_v30, %v5093_v23  ;;  %v5096_v7 = vadd.f32 %v9542_v2, %v4988_v24 }
 0x6f2   : > { %v5065_v25 = vpop.f32.mrf.mxu0 }
 0x6f3   : > { %5126 = vst.msk [vmem:[#allocation2 + $0x31] sm:$0xff] %vm921_vm3, %v5118_v62  ;;  %v5116_v1 = vmax.f32 %v5108_v61, 0.0  ;;  %v5111_v18 = vadd.f32 %v8457_v30, %v5096_v7  ;;  %v5094_v47 = vadd.f32 %v5065_v25, %v4986_v4 }
 0x6f4   : > { %v9545_v38 = vpop.f32.mrf.mxu0 }
 0x6f5   : > { %5124 = vst.msk [vmem:[#allocation2 + $0x11] sm:$0xff] %vm921_vm3, %v5116_v1  ;;  %v5119_v13 = vmax.f32 %v5111_v18, 0.0  ;;  %v5109_v59 = vadd.f32 %v8457_v30, %v5094_v47  ;;  %v5099_v35 = vadd.f32 %v9545_v38, %v4991_v45 }
 0x6f6   : > { %v5078_v6 = vpop.f32.mrf.mxu0 }
 0x6f7   : > { %5127 = vst.msk [vmem:[#allocation2 + $0x41] sm:$0xff] %vm921_vm3, %v5119_v13  ;;  %v5117_v63 = vmax.f32 %v5109_v59, 0.0  ;;  %v5114_v29 = vadd.f32 %v8457_v30, %v5099_v35  ;;  %v5097_v33 = vadd.f32 %v5078_v6, %v4989_v20  ;;  %v5652_v13 = vsel %vm978_vm2, %v8482_v21, 0  ;;  %v8487_v59 = vld [vmem:[%s12225_s14 + $0x18] sm:$0xf] }
 0x6f8   : > { %v9546_v40 = vpop.f32.mrf.mxu0  ;;  %v8492_v35 = vld [vmem:[%s12225_s14 + $0x1c] sm:$0xf] }
 0x6f9   : > { %5125 = vst.msk [vmem:[#allocation2 + $0x21] sm:$0xff] %vm921_vm3, %v5117_v63  ;;  %v5122_v19 = vmax.f32 %v5114_v29, 0.0  ;;  %v5112_v42 = vadd.f32 %v8457_v30, %v5097_v33  ;;  %v5100_v44 = vadd.f32 %v9546_v40, %v4992_v49 }
 0x6fa   : > { %v5081_v3 = vpop.f32.mrf.mxu0  ;;  %v11459_v41 = vld [vmem:[#allocation2 + $0x31] sm:$0xff] }
 0x6fb   : > { %5130 = vst.msk [vmem:[#allocation2 + $0x71] sm:$0xff] %vm921_vm3, %v5122_v19  ;;  %v5120_v32 = vmax.f32 %v5112_v42, 0.0  ;;  %v5115_v28 = vadd.f32 %v8457_v30, %v5100_v44  ;;  %v5098_v48 = vadd.f32 %v5081_v3, %v4990_v51  ;;  %v5135_v56 = vld [vmem:[#allocation2 + $0x30] sm:$0xff]  ;;  %v5754_v3 = vsel %vm978_vm2, %v8487_v59, 0 }
 0x6fc   : > { %v11450_v57 = vld [vmem:[#allocation2 + $0x11] sm:$0xff] }
 0x6fd   : > { %v5133_v60 = vld [vmem:[#allocation2 + $0x10] sm:$0xff]  ;;  %5128 = vst.msk [vmem:[#allocation2 + $0x51] sm:$0xff] %vm921_vm3, %v5120_v32  ;;  %v5123_v54 = vmax.f32 %v5115_v28, 0.0  ;;  %v5113_v43 = vadd.f32 %v8457_v30, %v5098_v48  ;;  %v5153_v36 = vpack.c.bf16 %v11450_v57, %v12393_v5  ;;  %v5856_v32 = vsel %vm978_vm2, %v8492_v35, 0  ;;  %v8497_v28 = vld [vmem:[%s12225_s14 + $0x20] sm:$0xf] }
 0x6fe   : > { %v5140_v55 = vpack.c.bf16 %v5133_v60, %v12394_v39  ;;  %v11484_v10 = vld [vmem:[#allocation2 + $0x41] sm:$0xff]  ;;  %v5320_v27 = vld [vmem:[#allocation2 + $0x12] sm:$0xff] }
 0x6ff   : > { %5131 = vst.msk [vmem:[#allocation2 + $0x81] sm:$0xff] %vm921_vm3, %v5123_v54  ;;  %v5121_v46 = vmax.f32 %v5113_v43, 0.0  ;;  %9549 = vmatprep.mubr.msk.bf16.mxu1 %vm921_vm3, %v5153_v36  ;;  %v5136_v22 = vld [vmem:[#allocation2 + $0x40] sm:$0xff]  ;;  %v5327_v26 = vpack.c.bf16 %v5320_v27, %v12397_v37  ;;  %v5322_v1 = vld [vmem:[#allocation2 + $0x32] sm:$0xff]  ;;  %v5532_v51 = vpack.c.bf16 %v11484_v10, %v11459_v41  ;;  %v5958_v43 = vsel %vm978_vm2, %v8497_v28, 0  ;;  %v12399_v39 = vld [vmem:[#allocation28_spill] sm:$0xff] }
 0x700   : > { %9559 = vmatprep.mubr.msk.bf16.mxu0 %vm921_vm3, %v5140_v55  ;;  %v11461_v53 = vld [vmem:[#allocation2 + $0x21] sm:$0xff]  ;;  %v5430_v47 = vpack.c.bf16 %v5136_v22, %v5135_v56 }
 0x701   : > { %v5134_v16 = vld [vmem:[#allocation2 + $0x20] sm:$0xff]  ;;  %5129 = vst.msk [vmem:[#allocation2 + $0x61] sm:$0xff] %vm921_vm3, %v5121_v46  ;;  %v11466_v30 = vpack.c.bf16 %v11459_v41, %v11461_v53  ;;  %v5531_v11 = vpack.c.bf16 %v11461_v53, %v11450_v57  ;;  %v12400_v46 = vld [vmem:[#allocation29_spill] sm:$0xff] }
 0x702   : > { %v11468_v17 = vpack.c.bf16 %v5135_v56, %v5134_v16  ;;  %v11500_v8 = vld [vmem:[#allocation2 + $0x71] sm:$0xff]  ;;  %v5429_v45 = vpack.c.bf16 %v5134_v16, %v5133_v60  ;;  %v5321_v25 = vld [vmem:[#allocation2 + $0x22] sm:$0xff] }
 0x703   : > { %9550 = vmatmul.mubr.msk.bf16.vlgmr.msra.gmra.mxu1 %vm921_vm3, %v11466_v30  ;;  %v5139_v62 = vld [vmem:[#allocation2 + $0x70] sm:$0xff]  ;;  %v5328_v18 = vpack.c.bf16 %v5322_v1, %v5321_v25  ;;  %v5323_v20 = vld [vmem:[#allocation2 + $0x42] sm:$0xff]  ;;  %v5633_v40 = vpack.c.bf16 %v5321_v25, %v5320_v27 }
 0x704   : > { %9560 = vmatmul.mubr.msk.bf16.vlgmr.msra.gmra.mxu0 %vm921_vm3, %v11468_v17  ;;  %v11486_v24 = vld [vmem:[#allocation2 + $0x51] sm:$0xff]  ;;  %9568 = vmatpush3.bf16.msra.mxu1 %v5346_v15  ;;  %v5634_v19 = vpack.c.bf16 %v5323_v20, %v5322_v1  ;;  %v12398_v5 = vld [vmem:[#allocation27_spill] sm:$0xff] }
 0x705   : > { %v5137_v23 = vld [vmem:[#allocation2 + $0x50] sm:$0xff]  ;;  %9578 = vmatpush3.bf16.msra.mxu0 %v5448_v0  ;;  %v11490_v31 = vpack.c.bf16 %v11486_v24, %v11484_v10  ;;  %9915 = vmatprep.subr.msk.bf16.mxu1 %vm978_vm2, %v8477_v52 }
 0x706   : > { %v11492_v34 = vpack.c.bf16 %v5137_v23, %v5136_v22  ;;  %9916 = vmatprep.subr.msk.bf16.mxu0 %vm978_vm2, %v8482_v21  ;;  %v5324_v58 = vld [vmem:[#allocation2 + $0x52] sm:$0xff]  ;;  %v5428_v49 = vld [vmem:[#allocation2 + $0x80] sm:$0xff] }
 0x707   : > { %9553 = vmatprep.mubr.msk.bf16.mxu1 %vm921_vm3, %v11490_v31  ;;  %v5329_v12 = vpack.c.bf16 %v5324_v58, %v5323_v20  ;;  %v5326_v63 = vld [vmem:[#allocation2 + $0x72] sm:$0xff]  ;;  %v5432_v33 = vpack.c.bf16 %v5428_v49, %v5139_v62  ;;  %v5530_v48 = vld [vmem:[#allocation2 + $0x81] sm:$0xff]  ;;  %v5738_v36 = vpack.c.bf16 %v12398_v5, %v5428_v49 }
 0x708   : > { %9563 = vmatprep.mubr.msk.bf16.mxu0 %vm921_vm3, %v11492_v34  ;;  %v5151_v2 = vld [vmem:[#allocation2 + $0x61] sm:$0xff]  ;;  %v5534_v60 = vpack.c.bf16 %v5530_v48, %v11500_v8  ;;  %v5840_v55 = vpack.c.bf16 %v12399_v39, %v5530_v48 }
 0x709   : > { %v5138_v4 = vld [vmem:[#allocation2 + $0x60] sm:$0xff]  ;;  %v11503_v61 = vpack.c.bf16 %v11500_v8, %v5151_v2  ;;  %v5533_v42 = vpack.c.bf16 %v5151_v2, %v11486_v24 }
 0x70a   : > { %v11505_v7 = vpack.c.bf16 %v5139_v62, %v5138_v4  ;;  %v5431_v38 = vpack.c.bf16 %v5138_v4, %v5137_v23  ;;  %v5325_v6 = vld [vmem:[#allocation2 + $0x62] sm:$0xff] }
 0x70b   : > { %9554 = vmatmul.mubr.msk.bf16.gmra.mxu1 %vm921_vm3, %v11503_v61  ;;  %v5330_v29 = vpack.c.bf16 %v5326_v63, %v5325_v6  ;;  %v5635_v44 = vpack.c.bf16 %v5325_v6, %v5324_v58  ;;  %v5632_v57 = vld [vmem:[#allocation2 + $0x82] sm:$0xff] }
 0x70c   : > { %9564 = vmatmul.mubr.msk.bf16.gmra.mxu0 %vm921_vm3, %v11505_v7  ;;  %9569 = vmatprep.mubr.msk.bf16.mxu1 %vm921_vm3, %v5327_v26  ;;  %v5636_v54 = vpack.c.bf16 %v5632_v57, %v5326_v63  ;;  %v5942_v41 = vpack.c.bf16 %v12400_v46, %v5632_v57 }
 0x70d   : > { %9579 = vmatprep.mubr.msk.bf16.mxu0 %vm921_vm3, %v5429_v45 }
 0x713   : > { %9570 = vmatmul.mubr.msk.bf16.vlgmr.msra.gmra.mxu1 %vm921_vm3, %v5328_v18 }
 0x714   : > { %9580 = vmatmul.mubr.msk.bf16.vlgmr.msra.gmra.mxu0 %vm921_vm3, %v5430_v47  ;;  %9573 = vmatprep.mubr.msk.bf16.mxu1 %vm921_vm3, %v5329_v12 }
 0x715   : > { %9583 = vmatprep.mubr.msk.bf16.mxu0 %vm921_vm3, %v5431_v38  ;;  %9588 = vmatpush3.bf16.msra.mxu1 %v5550_v50 }
 0x716   : > { %9598 = vmatpush3.bf16.msra.mxu0 %v5652_v13  ;;  %9917 = vmatprep.subr.msk.bf16.mxu1 %vm978_vm2, %v8487_v59 }
 0x717   : > { %9918 = vmatprep.subr.msk.bf16.mxu0 %vm978_vm2, %v8492_v35 }
 0x71b   : > { %9574 = vmatmul.mubr.msk.bf16.gmra.mxu1 %vm921_vm3, %v5330_v29 }
 0x71c   : > { %9584 = vmatmul.mubr.msk.bf16.gmra.mxu0 %vm921_vm3, %v5432_v33  ;;  %9589 = vmatprep.mubr.msk.bf16.mxu1 %vm921_vm3, %v5531_v11  ;;  %v9953_v11 = vld [vmem:[%s12227_s16] sm:$0xff]  }
 0x71d   : > { %9599 = vmatprep.mubr.msk.bf16.mxu0 %vm921_vm3, %v5633_v40 }
 0x723   : > { %9590 = vmatmul.mubr.msk.bf16.vlgmr.msra.gmra.mxu1 %vm921_vm3, %v5532_v51 }
 0x724   : > { %9600 = vmatmul.mubr.msk.bf16.vlgmr.msra.gmra.mxu0 %vm921_vm3, %v5634_v19  ;;  %9593 = vmatprep.mubr.msk.bf16.mxu1 %vm921_vm3, %v5533_v42 }
 0x725   : > { %9603 = vmatprep.mubr.msk.bf16.mxu0 %vm921_vm3, %v5635_v44  ;;  %9608 = vmatpush3.bf16.msra.mxu1 %v5754_v3 }
 0x726   : > { %9618 = vmatpush3.bf16.msra.mxu0 %v5856_v32  ;;  %9919 = vmatprep.subr.msk.bf16.mxu1 %vm978_vm2, %v8497_v28 }
 0x72b   : > { %9594 = vmatmul.mubr.msk.bf16.gmra.mxu1 %vm921_vm3, %v5534_v60 }
 0x72c   : > { %9604 = vmatmul.mubr.msk.bf16.gmra.mxu0 %vm921_vm3, %v5636_v54  ;;  %9609 = vmatprep.mubr.msk.bf16.mxu1 %vm921_vm3, %v11468_v17 }
 0x72d   : > { %9619 = vmatprep.mubr.msk.bf16.mxu0 %vm921_vm3, %v11466_v30 }
 0x733   : > { %9610 = vmatmul.mubr.msk.bf16.vlgmr.msra.gmra.mxu1 %vm921_vm3, %v11492_v34 }
 0x734   : > { %9620 = vmatmul.mubr.msk.bf16.vlgmr.msra.gmra.mxu0 %vm921_vm3, %v11490_v31  ;;  %9613 = vmatprep.mubr.msk.bf16.mxu1 %vm921_vm3, %v11505_v7 }
 0x735   : > { %9623 = vmatprep.mubr.msk.bf16.mxu0 %vm921_vm3, %v11503_v61  ;;  %9628 = vmatpush3.bf16.msra.mxu1 %v5958_v43 }
 0x73b   : > { %9614 = vmatmul.mubr.msk.bf16.gmra.mxu1 %vm921_vm3, %v5738_v36 }
 0x73c   : > { %9624 = vmatmul.mubr.msk.bf16.gmra.mxu0 %vm921_vm3, %v5840_v55  ;;  %9629 = vmatprep.mubr.msk.bf16.mxu1 %vm921_vm3, %v5328_v18 }
 0x73d   : > { %9645 = vmatprep.mubr.msk.bf16.mxu0 %vm6132_vm12, %v9953_v11 }
 0x743   : > { %9630 = vmatmul.mubr.msk.bf16.vlgmr.msra.gmra.mxu1 %vm921_vm3, %v5329_v12 }
 0x744   : > { %9633 = vmatprep.mubr.msk.bf16.mxu1 %vm921_vm3, %v5330_v29 }
 0x74b   : > { %9634 = vmatmul.mubr.msk.bf16.gmra.mxu1 %vm921_vm3, %v5942_v41 }
 0x7c3   : > { %v9551_v53 = vpop.f32.mrf.mxu1 }
 0x7c4   : > { %v9561_v16 = vpop.f32.mrf.mxu0 }
 0x7c5   : > { %v11572_v56 = vpop.f32.mrf.mxu1  ;;  %v5297_v36 = vadd.f32 %v9561_v16, %v9551_v53 }
 0x7c6   : > { %v11574_v30 = vpop.f32.mrf.mxu0 }
 0x7c7   : > { %v9552_v17 = vpop.f32.mrf.mxu1 }
 0x7c8   : > { %v9562_v14 = vpop.f32.mrf.mxu0 }
 0x7c9   : > { %v5211_v15 = vpop.f32.mrf.mxu1  ;;  %v5300_v54 = vadd.f32 %v9562_v14, %v9552_v17 }
 0x7ca   : > { %v5291_v9 = vpop.f32.mrf.mxu0 }
 0x7cb   : > { %v9555_v0 = vpop.f32.mrf.mxu1  ;;  %v5292_v46 = vadd.f32 %v5291_v9, %v5211_v15 }
 0x7cc   : > { %v9565_v52 = vpop.f32.mrf.mxu0 }
 0x7cd   : > { %v5224_v21 = vpop.f32.mrf.mxu1  ;;  %v5313_v57 = vadd.f32 %v9565_v52, %v9555_v0 }
 0x7ce   : > { %v5304_v10 = vpop.f32.mrf.mxu0 }
 0x7cf   : > { %v9556_v24 = vpop.f32.mrf.mxu1  ;;  %v5305_v43 = vadd.f32 %v5304_v10, %v5224_v21 }
 0x7d0   : > { %v9566_v22 = vpop.f32.mrf.mxu0 }
 0x7d1   : > { %v5227_v23 = vpop.f32.mrf.mxu1  ;;  %v5316_v41 = vadd.f32 %v9566_v22, %v9556_v24 }
 0x7d2   : > { %v5307_v31 = vpop.f32.mrf.mxu0 }
 0x7d3   : > { %v9571_v34 = vpop.f32.mrf.mxu1 }
 0x7d4   : > { %v11576_v8 = vpop.f32.mrf.mxu0 }
 0x7d5   : > { %v5382_v27 = vpop.f32.mrf.mxu1 }
 0x7d6   : > { %v11578_v2 = vpop.f32.mrf.mxu0 }
 0x7d7   : > { %12401 = vst [vmem:[#allocation32_spill] sm:$0xff] %v11578_v2  ;;  %v9572_v4 = vpop.f32.mrf.mxu1 }
 0x7d8   : > { %v9582_v62 = vpop.f32.mrf.mxu0  ;;  %v5416_v11 = vadd.f32 %v9572_v4, %v5300_v54 }
 0x7d9   : > { %v5385_v61 = vpop.f32.mrf.mxu1 }
 0x7da   : > { %v5487_v7 = vpop.f32.mrf.mxu0  ;;  %v5518_v21 = vadd.f32 %v9582_v62, %v5416_v11 }
 0x7db   : > { %v9575_v37 = vpop.f32.mrf.mxu1 }
 0x7dc   : > { %v9585_v26 = vpop.f32.mrf.mxu0  ;;  %v5419_v5 = vadd.f32 %v9575_v37, %v5313_v57 }
 0x7dd   : > { %v5398_v45 = vpop.f32.mrf.mxu1 }
 0x7de   : > { %v5500_v25 = vpop.f32.mrf.mxu0  ;;  %v5521_v2 = vadd.f32 %v9585_v26, %v5419_v5 }
 0x7df   : > { %v9576_v58 = vpop.f32.mrf.mxu1 }
 0x7e0   : > { %v9586_v1 = vpop.f32.mrf.mxu0  ;;  %v5420_v0 = vadd.f32 %v9576_v58, %v5316_v41 }
 0x7e1   : > { %v5401_v18 = vpop.f32.mrf.mxu1 }
 0x7e2   : > { %v5503_v47 = vpop.f32.mrf.mxu0  ;;  %v5522_v22 = vadd.f32 %v9586_v1, %v5420_v0 }
 0x7e3   : > { %v9591_v20 = vpop.f32.mrf.mxu1 }
 0x7e4   : > { %v11580_v12 = vpop.f32.mrf.mxu0 }
 0x7e5   : > { %12402 = vst [vmem:[#allocation33_spill] sm:$0xff] %v11580_v12  ;;  %v5586_v38 = vpop.f32.mrf.mxu1  ;;  %v5308_v12 = vadd.f32 %v5307_v31, %v5227_v23 }
 0x7e6   : > { %v11582_v50 = vpop.f32.mrf.mxu0 }
 0x7e7   : > { %12403 = vst [vmem:[#allocation34_spill] sm:$0xff] %v11582_v50  ;;  %v9592_v13 = vpop.f32.mrf.mxu1  ;;  %v5417_v50 = vadd.f32 %v5398_v45, %v5305_v43  ;;  %v5418_v16 = vadd.f32 %v5401_v18, %v5308_v12 }
 0x7e8   : > { %v9602_v59 = vpop.f32.mrf.mxu0  ;;  %v5620_v4 = vadd.f32 %v9592_v13, %v5518_v21 }
 0x7e9   : > { %v5589_v35 = vpop.f32.mrf.mxu1  ;;  %v5519_v53 = vadd.f32 %v5500_v25, %v5417_v50  ;;  %v5520_v37 = vadd.f32 %v5503_v47, %v5418_v16 }
 0x7ea   : > { %v11584_v6 = vpop.f32.mrf.mxu0  ;;  %v5722_v58 = vadd.f32 %v9602_v59, %v5620_v4 }
 0x7eb   : > { %12404 = vst [vmem:[#allocation26_spill] sm:$0xff] %v11584_v6  ;;  %v9595_v49 = vpop.f32.mrf.mxu1  ;;  %v5415_v6 = vadd.f32 %v9571_v34, %v5297_v36 }
 0x7ec   : > { %v9605_v63 = vpop.f32.mrf.mxu0  ;;  %v5623_v10 = vadd.f32 %v9595_v49, %v5521_v2  ;;  %v12409_v12 = vld [vmem:[#allocation33_spill] sm:$0xff] }
 0x7ed   : > { %v5602_v29 = vpop.f32.mrf.mxu1  ;;  %v5517_v15 = vadd.f32 %v11576_v8, %v5415_v6 }
 0x7ee   : > { %v5704_v33 = vpop.f32.mrf.mxu0  ;;  %v5725_v26 = vadd.f32 %v9605_v63, %v5623_v10 }
 0x7ef   : > { %v9596_v40 = vpop.f32.mrf.mxu1  ;;  %v5619_v23 = vadd.f32 %v9591_v20, %v5517_v15 }
 0x7f0   : > { %v9606_v51 = vpop.f32.mrf.mxu0  ;;  %v5624_v45 = vadd.f32 %v9596_v40, %v5522_v22 }
 0x7f1   : > { %v5605_v19 = vpop.f32.mrf.mxu1 }
 0x7f2   : > { %v5707_v42 = vpop.f32.mrf.mxu0  ;;  %v5622_v18 = vadd.f32 %v5605_v19, %v5520_v37  ;;  %v12410_v13 = vld [vmem:[#allocation26_spill] sm:$0xff]  ;;  %v5726_v49 = vadd.f32 %v9606_v51, %v5624_v45 }
 0x7f3   : > { %v9611_v44 = vpop.f32.mrf.mxu1 }
 0x7f4   : > { %v11590_v3 = vpop.f32.mrf.mxu0  ;;  %v5724_v40 = vadd.f32 %v5707_v42, %v5622_v18 }
 0x7f5   : > { %12405 = vst [vmem:[#allocation10_spill] sm:$0xff] %v11590_v3  ;;  %v11592_v32 = vpop.f32.mrf.mxu1  ;;  %v5289_v3 = vadd.f32 %v11574_v30, %v11572_v56  ;;  %v5621_v56 = vadd.f32 %v5602_v29, %v5519_v53  ;;  %v12408_v30 = vld [vmem:[#allocation32_spill] sm:$0xff] }
 0x7f6   : > { %12406 = vst [vmem:[#allocation30_spill] sm:$0xff] %v11592_v32  ;;  %v11594_v28 = vpop.f32.mrf.mxu0 }
 0x7f7   : > { %12407 = vst [vmem:[#allocation31_spill] sm:$0xff] %v11594_v28  ;;  %v9612_v48 = vpop.f32.mrf.mxu1  ;;  %v5414_v28 = vadd.f32 %v5385_v61, %v5292_v46  ;;  %v5413_v52 = vadd.f32 %v5382_v27, %v5289_v3  ;;  %v5723_v2 = vadd.f32 %v5704_v33, %v5621_v56  ;;  %v12411_v3 = vld [vmem:[#allocation34_spill] sm:$0xff] }
 0x7f8   : > { %v9622_v39 = vpop.f32.mrf.mxu0  ;;  %v5824_v20 = vadd.f32 %v9612_v48, %v5722_v58 }
 0x7f9   : > { %v5793_v60 = vpop.f32.mrf.mxu1  ;;  %v5516_v24 = vadd.f32 %v5487_v7, %v5414_v28  ;;  %v5515_v34 = vadd.f32 %v12408_v30, %v5413_v52  ;;  %v5721_v7 = vadd.f32 %v12409_v12, %v5619_v23 }
 0x7fa   : > { %v5895_v17 = vpop.f32.mrf.mxu0  ;;  %v5926_v43 = vadd.f32 %v9622_v39, %v5824_v20  ;;  %v9961_v20 = vld [vmem:[%s12227_s16 + $0x38] sm:$0xff]  }
 0x7fb   : > { %v9615_v55 = vpop.f32.mrf.mxu1  ;;  %v5618_v27 = vadd.f32 %v5589_v35, %v5516_v24  ;;  %v5617_v62 = vadd.f32 %v5586_v38, %v5515_v34  ;;  %v5823_v35 = vadd.f32 %v9611_v44, %v5721_v7  ;;  %v9954_v7 = vld [vmem:[%s12227_s16 + $0x8] sm:$0xff]  }
 0x7fc   : > { %v9625_v31 = vpop.f32.mrf.mxu0  ;;  %v5827_v8 = vadd.f32 %v9615_v55, %v5725_v26  ;;  %v12413_v46 = vld [vmem:[#allocation10_spill] sm:$0xff] }
 0x7fd   : > { %v5806_v32 = vpop.f32.mrf.mxu1  ;;  %v5720_v6 = vadd.f32 %v12410_v13, %v5618_v27  ;;  %v5719_v47 = vadd.f32 %v12411_v3, %v5617_v62  ;;  %v12412_v33 = vld [vmem:[#allocation30_spill] sm:$0xff]  ;;  %v5925_v51 = vadd.f32 %v12413_v46, %v5823_v35  ;;  %v9957_v13 = vld [vmem:[%s12227_s16 + $0x20] sm:$0xff]   ;;  %v12417_v35 = vld [vmem:[#allocation21_spill] sm:$0xff] }
 0x7fe   : > { %v5908_v1 = vpop.f32.mrf.mxu0  ;;  %v5825_v29 = vadd.f32 %v5806_v32, %v5723_v2  ;;  %v5929_v28 = vadd.f32 %v9625_v31, %v5827_v8  ;;  %v12414_v0 = vld [vmem:[#allocation31_spill] sm:$0xff] }
 0x7ff   : > { %v9616_v14 = vpop.f32.mrf.mxu1  ;;  %v5822_v38 = vadd.f32 %v5793_v60, %v5720_v6  ;;  %v5821_v19 = vadd.f32 %v12412_v33, %v5719_v47  ;;  %v9958_v6 = vld [vmem:[%s12227_s16 + $0x28] sm:$0xff]   ;;  %v12415_v3 = vld [vmem:[#allocation7_spill] sm:$0xff] }
 0x800   : > { %v5828_v59 = vadd.f32 %v9616_v14, %v5726_v49  ;;  %v9626_v57 = vpop.f32.mrf.mxu0  ;;  %v5927_v5 = vadd.f32 %v5908_v1, %v5825_v29  ;;  %v8502_v14 = vld [vmem:[%s12226_s15] ss:$0 sm:$0xff]  ;;  %v9955_v1 = vld [vmem:[%s12227_s16 + $0x10] sm:$0xff]   ;;  %v12416_v47 = vld [vmem:[#allocation16_spill] sm:$0xff] }
 0x801   : > { %v5809_v9 = vpop.f32.mrf.mxu1  ;;  %v5924_v32 = vadd.f32 %v5895_v17, %v5822_v38  ;;  %v5923_v42 = vadd.f32 %v12414_v0, %v5821_v19  ;;  %v9960_v49 = vld [vmem:[%s12227_s16 + $0x30] sm:$0xff]   ;;  %v9964_v29 = vld [vmem:[%s12227_s16 + $0x80] sm:$0xff]   ;;  %v12420_v38 = vld [vmem:[#allocation12_spill] sm:$0xff] }
 0x802   : > { %v5826_v36 = vadd.f32 %v5809_v9, %v5724_v40  ;;  %v5930_v41 = vadd.f32 %v9626_v57, %v5828_v59  ;;  %v5911_v60 = vpop.f32.mrf.mxu0  ;;  %v12419_v40 = vld [vmem:[#allocation13_spill] sm:$0xff]  ;;  %v12422_v59 = vld [vmem:[#allocation19_spill] sm:$0xff]  ;;  %v12423_v33 = vld [vmem:[#allocation8_spill] sm:$0xff] }
 0x803   : > { %v9631_v61 = vpop.f32.mrf.mxu1  ;;  %v12424_v19 = vld [vmem:[#allocation22_spill] sm:$0xff]  ;;  %v12425_v57 = vld [vmem:[#allocation15_spill] sm:$0xff]  ;;  %v9962_v0 = vld [vmem:[%s12227_s16 + $0x48] sm:$0xff]  }
 0x804   : > { %v6027_v52 = vadd.f32 %v9631_v61, %v5925_v51  ;;  %v5928_v39 = vadd.f32 %v5911_v60, %v5826_v36  ;;  %v12429_v36 = vld [vmem:[#allocation24_spill] sm:$0xff]  ;;  %v9963_v60 = vld [vmem:[%s12227_s16 + $0x50] sm:$0xff]  }
 0x805   : > { %v5994_v25 = vpop.f32.mrf.mxu1 }
 0x806   : > { %v6025_v15 = vadd.f32 %v5994_v25, %v5923_v42  ;;  %v6042_v56 = vadd.f32 %v8502_v14, %v6027_v52  ;;  %v9959_v25 = vld [vmem:[%s12227_s16 + $0x40] sm:$0xff]  }
 0x807   : > { %v9632_v50 = vpop.f32.mrf.mxu1  ;;  %9669 = vmatprep.mubr.msk.bf16.mxu1 %vm6132_vm12, %v9959_v25 }
 0x808   : > { %v6028_v11 = vadd.f32 %v9632_v50, %v5926_v43  ;;  %v6040_v61 = vadd.f32 %v8502_v14, %v6025_v15  ;;  %v6050_v62 = vmax.f32 %v6042_v56, 0.0  ;;  %v9956_v50 = vld [vmem:[%s12227_s16 + $0x18] sm:$0xff]   ;;  %v12427_v43 = vld [vmem:[#allocation20_spill] sm:$0xff]  ;;  %v9967_v15 = vld [vmem:[%s12227_s16 + $0x60] sm:$0xff]  }
 0x809   : > { %v5997_v63 = vpop.f32.mrf.mxu1 }
 0x80a   : > { %v6026_v53 = vadd.f32 %v5997_v63, %v5924_v32  ;;  %v6043_v24 = vadd.f32 %v8502_v14, %v6028_v11  ;;  %v6048_v18 = vmax.f32 %v6040_v61, 0.0  ;;  %v12418_v63 = vld [vmem:[#allocation11_spill] sm:$0xff] }
 0x80b   : > { %v9635_v54 = vpop.f32.mrf.mxu1 }
 0x80c   : > { %v6031_v55 = vadd.f32 %v9635_v54, %v5929_v28  ;;  %v6041_v30 = vadd.f32 %v8502_v14, %v6026_v53  ;;  %v6051_v37 = vmax.f32 %v6043_v24, 0.0  ;;  %v12421_v28 = vld [vmem:[#allocation17_spill] sm:$0xff]  ;;  %v12426_v54 = vld [vmem:[#allocation14_spill] sm:$0xff]  ;;  %v9966_v53 = vld [vmem:[%s12227_s16 + $0x88] sm:$0xff]  }
 0x80d   : > { %v6010_v48 = vpop.f32.mrf.mxu1 }
 0x80e   : > { %v6029_v44 = vadd.f32 %v6010_v48, %v5927_v5  ;;  %v6046_v16 = vadd.f32 %v8502_v14, %v6031_v55  ;;  %v6049_v58 = vmax.f32 %v6041_v30, 0.0  ;;  %v6073_v8 = vpack.c.bf16 %v6051_v37, %v6050_v62  ;;  %v12428_v5 = vld [vmem:[#allocation18_spill] sm:$0xff]  ;;  %v12430_v55 = vld [vmem:[#allocation25_spill] sm:$0xff]  ;;  %v9976_v62 = vld [vmem:[%s12227_s16 + $0xc0] sm:$0xff]  }
 0x80f   : > { %v9636_v21 = vpop.f32.mrf.mxu1  ;;  %v9971_v30 = vld [vmem:[%s12227_s16 + $0x70] sm:$0xff]   ;;  %v9973_v37 = vld [vmem:[%s12227_s16 + $0x78] sm:$0xff]  }
 0x810   : > { %v6032_v10 = vadd.f32 %v9636_v21, %v5930_v41  ;;  %v6044_v17 = vadd.f32 %v8502_v14, %v6029_v44  ;;  %v6054_v34 = vmax.f32 %v6046_v16, 0.0  ;;  %v6072_v12 = vpack.c.bf16 %v6049_v58, %v6048_v18  ;;  %v9977_v18 = vld [vmem:[%s12227_s16 + $0xb8] sm:$0xff]  }
 0x811   : > { %v6013_v9 = vpop.f32.mrf.mxu1 }
 0x812   : > { %v6047_v22 = vadd.f32 %v8502_v14, %v6032_v10  ;;  %v6030_v4 = vadd.f32 %v6013_v9, %v5928_v39  ;;  %v6052_v27 = vmax.f32 %v6044_v17, 0.0  ;;  %v9965_v39 = vld [vmem:[%s12227_s16 + $0x58] sm:$0xff]   ;;  %v9968_v9 = vld [vmem:[%s12227_s16 + $0x90] sm:$0xff]  }
 0x814   : > { %v6055_v23 = vmax.f32 %v6047_v22, 0.0  ;;  %v6045_v31 = vadd.f32 %v8502_v14, %v6030_v4  ;;  %v9969_v22 = vld [vmem:[%s12227_s16 + $0x68] sm:$0xff]   ;;  %v9970_v4 = vld [vmem:[%s12227_s16 + $0x98] sm:$0xff]  }
 0x816   : > { %v6075_v26 = vpack.c.bf16 %v6055_v23, %v6054_v34  ;;  %v6053_v45 = vmax.f32 %v6045_v31, 0.0  ;;  %v9972_v34 = vld [vmem:[%s12227_s16 + $0xa0] sm:$0xff]  }
 0x818   : > { %v6074_v2 = vpack.c.bf16 %v6053_v45, %v6052_v27  ;;  %6337 = vrot.lane.b32.xlu0 %v6075_v26, %s10193_s28  ;;  %9637 = vmatprep.subr.bf16.mxu0 %v6075_v26  ;;  %v9974_v27 = vld [vmem:[%s12227_s16 + $0xa8] sm:$0xff]   ;;  %v9975_v45 = vld [vmem:[%s12227_s16 + $0xb0] sm:$0xff]  }
 0x819   : > { %9638 = vmatpush3.bf16.msra.mxu0 %v6075_v26 }
 0x81a   : > { %6335 = vrot.lane.b32.xlu1 %v6074_v2, %s10193_s28  ;;  %9639 = vmatprep.subr.bf16.mxu0 %v6074_v2 }
 0x81c   : > { %6333 = vrot.lane.b32.xlu0 %v6073_v8, %s10193_s28 }
 0x81d   : > { %9640 = vmatpush3.bf16.msra.mxu0 %v6074_v2 }
 0x81e   : > { %9641 = vmatprep.subr.bf16.mxu0 %v6073_v8  ;;  %6331 = vrot.lane.b32.xlu1 %v6072_v12, %s10193_s28 }
 0x820   : > { %6543 = vrot.lane.b32.xlu0 %v6075_v26, %s10194_s19 }
 0x821   : > { %9642 = vmatpush3.bf16.msra.mxu0 %v6073_v8 }
 0x822   : > { %6749 = vrot.lane.b32.xlu1 %v6075_v26, %s10195_s8  ;;  %9643 = vmatprep.subr.bf16.mxu0 %v6072_v12 }
 0x824   : > { %6541 = vrot.lane.b32.xlu0 %v6074_v2, %s10194_s19 }
 0x825   : > { %9644 = vmatpush3.bf16.msra.mxu0 %v6072_v12 }
 0x826   : > { %6747 = vrot.lane.b32.xlu1 %v6074_v2, %s10195_s8 }
 0x828   : > { %6539 = vrot.lane.b32.xlu0 %v6073_v8, %s10194_s19  ;;  %9646 = vmatmul.mubr.msk.bf16.vlgmr.msra.gmra.mxu0 %vm6132_vm12, %v9954_v7  ;;  %v9979_v7 = vld [vmem:[%s12227_s16 + $0xd0] sm:$0xff]  }
 0x829   : > { %9649 = vmatprep.mubr.msk.bf16.mxu0 %vm6132_vm12, %v9955_v1  ;;  %v9980_v1 = vld [vmem:[%s12227_s16 + $0x100] sm:$0xff]  }
 0x82a   : > { %6745 = vrot.lane.b32.xlu1 %v6073_v8, %s10195_s8 }
 0x82c   : > { %6537 = vrot.lane.b32.xlu0 %v6072_v12, %s10194_s19 }
 0x82e   : > { %6743 = vrot.lane.b32.xlu1 %v6072_v12, %s10195_s8 }
 0x830   : > { %6955 = vrot.lane.b32.xlu0 %v6075_v26, %s10196_s29  ;;  %9650 = vmatmul.mubr.msk.bf16.gmra.mxu0 %vm6132_vm12, %v9956_v50 }
 0x831   : > { %9653 = vmatprep.mubr.msk.bf16.mxu0 %vm6132_vm12, %v9957_v13 }
 0x832   : > { %7161 = vrot.lane.b32.xlu1 %v6075_v26, %s10197_s5 }
 0x834   : > { %6953 = vrot.lane.b32.xlu0 %v6074_v2, %s10196_s29 }
 0x836   : > { %7159 = vrot.lane.b32.xlu1 %v6074_v2, %s10197_s5 }
 0x838   : > { %6951 = vrot.lane.b32.xlu0 %v6073_v8, %s10196_s29  ;;  %9654 = vmatmul.mubr.msk.bf16.gmra.mxu0 %vm6132_vm12, %v9958_v6 }
 0x839   : > { %9657 = vmatprep.mubr.msk.bf16.mxu0 %vm6132_vm12, %v9960_v49  ;;  %v9981_v49 = vld [vmem:[%s12227_s16 + $0xd8] sm:$0xff]  }
 0x83a   : > { %7157 = vrot.lane.b32.xlu1 %v6073_v8, %s10197_s5 }
 0x83c   : > { %6949 = vrot.lane.b32.xlu0 %v6072_v12, %s10196_s29  ;;  %s10200_s29 = smov 1  }
 0x83e   : > { %7155 = vrot.lane.b32.xlu1 %v6072_v12, %s10197_s5 }
 0x840   : > { %7367 = vrot.lane.b32.xlu0 %v6075_v26, %s10198_s9  ;;  %9658 = vmatmul.mubr.msk.bf16.gmra.mxu0 %vm6132_vm12, %v9961_v20  ;;  %v9982_v20 = vld [vmem:[%s12227_s16 + $0x108] sm:$0xff]  }
 0x841   : > { %9693 = vmatprep.mubr.msk.bf16.mxu0 %vm6132_vm12, %v9964_v29 }
 0x842   : > { %7573 = vrot.lane.b32.xlu1 %v6075_v26, %s10199_s2 }
 0x844   : > { %7365 = vrot.lane.b32.xlu0 %v6074_v2, %s10198_s9 }
 0x846   : > { %7571 = vrot.lane.b32.xlu1 %v6074_v2, %s10199_s2 }
 0x848   : > { %7363 = vrot.lane.b32.xlu0 %v6073_v8, %s10198_s9 }
 0x84a   : > { %7569 = vrot.lane.b32.xlu1 %v6073_v8, %s10199_s2  ;;  %v9978_v8 = vld [vmem:[%s12227_s16 + $0xc8] sm:$0xff]  }
 0x84c   : > { %7361 = vrot.lane.b32.xlu0 %v6072_v12, %s10198_s9  ;;  %s12454_s9 = sld [smem:[#allocation44_spill]] }
 0x84e   : > { %7567 = vrot.lane.b32.xlu1 %v6072_v12, %s10199_s2 }
 0x850   : > { %3464 = vrot.lane.b32.xlu0 %v12415_v3, %s10200_s29 }
 0x852   : > { %3466 = vrot.lane.b32.xlu1 %v12416_v47, %s10200_s29  ;;  %v9983_v47 = vld [vmem:[%s12227_s16 + $0xe0] sm:$0xff]  }
 0x854   : > { %3468 = vrot.lane.b32.xlu0 %v12417_v35, %s10200_s29  ;;  %v9984_v35 = vld [vmem:[%s12227_s16 + $0x110] sm:$0xff]  }
 0x856   : > { %3470 = vrot.lane.b32.xlu1 %v12418_v63, %s10200_s29 }
 0x858   : > { %3472 = vrot.lane.b32.xlu0 %v12419_v40, %s10200_s29 }
 0x85a   : > { %3474 = vrot.lane.b32.xlu1 %v12420_v38, %s10200_s29  ;;  %v9985_v38 = vld [vmem:[%s12227_s16 + $0xe8] sm:$0xff]  }
 0x85c   : > { %3476 = vrot.lane.b32.xlu0 %v12421_v28, %s10200_s29  ;;  %v9986_v28 = vld [vmem:[%s12227_s16 + $0x118] sm:$0xff]  }
 0x85e   : > { %3478 = vrot.lane.b32.xlu1 %v12422_v59, %s10200_s29 }
 0x860   : > { %4054 = vrot.lane.b32.xlu0 %v12423_v33, %s10200_s29  ;;  %v9987_v33 = vld [vmem:[%s12227_s16 + $0xf0] sm:$0xff]  }
 0x862   : > { %4056 = vrot.lane.b32.xlu1 %v12424_v19, %s10200_s29  ;;  %v9988_v19 = vld [vmem:[%s12227_s16 + $0x120] sm:$0xff]  }
 0x864   : > { %4058 = vrot.lane.b32.xlu0 %v12425_v57, %s10200_s29 }
 0x866   : > { %4060 = vrot.lane.b32.xlu1 %v12426_v54, %s10200_s29 }
 0x868   : > { %4062 = vrot.lane.b32.xlu0 %v12427_v43, %s10200_s29 }
 0x86a   : > { %4064 = vrot.lane.b32.xlu1 %v12428_v5, %s10200_s29  ;;  %v9989_v5 = vld [vmem:[%s12227_s16 + $0xf8] sm:$0xff]  }
 0x86c   : > { %4066 = vrot.lane.b32.xlu0 %v12429_v36, %s10200_s29  ;;  %v9990_v36 = vld [vmem:[%s12227_s16 + $0x128] sm:$0xff]  }
 0x86e   : > { %4068 = vrot.lane.b32.xlu1 %v12430_v55, %s10200_s29 }
 0x88a   : > { %v6338_v46 = vpop.permute.xlu0 %6337 }
 0x88b   : > { %9661 = vmatprep.subr.bf16.mxu1 %v6338_v46 }
 0x88c   : > { %9662 = vmatpush3.bf16.msra.mxu1 %v6338_v46  ;;  %v6336_v51 = vpop.permute.xlu1 %6335  ;;  %v9991_v46 = vld [vmem:[%s12227_s16 + $0x130] sm:$0xff]  }
 0x88d   : > { %9663 = vmatprep.subr.bf16.mxu1 %v6336_v51 }
 0x88e   : > { %v6334_v48 = vpop.permute.xlu0 %6333 }
 0x890   : > { %9664 = vmatpush3.bf16.msra.mxu1 %v6336_v51  ;;  %v6332_v32 = vpop.permute.xlu1 %6331  ;;  %v9992_v51 = vld [vmem:[%s12227_s16 + $0x140] sm:$0xff]  }
 0x891   : > { %9665 = vmatprep.subr.bf16.mxu1 %v6334_v48 }
 0x892   : > { %v6544_v41 = vpop.permute.xlu0 %6543 }
 0x893   : > { %9685 = vmatprep.subr.bf16.mxu0 %v6544_v41 }
 0x894   : > { %9666 = vmatpush3.bf16.msra.mxu1 %v6334_v48  ;;  %v6750_v11 = vpop.permute.xlu1 %6749  ;;  %9686 = vmatpush3.bf16.msra.mxu0 %v6544_v41 }
 0x895   : > { %9667 = vmatprep.subr.bf16.mxu1 %v6332_v32 }
 0x896   : > { %v6542_v44 = vpop.permute.xlu0 %6541 }
 0x897   : > { %9687 = vmatprep.subr.bf16.mxu0 %v6542_v44 }
 0x898   : > { %9668 = vmatpush3.bf16.msra.mxu1 %v6332_v32  ;;  %v6748_v42 = vpop.permute.xlu1 %6747  ;;  %9688 = vmatpush3.bf16.msra.mxu0 %v6542_v44  ;;  %v9994_v44 = vld [vmem:[%s12227_s16 + $0x148] sm:$0xff]  }
 0x899   : > { %9709 = vmatprep.subr.bf16.mxu1 %v6750_v11 }
 0x89a   : > { %v6540_v52 = vpop.permute.xlu0 %6539 }
 0x89b   : > { %9670 = vmatmul.mubr.msk.bf16.vlgmr.msra.gmra.mxu1 %vm6132_vm12, %v9962_v0  ;;  %9689 = vmatprep.subr.bf16.mxu0 %v6540_v52 }
 0x89c   : > { %9710 = vmatpush3.bf16.msra.mxu1 %v6750_v11  ;;  %v6746_v14 = vpop.permute.xlu1 %6745  ;;  %9690 = vmatpush3.bf16.msra.mxu0 %v6540_v52  ;;  %v9993_v11 = vld [vmem:[%s12227_s16 + $0x138] sm:$0xff]  }
 0x89d   : > { %9711 = vmatprep.subr.bf16.mxu1 %v6748_v42  ;;  %9673 = vmatprep.mubr.msk.bf16.mxu1 %vm6132_vm12, %v9963_v60  ;;  %v9996_v60 = vld [vmem:[%s12227_s16 + $0x180] sm:$0xff]  }
 0x89e   : > { %v6538_v21 = vpop.permute.xlu0 %6537 }
 0x89f   : > { %9691 = vmatprep.subr.bf16.mxu0 %v6538_v21 }
 0x8a0   : > { %9712 = vmatpush3.bf16.msra.mxu1 %v6748_v42  ;;  %v6744_v16 = vpop.permute.xlu1 %6743  ;;  %9692 = vmatpush3.bf16.msra.mxu0 %v6538_v21  ;;  %v9995_v42 = vld [vmem:[%s12227_s16 + $0x150] sm:$0xff]  }
 0x8a1   : > { %9713 = vmatprep.subr.bf16.mxu1 %v6746_v14 }
 0x8a2   : > { %v6956_v10 = vpop.permute.xlu0 %6955 }
 0x8a3   : > { %9674 = vmatmul.mubr.msk.bf16.gmra.mxu1 %vm6132_vm12, %v9965_v39  ;;  %9694 = vmatmul.mubr.msk.bf16.vlgmr.msra.gmra.mxu0 %vm6132_vm12, %v9966_v53  ;;  %v9997_v39 = vld [vmem:[%s12227_s16 + $0x158] sm:$0xff]   ;;  %v9998_v53 = vld [vmem:[%s12227_s16 + $0x188] sm:$0xff]  }
 0x8a4   : > { %9733 = vmatprep.subr.bf16.mxu0 %v6956_v10  ;;  %9714 = vmatpush3.bf16.msra.mxu1 %v6746_v14  ;;  %v7162_v24 = vpop.permute.xlu1 %7161 }
 0x8a5   : > { %9734 = vmatpush3.bf16.msra.mxu0 %v6956_v10  ;;  %9715 = vmatprep.subr.bf16.mxu1 %v6744_v16  ;;  %v9999_v10 = vld [vmem:[%s12227_s16 + $0x160] sm:$0xff]  }
 0x8a6   : > { %v6954_v17 = vpop.permute.xlu0 %6953  ;;  %9677 = vmatprep.mubr.msk.bf16.mxu1 %vm6132_vm12, %v9967_v15  ;;  %9697 = vmatprep.mubr.msk.bf16.mxu0 %vm6132_vm12, %v9968_v9  ;;  %v10000_v15 = vld [vmem:[%s12227_s16 + $0x190] sm:$0xff]   ;;  %v10001_v9 = vld [vmem:[%s12227_s16 + $0x168] sm:$0xff]  }
 0x8a7   : > { %9735 = vmatprep.subr.bf16.mxu0 %v6954_v17 }
 0x8a8   : > { %9716 = vmatpush3.bf16.msra.mxu1 %v6744_v16  ;;  %v7160_v56 = vpop.permute.xlu1 %7159 }
 0x8a9   : > { %9736 = vmatpush3.bf16.msra.mxu0 %v6954_v17  ;;  %9757 = vmatprep.subr.bf16.mxu1 %v7162_v24  ;;  %v10003_v17 = vld [vmem:[%s12227_s16 + $0x170] sm:$0xff]  }
 0x8aa   : > { %v6952_v23 = vpop.permute.xlu0 %6951 }
 0x8ab   : > { %9678 = vmatmul.mubr.msk.bf16.gmra.mxu1 %vm6132_vm12, %v9969_v22  ;;  %9698 = vmatmul.mubr.msk.bf16.gmra.mxu0 %vm6132_vm12, %v9970_v4  ;;  %v10004_v22 = vld [vmem:[%s12227_s16 + $0x1a0] sm:$0xff]   ;;  %v12431_v4 = vmov 0.0  }
 0x8ac   : > { %9737 = vmatprep.subr.bf16.mxu0 %v6952_v23  ;;  %v7158_v31 = vpop.permute.xlu1 %7157  ;;  %9681 = vmatprep.mubr.msk.bf16.mxu1 %vm6132_vm12, %v9971_v30  ;;  %v10006_v30 = vld [vmem:[%s12227_s16 + $0x1a8] sm:$0xff]  }
 0x8ad   : > { %9738 = vmatpush3.bf16.msra.mxu0 %v6952_v23  ;;  %9701 = vmatprep.mubr.msk.bf16.mxu0 %vm6132_vm12, %v9972_v34  ;;  %v10007_v34 = vld [vmem:[%s12227_s16 + $0x1b0] sm:$0xff]   ;;  %v10008_v23 = vld [vmem:[%s12227_s16 + $0x1c0] sm:$0xff]  }
 0x8ae   : > { %v6950_v61 = vpop.permute.xlu0 %6949 }
 0x8af   : > { %9739 = vmatprep.subr.bf16.mxu0 %v6950_v61 }
 0x8b0   : > { %v7156_v26 = vpop.permute.xlu1 %7155 }
 0x8b1   : > { %9740 = vmatpush3.bf16.msra.mxu0 %v6950_v61  ;;  %v10010_v61 = vld [vmem:[%s12227_s16 + $0x1c8] sm:$0xff]  }
 0x8b2   : > { %v7368_v58 = vpop.permute.xlu0 %7367 }
 0x8b3   : > { %9682 = vmatmul.mubr.msk.bf16.gmra.mxu1 %vm6132_vm12, %v9973_v37  ;;  %9702 = vmatmul.mubr.msk.bf16.gmra.mxu0 %vm6132_vm12, %v9974_v27  ;;  %v10011_v37 = vld [vmem:[%s12227_s16 + $0x1d0] sm:$0xff]   ;;  %v10012_v27 = vld [vmem:[%s12227_s16 + $0x1d8] sm:$0xff]  }
 0x8b4   : > { %9781 = vmatprep.subr.bf16.mxu0 %v7368_v58  ;;  %v11715_v2 = vpop.permute.xlu1 %7573  ;;  %9705 = vmatprep.mubr.msk.bf16.mxu0 %vm6132_vm12, %v9975_v45  ;;  %v10014_v45 = vld [vmem:[%s12227_s16 + $0x1e8] sm:$0xff]  }
 0x8b5   : > { %9717 = vmatprep.mubr.msk.bf16.mxu1 %vm6132_vm12, %v9976_v62  ;;  %v10015_v62 = vld [vmem:[%s12227_s16 + $0x1f0] sm:$0xff]  }
 0x8b6   : > { %v7366_v25 = vpop.permute.xlu0 %7365 }
 0x8b8   : > { %v11725_v12 = vpop.permute.xlu1 %7571 }
 0x8ba   : > { %v7364_v50 = vpop.permute.xlu0 %7363 }
 0x8bb   : > { %9706 = vmatmul.mubr.msk.bf16.gmra.mxu0 %vm6132_vm12, %v9977_v18  ;;  %9718 = vmatmul.mubr.msk.bf16.vlgmr.msra.gmra.mxu1 %vm6132_vm12, %v9978_v8 }
 0x8bc   : > { %9758 = vmatpush3.bf16.msra.mxu1 %v7162_v24  ;;  %v11735_v13 = vpop.permute.xlu1 %7569  ;;  %9721 = vmatprep.mubr.msk.bf16.mxu1 %vm6132_vm12, %v9979_v7  ;;  %v10002_v24 = vld [vmem:[%s12227_s16 + $0x198] sm:$0xff]  }
 0x8bd   : > { %9759 = vmatprep.subr.bf16.mxu1 %v7160_v56  ;;  %9741 = vmatprep.mubr.msk.bf16.mxu0 %vm6132_vm12, %v9980_v1 }
 0x8be   : > { %v7362_v6 = vpop.permute.xlu0 %7361 }
 0x8c0   : > { %9760 = vmatpush3.bf16.msra.mxu1 %v7160_v56  ;;  %v11745_v29 = vpop.permute.xlu1 %7567  ;;  %v10005_v56 = vld [vmem:[%s12227_s16 + $0x178] sm:$0xff]  }
 0x8c1   : > { %9761 = vmatprep.subr.bf16.mxu1 %v7158_v31 }
 0x8c2   : > { %v3465_v3 = vpop.permute.xlu0 %3464 }
 0x8c3   : > { %3489 = vst.msk [vmem:[%s11089_s3] sm:$0xff] %vm3488_vm13, %v3465_v3  ;;  %9722 = vmatmul.mubr.msk.bf16.gmra.mxu1 %vm6132_vm12, %v9981_v49  ;;  %9742 = vmatmul.mubr.msk.bf16.vlgmr.msra.gmra.mxu0 %vm6132_vm12, %v9982_v20  ;;  %v6058_v3 = vld [vmem:[%s12228_s17 + $0x10] sm:$0xff] }
 0x8c4   : > { %9762 = vmatpush3.bf16.msra.mxu1 %v7158_v31  ;;  %9782 = vmatpush3.bf16.msra.mxu0 %v7368_v58  ;;  %v3467_v63 = vpop.permute.xlu1 %3466  ;;  %v10009_v31 = vld [vmem:[%s12227_s16 + $0x1b8] sm:$0xff]  }
 0x8c5   : > { %9763 = vmatprep.subr.bf16.mxu1 %v7156_v26  ;;  %3490 = vst.msk [vmem:[%s11089_s3 + $0x10] sm:$0xff] %vm3488_vm13, %v3467_v63  ;;  %9783 = vmatprep.subr.bf16.mxu0 %v7366_v25  ;;  %v10016_v58 = vld [vmem:[%s12227_s16 + $0x1f8] sm:$0xff]   ;;  %v6056_v63 = vld [vmem:[%s12228_s17] sm:$0xff] }
 0x8c6   : > { %v3469_v40 = vpop.permute.xlu0 %3468  ;;  %9725 = vmatprep.mubr.msk.bf16.mxu1 %vm6132_vm12, %v9983_v47  ;;  %9745 = vmatprep.mubr.msk.bf16.mxu0 %vm6132_vm12, %v9984_v35 }
 0x8c7   : > { %3491 = vst.msk [vmem:[%s11089_s3 + $0x20] sm:$0xff] %vm3488_vm13, %v3469_v40  ;;  %v6059_v40 = vld [vmem:[%s12228_s17 + $0x18] sm:$0xff] }
 0x8c8   : > { %9764 = vmatpush3.bf16.msra.mxu1 %v7156_v26  ;;  %9784 = vmatpush3.bf16.msra.mxu0 %v7366_v25  ;;  %v3471_v59 = vpop.permute.xlu1 %3470  ;;  %v10013_v26 = vld [vmem:[%s12227_s16 + $0x1e0] sm:$0xff]  }
 0x8c9   : > { %9805 = vmatprep.subr.bf16.mxu1 %v11715_v2  ;;  %3492 = vst.msk [vmem:[%s11089_s3 + $0x30] sm:$0xff] %vm3488_vm13, %v3471_v59  ;;  %9785 = vmatprep.subr.bf16.mxu0 %v7364_v50 }
 0x8ca   : > { %v3473_v57 = vpop.permute.xlu0 %3472 }
 0x8cb   : > { %3493 = vst.msk [vmem:[%s11089_s3 + $0x40] sm:$0xff] %vm3488_vm13, %v3473_v57  ;;  %9726 = vmatmul.mubr.msk.bf16.gmra.mxu1 %vm6132_vm12, %v9985_v38  ;;  %9746 = vmatmul.mubr.msk.bf16.gmra.mxu0 %vm6132_vm12, %v9986_v28  ;;  %v6062_v57 = vld [vmem:[%s12228_s17 + $0x30] sm:$0xff] }
 0x8cc   : > { %9786 = vmatpush3.bf16.msra.mxu0 %v7364_v50  ;;  %v3475_v54 = vpop.permute.xlu1 %3474  ;;  %9729 = vmatprep.mubr.msk.bf16.mxu1 %vm6132_vm12, %v9987_v33 }
 0x8cd   : > { %3494 = vst.msk [vmem:[%s11089_s3 + $0x50] sm:$0xff] %vm3488_vm13, %v3475_v54  ;;  %9787 = vmatprep.subr.bf16.mxu0 %v7362_v6  ;;  %9749 = vmatprep.mubr.msk.bf16.mxu0 %vm6132_vm12, %v9988_v19  ;;  %v6057_v19 = vld [vmem:[%s12228_s17 + $0x8] sm:$0xff] }
 0x8ce   : > { %v3477_v43 = vpop.permute.xlu0 %3476 }
 0x8cf   : > { %3495 = vst.msk [vmem:[%s11089_s3 + $0x60] sm:$0xff] %vm3488_vm13, %v3477_v43 }
 0x8d0   : > { %9788 = vmatpush3.bf16.msra.mxu0 %v7362_v6  ;;  %v3479_v55 = vpop.permute.xlu1 %3478 }
 0x8d1   : > { %3496 = vst.msk [vmem:[%s11089_s3 + $0x70] sm:$0xff] %vm3488_vm13, %v3479_v55 }
 0x8d2   : > { %v4055_v48 = vpop.permute.xlu0 %4054 }
 0x8d3   : > { %8388 = vst.msk [vmem:[%s11089_s3 + $0x8] sm:$0xff] %vm3488_vm13, %v4055_v48  ;;  %9730 = vmatmul.mubr.msk.bf16.gmra.mxu1 %vm6132_vm12, %v9989_v5  ;;  %9750 = vmatmul.mubr.msk.bf16.gmra.mxu0 %vm6132_vm12, %v9990_v36 }
 0x8d4   : > { %v4057_v32 = vpop.permute.xlu1 %4056  ;;  %9753 = vmatprep.mubr.msk.bf16.mxu0 %vm6132_vm12, %v9991_v46  ;;  %9765 = vmatprep.mubr.msk.bf16.mxu1 %vm6132_vm12, %v9992_v51 }
 0x8d5   : > { %8389 = vst.msk [vmem:[%s11089_s3 + $0x18] sm:$0xff] %vm3488_vm13, %v4057_v32  ;;  %v6060_v32 = vld [vmem:[%s12228_s17 + $0x20] sm:$0xff] }
 0x8d6   : > { %v4059_v41 = vpop.permute.xlu0 %4058 }
 0x8d7   : > { %8390 = vst.msk [vmem:[%s11089_s3 + $0x28] sm:$0xff] %vm3488_vm13, %v4059_v41 }
 0x8d8   : > { %v4061_v0 = vpop.permute.xlu1 %4060 }
 0x8d9   : > { %8391 = vst.msk [vmem:[%s11089_s3 + $0x38] sm:$0xff] %vm3488_vm13, %v4061_v0 }
 0x8da   : > { %v4063_v52 = vpop.permute.xlu0 %4062 }
 0x8db   : > { %8392 = vst.msk [vmem:[%s11089_s3 + $0x48] sm:$0xff] %vm3488_vm13, %v4063_v52  ;;  %9754 = vmatmul.mubr.msk.bf16.gmra.mxu0 %vm6132_vm12, %v9993_v11  ;;  %9766 = vmatmul.mubr.msk.bf16.vlgmr.msra.gmra.mxu1 %vm6132_vm12, %v9994_v44  ;;  %v6063_v44 = vld [vmem:[%s12228_s17 + $0x38] sm:$0xff] }
 0x8dc   : > { %9806 = vmatpush3.bf16.msra.mxu1 %v11715_v2  ;;  %v4065_v14 = vpop.permute.xlu1 %4064  ;;  %9769 = vmatprep.mubr.msk.bf16.mxu1 %vm6132_vm12, %v9995_v42 }
 0x8dd   : > { %9807 = vmatprep.subr.bf16.mxu1 %v11725_v12  ;;  %8393 = vst.msk [vmem:[%s11089_s3 + $0x58] sm:$0xff] %vm3488_vm13, %v4065_v14  ;;  %9789 = vmatprep.mubr.msk.bf16.mxu0 %vm6132_vm12, %v9996_v60 }
 0x8de   : > { %v4067_v21 = vpop.permute.xlu0 %4066 }
 0x8df   : > { %8394 = vst.msk [vmem:[%s11089_s3 + $0x68] sm:$0xff] %vm3488_vm13, %v4067_v21  ;;  %v6061_v21 = vld [vmem:[%s12228_s17 + $0x28] sm:$0xff] }
 0x8e0   : > { %9808 = vmatpush3.bf16.msra.mxu1 %v11725_v12  ;;  %v4069_v16 = vpop.permute.xlu1 %4068 }
 0x8e1   : > { %9809 = vmatprep.subr.bf16.mxu1 %v11735_v13  ;;  %8395 = vst.msk [vmem:[%s11089_s3 + $0x78] sm:$0xff] %vm3488_vm13, %v4069_v16  ;;  %s743_s3 = scalar_lea.vmem %s12235_s24, %s10345_s25 }
 0x8e3   : > { %9770 = vmatmul.mubr.msk.bf16.gmra.mxu1 %vm6132_vm12, %v9997_v39  ;;  %9790 = vmatmul.mubr.msk.bf16.vlgmr.msra.gmra.mxu0 %vm6132_vm12, %v9998_v53  ;;  %v6066_v39 = vld [vmem:[%s12228_s17 + $0x50] sm:$0xff] }
 0x8e4   : > { %9810 = vmatpush3.bf16.msra.mxu1 %v11735_v13  ;;  %9773 = vmatprep.mubr.msk.bf16.mxu1 %vm6132_vm12, %v9999_v10 }
 0x8e5   : > { %9811 = vmatprep.subr.bf16.mxu1 %v11745_v29  ;;  %9793 = vmatprep.mubr.msk.bf16.mxu0 %vm6132_vm12, %v10000_v15 }
 0x8e8   : > { %9812 = vmatpush3.bf16.msra.mxu1 %v11745_v29  ;;  %v9647_v2 = vpop.f32.mrf.mxu0 }
 0x8e9   : > { %9861 = vmatprep.subr.bf16.mxu1 %v12431_v4  ;;  %v6256_v35 = vadd.f32 %v9647_v2, %v6058_v3 }
 0x8ea   : > { %v6191_v25 = vpop.f32.mrf.mxu0 }
 0x8eb   : > { %9774 = vmatmul.mubr.msk.bf16.gmra.mxu1 %vm6132_vm12, %v10001_v9  ;;  %9794 = vmatmul.mubr.msk.bf16.gmra.mxu0 %vm6132_vm12, %v10002_v24  ;;  %v6254_v59 = vadd.f32 %v6191_v25, %v6056_v63 }
 0x8ec   : > { %9777 = vmatprep.mubr.msk.bf16.mxu1 %vm6132_vm12, %v10003_v17  ;;  %9797 = vmatprep.mubr.msk.bf16.mxu0 %vm6132_vm12, %v10004_v22  ;;  %v9648_v18 = vpop.f32.mrf.mxu0 }
 0x8ed   : > { %v6257_v43 = vadd.f32 %v9648_v18, %v6059_v40  ;;  %v6065_v18 = vld [vmem:[%s12228_s17 + $0x48] sm:$0xff] }
 0x8ee   : > { %v6194_v8 = vpop.f32.mrf.mxu0 }
 0x8ef   : > { %v6255_v46 = vadd.f32 %v6194_v8, %v6057_v19  ;;  %v6070_v8 = vld [vmem:[%s12228_s17 + $0x70] sm:$0xff] }
 0x8f0   : > { %v9651_v12 = vpop.f32.mrf.mxu0 }
 0x8f1   : > { %v6260_v51 = vadd.f32 %v9651_v12, %v6062_v57 }
 0x8f2   : > { %v6207_v7 = vpop.f32.mrf.mxu0 }
 0x8f3   : > { %9778 = vmatmul.mubr.msk.bf16.gmra.mxu1 %vm6132_vm12, %v10005_v56  ;;  %9798 = vmatmul.mubr.msk.bf16.gmra.mxu0 %vm6132_vm12, %v10006_v30  ;;  %v6258_v60 = vadd.f32 %v6207_v7, %v6060_v32 }
 0x8f4   : > { %9801 = vmatprep.mubr.msk.bf16.mxu0 %vm6132_vm12, %v10007_v34  ;;  %9813 = vmatprep.mubr.msk.bf16.mxu1 %vm6132_vm12, %v10008_v23  ;;  %v9652_v1 = vpop.f32.mrf.mxu0  ;;  %v6064_v23 = vld [vmem:[%s12228_s17 + $0x40] sm:$0xff] }
 0x8f5   : > { %v6261_v10 = vadd.f32 %v9652_v1, %v6063_v44 }
 0x8f6   : > { %v6210_v50 = vpop.f32.mrf.mxu0 }
 0x8f7   : > { %v6259_v22 = vadd.f32 %v6210_v50, %v6061_v21 }
 0x8f8   : > { %v9655_v13 = vpop.f32.mrf.mxu0 }
 0x8f9   : > { %v6264_v56 = vadd.f32 %v9655_v13, %v6066_v39 }
 0x8fa   : > { %v6223_v6 = vpop.f32.mrf.mxu0 }
 0x8fb   : > { %9802 = vmatmul.mubr.msk.bf16.gmra.mxu0 %vm6132_vm12, %v10009_v31  ;;  %9814 = vmatmul.mubr.msk.bf16.vlgmr.msra.gmra.mxu1 %vm6132_vm12, %v10010_v61 }
 0x8fc   : > { %9817 = vmatprep.mubr.msk.bf16.mxu1 %vm6132_vm12, %v10011_v37  ;;  %v9656_v49 = vpop.f32.mrf.mxu0 }
 0x8fe   : > { %v11928_v20 = vpop.f32.mrf.mxu0 }
 0x8ff   : > { %v6263_v63 = vadd.f32 %v11928_v20, %v6065_v18 }
 0x900   : > { %v11930_v29 = vpop.f32.mrf.mxu0 }
 0x902   : > { %v11935_v47 = vpop.f32.mrf.mxu0 }
 0x903   : > { %9818 = vmatmul.mubr.msk.bf16.gmra.mxu1 %vm6132_vm12, %v10012_v27 }
 0x904   : > { %9821 = vmatprep.mubr.msk.bf16.mxu1 %vm6132_vm12, %v10013_v26  ;;  %v11943_v28 = vpop.f32.mrf.mxu0  ;;  %v6067_v26 = vld [vmem:[%s12228_s17 + $0x58] sm:$0xff] }
 0x905   : > { %v6265_v1 = vadd.f32 %v9656_v49, %v6067_v26  ;;  %v6071_v49 = vld [vmem:[%s12228_s17 + $0x78] sm:$0xff] }
 0x906   : > { %v11951_v55 = vpop.f32.mrf.mxu0 }
 0x90b   : > { %9822 = vmatmul.mubr.msk.bf16.gmra.mxu1 %vm6132_vm12, %v10014_v45 }
 0x90c   : > { %9825 = vmatprep.mubr.msk.bf16.mxu1 %vm6132_vm12, %v10015_v62 }
 0x913   : > { %9826 = vmatmul.mubr.msk.bf16.gmra.mxu1 %vm6132_vm12, %v10016_v58  ;;  %v6262_v58 = vadd.f32 %v6223_v6, %v6064_v23  ;;  %v6268_v6 = vadd.f32 %v11930_v29, %v6070_v8 }
 0x914   : > { %9877 = vmatprep.mubr.msk.bf16.mxu1 %vm10190_vm5, %v12431_v4 }
 0x95b   : > { %v9671_v38 = vpop.f32.mrf.mxu1 }
 0x95c   : > { %v6466_v33 = vadd.f32 %v9671_v38, %v6256_v35 }
 0x95d   : > { %v6401_v54 = vpop.f32.mrf.mxu1 }
 0x95e   : > { %v6464_v5 = vadd.f32 %v6401_v54, %v6254_v59  ;;  %v6068_v59 = vld [vmem:[%s12228_s17 + $0x60] sm:$0xff] }
 0x95f   : > { %v9672_v36 = vpop.f32.mrf.mxu1  ;;  %v6266_v20 = vadd.f32 %v11935_v47, %v6068_v59 }
 0x960   : > { %v6467_v48 = vadd.f32 %v9672_v36, %v6257_v43 }
 0x961   : > { %v6404_v41 = vpop.f32.mrf.mxu1 }
 0x962   : > { %v6465_v11 = vadd.f32 %v6404_v41, %v6255_v46 }
 0x963   : > { %v9675_v0 = vpop.f32.mrf.mxu1  ;;  %v9695_v42 = vpop.f32.mrf.mxu0 }
 0x964   : > { %v6470_v52 = vadd.f32 %v9675_v0, %v6260_v51  ;;  %v11959_v14 = vadd.f32 %v9695_v42, %v6466_v33 }
 0x965   : > { %v6417_v53 = vpop.f32.mrf.mxu1  ;;  %v6607_v16 = vpop.f32.mrf.mxu0 }
 0x966   : > { %v6468_v15 = vadd.f32 %v6417_v53, %v6258_v60  ;;  %v6670_v9 = vadd.f32 %v6607_v16, %v6464_v5  ;;  %v10017_v53 = vld [vmem:[%s12229_s18] sm:$0xff]  }
 0x967   : > { %v9676_v24 = vpop.f32.mrf.mxu1  ;;  %v9696_v17 = vpop.f32.mrf.mxu0  ;;  %9845 = vmatprep.mubr.bf16.mxu0 %v10017_v53 }
 0x968   : > { %v6471_v30 = vadd.f32 %v9676_v24, %v6261_v10  ;;  %v6673_v34 = vadd.f32 %v9696_v17, %v6467_v48  ;;  %v6269_v48 = vadd.f32 %v11943_v28, %v6071_v49 }
 0x969   : > { %v6420_v31 = vpop.f32.mrf.mxu1  ;;  %v6610_v61 = vpop.f32.mrf.mxu0 }
 0x96a   : > { %v6469_v37 = vadd.f32 %v6420_v31, %v6259_v22  ;;  %v6671_v27 = vadd.f32 %v6610_v61, %v6465_v11 }
 0x96b   : > { %v9679_v45 = vpop.f32.mrf.mxu1  ;;  %v9699_v62 = vpop.f32.mrf.mxu0 }
 0x96c   : > { %v6474_v2 = vadd.f32 %v9679_v45, %v6264_v56  ;;  %v6676_v25 = vadd.f32 %v9699_v62, %v6470_v52 }
 0x96d   : > { %v6433_v12 = vpop.f32.mrf.mxu1  ;;  %v6623_v7 = vpop.f32.mrf.mxu0 }
 0x96e   : > { %v6472_v50 = vadd.f32 %v6433_v12, %v6262_v58  ;;  %v6674_v13 = vadd.f32 %v6623_v7, %v6468_v15 }
 0x96f   : > { %v9680_v3 = vpop.f32.mrf.mxu1  ;;  %v9700_v35 = vpop.f32.mrf.mxu0 }
 0x970   : > { %v6475_v40 = vadd.f32 %v9680_v3, %v6265_v1  ;;  %v6677_v38 = vadd.f32 %v9700_v35, %v6471_v30 }
 0x971   : > { %v6436_v33 = vpop.f32.mrf.mxu1  ;;  %v6626_v19 = vpop.f32.mrf.mxu0 }
 0x972   : > { %v6473_v57 = vadd.f32 %v6436_v33, %v6263_v63  ;;  %v6675_v54 = vadd.f32 %v6626_v19, %v6469_v37 }
 0x973   : > { %v9683_v43 = vpop.f32.mrf.mxu1  ;;  %v9703_v5 = vpop.f32.mrf.mxu0 }
 0x974   : > { %v11988_v36 = vadd.f32 %v9683_v43, %v6268_v6  ;;  %v6680_v29 = vadd.f32 %v9703_v5, %v6474_v2 }
 0x975   : > { %v6449_v46 = vpop.f32.mrf.mxu1  ;;  %v6639_v51 = vpop.f32.mrf.mxu0 }
 0x976   : > { %v11991_v32 = vadd.f32 %v6449_v46, %v6266_v20  ;;  %v6678_v41 = vadd.f32 %v6639_v51, %v6472_v50 }
 0x977   : > { %v9684_v11 = vpop.f32.mrf.mxu1  ;;  %v9704_v44 = vpop.f32.mrf.mxu0 }
 0x978   : > { %v11993_v0 = vadd.f32 %v9684_v11, %v6269_v48  ;;  %v6681_v42 = vadd.f32 %v9704_v44, %v6475_v40 }
 0x979   : > { %v11995_v60 = vpop.f32.mrf.mxu1  ;;  %v6642_v52 = vpop.f32.mrf.mxu0 }
 0x97a   : > { %v6679_v21 = vadd.f32 %v6642_v52, %v6473_v57 }
 0x97b   : > { %v11997_v47 = vpop.f32.mrf.mxu0  ;;  %v9719_v39 = vpop.f32.mrf.mxu1 }
 0x97c   : > { %v6878_v28 = vadd.f32 %v9719_v39, %v11959_v14 }
 0x97d   : > { %v12003_v16 = vpop.f32.mrf.mxu0  ;;  %v6813_v10 = vpop.f32.mrf.mxu1 }
 0x97e   : > { %v6876_v15 = vadd.f32 %v6813_v10, %v6670_v9 }
 0x97f   : > { %v12005_v24 = vpop.f32.mrf.mxu0  ;;  %v9720_v17 = vpop.f32.mrf.mxu1 }
 0x980   : > { %v6879_v22 = vadd.f32 %v9720_v17, %v6673_v34 }
 0x981   : > { %v12007_v56 = vpop.f32.mrf.mxu0  ;;  %v6816_v30 = vpop.f32.mrf.mxu1 }
 0x982   : > { %v6877_v23 = vadd.f32 %v6816_v30, %v6671_v27 }
 0x983   : > { %v9723_v31 = vpop.f32.mrf.mxu1  ;;  %v9743_v61 = vpop.f32.mrf.mxu0 }
 0x984   : > { %v12009_v37 = vadd.f32 %v9723_v31, %v6676_v25  ;;  %v7084_v26 = vadd.f32 %v9743_v61, %v6878_v28 }
 0x985   : > { %v6829_v45 = vpop.f32.mrf.mxu1  ;;  %v7019_v14 = vpop.f32.mrf.mxu0 }
 0x986   : > { %v6880_v62 = vadd.f32 %v6829_v45, %v6674_v13  ;;  %v7082_v58 = vadd.f32 %v7019_v14, %v6876_v15 }
 0x987   : > { %v9724_v2 = vpop.f32.mrf.mxu1  ;;  %v9744_v18 = vpop.f32.mrf.mxu0 }
 0x988   : > { %v12011_v9 = vadd.f32 %v9724_v2, %v6677_v38  ;;  %v7085_v8 = vadd.f32 %v9744_v18, %v6879_v22 }
 0x989   : > { %v6832_v12 = vpop.f32.mrf.mxu1  ;;  %v7022_v34 = vpop.f32.mrf.mxu0 }
 0x98a   : > { %v12013_v7 = vadd.f32 %v6832_v12, %v6675_v54  ;;  %v7083_v1 = vadd.f32 %v7022_v34, %v6877_v23 }
 0x98b   : > { %v9727_v27 = vpop.f32.mrf.mxu1  ;;  %v9747_v50 = vpop.f32.mrf.mxu0 }
 0x98c   : > { %v12015_v3 = vadd.f32 %v9727_v27, %v6680_v29 }
 0x98d   : > { %v6845_v25 = vpop.f32.mrf.mxu1  ;;  %v7035_v35 = vpop.f32.mrf.mxu0 }
 0x98e   : > { %v12017_v63 = vadd.f32 %v6845_v25, %v6678_v41  ;;  %v7086_v13 = vadd.f32 %v7035_v35, %v6880_v62 }
 0x98f   : > { %v9728_v6 = vpop.f32.mrf.mxu1  ;;  %v9748_v40 = vpop.f32.mrf.mxu0 }
 0x990   : > { %v12019_v59 = vadd.f32 %v9728_v6, %v6681_v42 }
 0x991   : > { %v6848_v38 = vpop.f32.mrf.mxu1  ;;  %v12021_v33 = vpop.f32.mrf.mxu0 }
 0x992   : > { %v12023_v19 = vadd.f32 %v6848_v38, %v6679_v21 }
 0x993   : > { %v12025_v57 = vpop.f32.mrf.mxu1  ;;  %v12027_v54 = vpop.f32.mrf.mxu0 }
 0x995   : > { %v12029_v49 = vpop.f32.mrf.mxu1  ;;  %v12031_v43 = vpop.f32.mrf.mxu0 }
 0x996   : > { %12432 = vst [vmem:[#allocation23_spill] sm:$0xff] %v12029_v49 }
 0x997   : > { %v12033_v5 = vpop.f32.mrf.mxu1  ;;  %v12035_v20 = vpop.f32.mrf.mxu0 }
 0x998   : > { %12433 = vst [vmem:[#allocation27_spill] sm:$0xff] %v12033_v5 }
 0x999   : > { %v12037_v29 = vpop.f32.mrf.mxu1  ;;  %v12039_v46 = vpop.f32.mrf.mxu0 }
 0x99a   : > { %12434 = vst [vmem:[#allocation28_spill] sm:$0xff] %v12037_v29 }
 0x99b   : > { %v12041_v51 = vpop.f32.mrf.mxu0  ;;  %v9767_v48 = vpop.f32.mrf.mxu1 }
 0x99c   : > { %12435 = vst [vmem:[#allocation29_spill] sm:$0xff] %v12041_v51  ;;  %v7290_v41 = vadd.f32 %v9767_v48, %v7084_v26 }
 0x99d   : > { %v12043_v11 = vpop.f32.mrf.mxu0  ;;  %v7225_v44 = vpop.f32.mrf.mxu1 }
 0x99e   : > { %12436 = vst [vmem:[#allocation32_spill] sm:$0xff] %v12043_v11  ;;  %v7288_v42 = vadd.f32 %v7225_v44, %v7082_v58 }
 0x99f   : > { %v12045_v52 = vpop.f32.mrf.mxu0  ;;  %v9768_v21 = vpop.f32.mrf.mxu1 }
 0x9a0   : > { %12437 = vst [vmem:[#allocation33_spill] sm:$0xff] %v12045_v52  ;;  %v7291_v39 = vadd.f32 %v9768_v21, %v7085_v8 }
 0x9a1   : > { %v12047_v53 = vpop.f32.mrf.mxu0  ;;  %v7228_v28 = vpop.f32.mrf.mxu1 }
 0x9a2   : > { %12438 = vst [vmem:[#allocation26_spill] sm:$0xff] %v12047_v53  ;;  %v7289_v10 = vadd.f32 %v7228_v28, %v7083_v1  ;;  %v7088_v53 = vadd.f32 %v9747_v50, %v12009_v37  ;;  %v6069_v37 = vld [vmem:[%s12228_s17 + $0x68] sm:$0xff] }
 0x9a3   : > { %v9771_v15 = vpop.f32.mrf.mxu1  ;;  %v9791_v17 = vpop.f32.mrf.mxu0 }
 0x9a4   : > { %v7496_v38 = vadd.f32 %v9791_v17, %v7290_v41  ;;  %v7294_v51 = vadd.f32 %v9771_v15, %v7088_v53  ;;  %v7087_v41 = vadd.f32 %v12021_v33, %v12013_v7  ;;  %v6267_v7 = vadd.f32 %v11951_v55, %v6069_v37 }
 0x9a5   : > { %v7241_v22 = vpop.f32.mrf.mxu1  ;;  %v7431_v30 = vpop.f32.mrf.mxu0 }
 0x9a6   : > { %v7292_v23 = vadd.f32 %v7241_v22, %v7086_v13  ;;  %v7494_v21 = vadd.f32 %v7431_v30, %v7288_v42 }
 0x9a7   : > { %v9772_v31 = vpop.f32.mrf.mxu1  ;;  %v9792_v61 = vpop.f32.mrf.mxu0 }
 0x9a8   : > { %v7497_v28 = vadd.f32 %v9792_v61, %v7291_v39 }
 0x9a9   : > { %v7244_v26 = vpop.f32.mrf.mxu1  ;;  %v7434_v45 = vpop.f32.mrf.mxu0 }
 0x9aa   : > { %v7495_v52 = vadd.f32 %v7434_v45, %v7289_v10 }
 0x9ab   : > { %v9775_v14 = vpop.f32.mrf.mxu1  ;;  %v9795_v62 = vpop.f32.mrf.mxu0 }
 0x9ac   : > { %v7500_v50 = vadd.f32 %v9795_v62, %v7294_v51 }
 0x9ad   : > { %v7257_v58 = vpop.f32.mrf.mxu1  ;;  %v7447_v2 = vpop.f32.mrf.mxu0 }
 0x9ae   : > { %v7498_v15 = vadd.f32 %v7447_v2, %v7292_v23  ;;  %v7093_v23 = vadd.f32 %v12035_v20, %v12019_v59  ;;  %v6682_v20 = vadd.f32 %v12003_v16, %v11991_v32  ;;  %v12445_v16 = vld [vmem:[#allocation29_spill] sm:$0xff] }
 0x9af   : > { %v9776_v18 = vpop.f32.mrf.mxu1  ;;  %v9796_v12 = vpop.f32.mrf.mxu0 }
 0x9b1   : > { %v12049_v8 = vpop.f32.mrf.mxu1  ;;  %v7450_v1 = vpop.f32.mrf.mxu0 }
 0x9b3   : > { %v12051_v34 = vpop.f32.mrf.mxu1  ;;  %v9799_v35 = vpop.f32.mrf.mxu0 }
 0x9b4   : > { %12439 = vst [vmem:[#allocation34_spill] sm:$0xff] %v12051_v34 }
 0x9b5   : > { %v12053_v27 = vpop.f32.mrf.mxu1  ;;  %v7463_v48 = vpop.f32.mrf.mxu0 }
 0x9b6   : > { %12440 = vst [vmem:[#allocation30_spill] sm:$0xff] %v12053_v27  ;;  %v7089_v27 = vadd.f32 %v9748_v40, %v12011_v9  ;;  %v7293_v40 = vadd.f32 %v7244_v26, %v7087_v41  ;;  %v12446_v41 = vld [vmem:[#allocation28_spill] sm:$0xff] }
 0x9b7   : > { %v12055_v25 = vpop.f32.mrf.mxu1  ;;  %v9800_v29 = vpop.f32.mrf.mxu0 }
 0x9b8   : > { %12441 = vst [vmem:[#allocation10_spill] sm:$0xff] %v12055_v25  ;;  %v7295_v42 = vadd.f32 %v9772_v31, %v7089_v27  ;;  %v7092_v31 = vadd.f32 %v12027_v54, %v12015_v3  ;;  %v7499_v61 = vadd.f32 %v7450_v1, %v7293_v40  ;;  %v6684_v3 = vadd.f32 %v11997_v47, %v11988_v36 }
 0x9b9   : > { %v12057_v13 = vpop.f32.mrf.mxu1  ;;  %v7466_v17 = vpop.f32.mrf.mxu0  ;;  %v7091_v54 = vadd.f32 %v12039_v46, %v12023_v19 }
 0x9ba   : > { %12442 = vst [vmem:[#allocation31_spill] sm:$0xff] %v12057_v13  ;;  %v7298_v2 = vadd.f32 %v9775_v14, %v7092_v31  ;;  %v6685_v14 = vadd.f32 %v12005_v24, %v11993_v0 }
 0x9bb   : > { %v9815_v6 = vpop.f32.mrf.mxu1  ;;  %v9803_v26 = vpop.f32.mrf.mxu0  ;;  %v7297_v36 = vadd.f32 %v12049_v8, %v7091_v54 }
 0x9bc   : > { %v7702_v22 = vadd.f32 %v9815_v6, %v7496_v38  ;;  %v12443_v38 = vld [vmem:[#allocation23_spill] sm:$0xff] }
 0x9bd   : > { %v7637_v44 = vpop.f32.mrf.mxu1  ;;  %v7479_v47 = vpop.f32.mrf.mxu0  ;;  %v7503_v0 = vadd.f32 %v7466_v17, %v7297_v36 }
 0x9be   : > { %v7700_v34 = vadd.f32 %v7637_v44, %v7494_v21  ;;  %v7718_v5 = vmax.f32 %v7702_v22, 0.0  ;;  %v6888_v44 = vadd.f32 %v12443_v38, %v6682_v20  ;;  %v12444_v21 = vld [vmem:[#allocation27_spill] sm:$0xff] }
 0x9bf   : > { %v9816_v4 = vpop.f32.mrf.mxu1  ;;  %v9804_v37 = vpop.f32.mrf.mxu0  ;;  %v12452_v17 = vld [vmem:[#allocation10_spill] sm:$0xff] }
 0x9c0   : > { %v7703_v11 = vadd.f32 %v9816_v4, %v7497_v28  ;;  %v7716_v10 = vmax.f32 %v7700_v34, 0.0  ;;  %v6891_v28 = vadd.f32 %v12444_v21, %v6685_v14 }
 0x9c1   : > { %v7640_v25 = vpop.f32.mrf.mxu1 }
 0x9c2   : > { %v7719_v13 = vmax.f32 %v7703_v11, 0.0  ;;  %v7701_v49 = vadd.f32 %v7640_v25, %v7495_v52  ;;  %v7501_v11 = vadd.f32 %v9796_v12, %v7295_v42  ;;  %v7504_v25 = vadd.f32 %v9799_v35, %v7298_v2  ;;  %v12447_v42 = vld [vmem:[#allocation32_spill] sm:$0xff] }
 0x9c3   : > { %v9819_v39 = vpop.f32.mrf.mxu1 }
 0x9c4   : > { %v12066_v4 = vpack.c.bf16 %v7719_v13, %v7718_v5  ;;  %v7717_v9 = vmax.f32 %v7701_v49, 0.0  ;;  %v7706_v30 = vadd.f32 %v9819_v39, %v7500_v50  ;;  %v6477_v5 = vadd.f32 %v11995_v60, %v6267_v7 }
 0x9c5   : > { %v7653_v53 = vpop.f32.mrf.mxu1  ;;  %v7090_v49 = vadd.f32 %v12031_v43, %v12017_v63  ;;  %v7299_v60 = vadd.f32 %v9776_v18, %v7093_v23  ;;  %v6890_v13 = vadd.f32 %v12025_v57, %v6684_v3  ;;  %v7094_v39 = vadd.f32 %v12447_v42, %v6888_v44  ;;  %v7771_v42 = vld [vmem:[%s12454_s9 + $0x78] sm:$0xff] }
 0x9c6   : > { %v12068_v52 = vpack.c.bf16 %v7717_v9, %v7716_v10  ;;  %v7704_v51 = vadd.f32 %v7653_v53, %v7498_v15  ;;  %v7722_v12 = vmax.f32 %v7706_v30, 0.0  ;;  %v6683_v6 = vadd.f32 %v12007_v56, %v6477_v5  ;;  %v12449_v10 = vld [vmem:[#allocation34_spill] sm:$0xff] }
 0x9c7   : > { %v9820_v33 = vpop.f32.mrf.mxu1  ;;  %v7296_v1 = vadd.f32 %v7257_v58, %v7090_v49  ;;  %v7505_v58 = vadd.f32 %v9800_v29, %v7299_v60  ;;  %v7096_v22 = vadd.f32 %v12445_v16, %v6890_v13  ;;  %v12450_v15 = vld [vmem:[#allocation26_spill] sm:$0xff]  ;;  %v12453_v49 = vld [vmem:[#allocation31_spill] sm:$0xff] }
 0x9c8   : > { %v7707_v45 = vadd.f32 %v9820_v33, %v7501_v11  ;;  %v7720_v63 = vmax.f32 %v7704_v51, 0.0  ;;  %v6889_v8 = vadd.f32 %v12446_v41, %v6683_v6  ;;  %v12451_v30 = vld [vmem:[#allocation30_spill] sm:$0xff] }
 0x9c9   : > { %v7656_v62 = vpop.f32.mrf.mxu1  ;;  %v7502_v46 = vadd.f32 %v7463_v48, %v7296_v1  ;;  %v12448_v48 = vld [vmem:[#allocation33_spill] sm:$0xff]  ;;  %v7302_v56 = vadd.f32 %v12449_v10, %v7096_v22  ;;  %v7300_v7 = vadd.f32 %v12451_v30, %v7094_v39  ;;  %v7767_v10 = vld [vmem:[%s12454_s9 + $0x58] sm:$0xff] }
 0x9ca   : > { %v7723_v55 = vmax.f32 %v7707_v45, 0.0  ;;  %v7705_v34 = vadd.f32 %v7656_v62, %v7499_v61  ;;  %v7097_v29 = vadd.f32 %v12448_v48, %v6891_v28  ;;  %v7095_v11 = vadd.f32 %v12450_v15, %v6889_v8  ;;  %v7482_v62 = vpop.f32.mrf.mxu0  ;;  %v7768_v48 = vld [vmem:[%s12454_s9 + $0x60] sm:$0xff] }
 0x9cb   : > { %v9823_v27 = vpop.f32.mrf.mxu1  ;;  %v7508_v61 = vadd.f32 %v9803_v26, %v7302_v56 }
 0x9cc   : > { %v12082_v43 = vpack.c.bf16 %v7723_v55, %v7722_v12  ;;  %v7721_v59 = vmax.f32 %v7705_v34, 0.0  ;;  %v7710_v35 = vadd.f32 %v9823_v27, %v7504_v25  ;;  %v7303_v33 = vadd.f32 %v12452_v17, %v7097_v29 }
 0x9cd   : > { %v7669_v19 = vpop.f32.mrf.mxu1  ;;  %v7301_v23 = vadd.f32 %v12453_v49, %v7095_v11  ;;  %v7506_v12 = vadd.f32 %v7479_v47, %v7300_v7  ;;  %v10018_v47 = vld [vmem:[%s12229_s18 + $0x8] sm:$0xff]   ;;  %v7766_v11 = vld [vmem:[%s12454_s9 + $0x50] sm:$0xff] }
 0x9ce   : > { %v7750_v18 = vpack.c.bf16 %v7721_v59, %v7720_v63  ;;  %v7708_v24 = vadd.f32 %v7669_v19, %v7502_v46  ;;  %v7726_v9 = vmax.f32 %v7710_v35, 0.0  ;;  %v7509_v55 = vadd.f32 %v9804_v37, %v7303_v33  ;;  %v10019_v19 = vld [vmem:[%s12229_s18 + $0x10] sm:$0xff]   ;;  %v7769_v37 = vld [vmem:[%s12454_s9 + $0x68] sm:$0xff] }
 0x9cf   : > { %v9824_v32 = vpop.f32.mrf.mxu1  ;;  %v7507_v1 = vadd.f32 %v7482_v62, %v7301_v23  ;;  %v10023_v46 = vld [vmem:[%s12229_s18 + $0x30] sm:$0xff]   ;;  %v7765_v33 = vld [vmem:[%s12454_s9 + $0x48] sm:$0xff]  ;;  %v7763_v62 = vld [vmem:[%s12454_s9 + $0x38] sm:$0xff] }
 0x9d0   : > { %v7711_v57 = vadd.f32 %v9824_v32, %v7505_v58  ;;  %v7724_v51 = vmax.f32 %v7708_v24, 0.0  ;;  %v10024_v58 = vld [vmem:[%s12229_s18 + $0x38] sm:$0xff]  }
 0x9d1   : > { %v7672_v50 = vpop.f32.mrf.mxu1 }
 0x9d2   : > { %v7727_v40 = vmax.f32 %v7711_v57, 0.0  ;;  %v7709_v53 = vadd.f32 %v7672_v50, %v7503_v0  ;;  %v7770_v57 = vld [vmem:[%s12454_s9 + $0x70] sm:$0xff] }
 0x9d3   : > { %v9827_v31 = vpop.f32.mrf.mxu1 }
 0x9d4   : > { %v7753_v45 = vpack.c.bf16 %v7727_v40, %v7726_v9  ;;  %v7725_v5 = vmax.f32 %v7709_v53, 0.0  ;;  %v7714_v3 = vadd.f32 %v9827_v31, %v7508_v61 }
 0x9d5   : > { %v7685_v2 = vpop.f32.mrf.mxu1 }
 0x9d6   : > { %v7752_v34 = vpack.c.bf16 %v7725_v5, %v7724_v51  ;;  %v7712_v60 = vadd.f32 %v7685_v2, %v7506_v12  ;;  %v7730_v63 = vmax.f32 %v7714_v3, 0.0  ;;  %v7764_v51 = vld [vmem:[%s12454_s9 + $0x40] sm:$0xff] }
 0x9d7   : > { %v9828_v54 = vpop.f32.mrf.mxu1 }
 0x9d8   : > { %v7715_v27 = vadd.f32 %v9828_v54, %v7509_v55  ;;  %v7728_v26 = vmax.f32 %v7712_v60, 0.0  ;;  %v7762_v55 = vld [vmem:[%s12454_s9 + $0x30] sm:$0xff] }
 0x9d9   : > { %v7688_v25 = vpop.f32.mrf.mxu1 }
 0x9da   : > { %v7731_v59 = vmax.f32 %v7715_v27, 0.0  ;;  %v7713_v20 = vadd.f32 %v7688_v25, %v7507_v1  ;;  %v7761_v1 = vld [vmem:[%s12454_s9 + $0x28] sm:$0xff]  ;;  %v7760_v25 = vld [vmem:[%s12454_s9 + $0x20] sm:$0xff] }
 0x9dc   : > { %v7755_v14 = vpack.c.bf16 %v7731_v59, %v7730_v63  ;;  %v7729_v13 = vmax.f32 %v7713_v20, 0.0 }
 0x9de   : > { %v7754_v36 = vpack.c.bf16 %v7729_v13, %v7728_v26  ;;  %9829 = vmatprep.subr.bf16.mxu0 %v7755_v14  ;;  %v7759_v26 = vld [vmem:[%s12454_s9 + $0x18] sm:$0xff] }
 0x9df   : > { %9830 = vmatpush3.bf16.msra.mxu0 %v7755_v14 }
 0x9e0   : > { %9831 = vmatprep.subr.bf16.mxu0 %v7754_v36 }
 0x9e3   : > { %9832 = vmatpush3.bf16.msra.mxu0 %v7754_v36  ;;  %v7758_v36 = vld [vmem:[%s12454_s9 + $0x10] sm:$0xff] }
 0x9e4   : > { %9833 = vmatprep.subr.bf16.mxu0 %v7753_v45 }
 0x9e7   : > { %9834 = vmatpush3.bf16.msra.mxu0 %v7753_v45  ;;  %v12455_v45 = vmov 0.0  }
 0x9e8   : > { %9835 = vmatprep.subr.bf16.mxu0 %v7752_v34 }
 0x9eb   : > { %9836 = vmatpush3.bf16.msra.mxu0 %v7752_v34 }
 0x9ec   : > { %9837 = vmatprep.subr.bf16.mxu0 %v12082_v43 }
 0x9ef   : > { %9838 = vmatpush3.bf16.msra.mxu0 %v12082_v43  ;;  %v10020_v43 = vld [vmem:[%s12229_s18 + $0x18] sm:$0xff]  }
 0x9f0   : > { %9839 = vmatprep.subr.bf16.mxu0 %v7750_v18 }
 0x9f3   : > { %9840 = vmatpush3.bf16.msra.mxu0 %v7750_v18 }
 0x9f4   : > { %9841 = vmatprep.subr.bf16.mxu0 %v12066_v4 }
 0x9f7   : > { %9842 = vmatpush3.bf16.msra.mxu0 %v12066_v4  ;;  %v10021_v4 = vld [vmem:[%s12229_s18 + $0x20] sm:$0xff]  }
 0x9f8   : > { %9843 = vmatprep.subr.bf16.mxu0 %v12068_v52 }
 0x9fb   : > { %9844 = vmatpush3.bf16.msra.mxu0 %v12068_v52  ;;  %v10022_v52 = vld [vmem:[%s12229_s18 + $0x28] sm:$0xff]  }
 0x9fe   : > { %9846 = vmatmul.mubr.bf16.vlgmr.msra.gmra.mxu0 %v10018_v47 }
 0x9ff   : > { %9849 = vmatprep.mubr.bf16.mxu0 %v10019_v19 }
 0xa06   : > { %9850 = vmatmul.mubr.bf16.gmra.mxu0 %v10020_v43 }
 0xa07   : > { %9853 = vmatprep.mubr.bf16.mxu0 %v10021_v4  ;;  %v7757_v4 = vld [vmem:[%s12454_s9 + $0x8] sm:$0xff] }
 0xa0e   : > { %9854 = vmatmul.mubr.bf16.gmra.mxu0 %v10022_v52 }
 0xa0f   : > { %9857 = vmatprep.mubr.bf16.mxu0 %v10023_v46 }
 0xa16   : > { %9858 = vmatmul.mubr.bf16.gmra.mxu0 %v10024_v58  ;;  %v7756_v58 = vld [vmem:[%s12454_s9] sm:$0xff] }
 0xabe   : > { %v12129_v18 = vpop.f32.mrf.mxu0 }
 0xabf   : > { %v7863_v52 = vadd.f32 %v12129_v18, %v7758_v36 }
 0xac0   : > { %v12131_v35 = vpop.f32.mrf.mxu0 }
 0xac2   : > { %v9848_v6 = vpop.f32.mrf.mxu0 }
 0xac3   : > { %v7866_v47 = vadd.f32 %v9848_v6, %v7759_v26 }
 0xac4   : > { %v12133_v38 = vpop.f32.mrf.mxu0 }
 0xac6   : > { %v9851_v44 = vpop.f32.mrf.mxu0 }
 0xac7   : > { %v7879_v60 = vadd.f32 %v9851_v44, %v7762_v55  ;;  %v7920_v44 = vmax.f32 %v7866_v47, 0.0 }
 0xac8   : > { %v7870_v21 = vpop.f32.mrf.mxu0 }
 0xac9   : > { %v7923_v14 = vmax.f32 %v7879_v60, 0.0  ;;  %v7871_v13 = vadd.f32 %v7870_v21, %v7760_v25  ;;  %v7858_v21 = vadd.f32 %v12133_v38, %v7757_v4  ;;  %v7933_v38 = vld [vmem:[%s12231_s20] sm:$0x3] }
 0xaca   : > { %v9852_v28 = vpop.f32.mrf.mxu0 }
 0xacb   : > { %v7882_v34 = vadd.f32 %v9852_v28, %v7763_v62  ;;  %v7921_v46 = vmax.f32 %v7871_v13, 0.0  ;;  %v7919_v28 = vmax.f32 %v7863_v52, 0.0  ;;  %v7918_v18 = vmax.f32 %v7858_v21, 0.0 }
 0xacc   : > { %v7873_v32 = vpop.f32.mrf.mxu0 }
 0xacd   : > { %v7924_v63 = vmax.f32 %v7882_v34, 0.0  ;;  %v7874_v59 = vadd.f32 %v7873_v32, %v7761_v1  ;;  %v7855_v32 = vadd.f32 %v12131_v35, %v7756_v58  ;;  %v7942_v35 = vld [vmem:[%s12232_s21] sm:$0xf] }
 0xace   : > { %v9855_v16 = vpop.f32.mrf.mxu0 }
 0xacf   : > { %v7895_v31 = vadd.f32 %v9855_v16, %v7766_v11  ;;  %v7937_v19 = vpack.c.bf16 %v7924_v63, %v7923_v14  ;;  %v7922_v43 = vmax.f32 %v7874_v59, 0.0  ;;  %v7935_v16 = vpack.c.bf16 %v7920_v44, %v7919_v28 }
 0xad0   : > { %v7886_v22 = vpop.f32.mrf.mxu0 }
 0xad1   : > { %v7927_v2 = vmax.f32 %v7895_v31, 0.0  ;;  %v7887_v12 = vadd.f32 %v7886_v22, %v7764_v51  ;;  %v7936_v6 = vpack.c.bf16 %v7922_v43, %v7921_v46  ;;  %v7917_v22 = vmax.f32 %v7855_v32, 0.0 }
 0xad2   : > { %v9856_v0 = vpop.f32.mrf.mxu0 }
 0xad3   : > { %v7898_v30 = vadd.f32 %v9856_v0, %v7767_v10  ;;  %v7925_v27 = vmax.f32 %v7887_v12, 0.0  ;;  %v7934_v0 = vpack.c.bf16 %v7918_v18, %v7917_v22 }
 0xad4   : > { %v7889_v24 = vpop.f32.mrf.mxu0 }
 0xad5   : > { %v7928_v5 = vmax.f32 %v7898_v30, 0.0  ;;  %v7890_v49 = vadd.f32 %v7889_v24, %v7765_v33 }
 0xad6   : > { %v9859_v41 = vpop.f32.mrf.mxu0 }
 0xad7   : > { %v7911_v39 = vadd.f32 %v9859_v41, %v7770_v57  ;;  %v7939_v3 = vpack.c.bf16 %v7928_v5, %v7927_v2  ;;  %v7926_v54 = vmax.f32 %v7890_v49, 0.0 }
 0xad8   : > { %v7902_v8 = vpop.f32.mrf.mxu0 }
 0xad9   : > { %v7931_v9 = vmax.f32 %v7911_v39, 0.0  ;;  %v7903_v40 = vadd.f32 %v7902_v8, %v7768_v48  ;;  %v7938_v20 = vpack.c.bf16 %v7926_v54, %v7925_v27 }
 0xada   : > { %v9860_v29 = vpop.f32.mrf.mxu0 }
 0xadb   : > { %v7914_v50 = vadd.f32 %v9860_v29, %v7771_v42  ;;  %v7929_v61 = vmax.f32 %v7903_v40, 0.0  ;;  %v12456_v42 = vld [vmem:[#allocation9_spill] sm:$0xff] }
 0xadc   : > { %v7905_v56 = vpop.f32.mrf.mxu0 }
 0xadd   : > { %v7932_v53 = vmax.f32 %v7914_v50, 0.0  ;;  %v7906_v15 = vadd.f32 %v7905_v56, %v7769_v37 }
 0xadf   : > { %v7941_v7 = vpack.c.bf16 %v7932_v53, %v7931_v9  ;;  %v7930_v17 = vmax.f32 %v7906_v15, 0.0 }
 0xae1   : > { %9862 = vmatpush3.bf16.msra.mxu1 %v7941_v7  ;;  %v7940_v23 = vpack.c.bf16 %v7930_v17, %v7929_v61 }
 0xae2   : > { %9863 = vmatprep.subr.bf16.mxu1 %v12455_v45 }
 0xae5   : > { %9864 = vmatpush3.bf16.msra.mxu1 %v7940_v23 }
 0xae6   : > { %9865 = vmatprep.subr.bf16.mxu1 %v12455_v45 }
 0xae9   : > { %9866 = vmatpush3.bf16.msra.mxu1 %v7939_v3 }
 0xaea   : > { %9867 = vmatprep.subr.bf16.mxu1 %v12455_v45 }
 0xaed   : > { %9868 = vmatpush3.bf16.msra.mxu1 %v7938_v20 }
 0xaee   : > { %9869 = vmatprep.subr.bf16.mxu1 %v12455_v45 }
 0xaf1   : > { %9870 = vmatpush3.bf16.msra.mxu1 %v7937_v19 }
 0xaf2   : > { %9871 = vmatprep.subr.bf16.mxu1 %v12455_v45 }
 0xaf5   : > { %9872 = vmatpush3.bf16.msra.mxu1 %v7936_v6 }
 0xaf6   : > { %9873 = vmatprep.subr.bf16.mxu1 %v12455_v45 }
 0xaf9   : > { %9874 = vmatpush3.bf16.msra.mxu1 %v7935_v16 }
 0xafa   : > { %9875 = vmatprep.subr.bf16.mxu1 %v12455_v45 }
 0xafd   : > { %9876 = vmatpush3.bf16.msra.mxu1 %v7934_v0 }
 0xafe   : > { %9881 = vmatprep.subr.mxu1 %v12455_v45 }
 0xb00   : > { %9878 = vmatmul.mubr.bf16.vlgmr.msra.gmra.mxu1 %v7933_v38 }
 0xb01   : > { %9883 = vmatprep.mubr.msk.f32.mxu1 %vm10190_vm5, %v12455_v45 }
 0xbc0   : > { %v7977_v24 = vpop.f32.mrf.mxu1 }
 0xbc1   : > { %v7978_v57 = vadd.f32 %v7977_v24, %v7942_v35 }
 0xbc2   : > { %v9879_v41 = vpop.f32.mrf.mxu1 }
 0xbc3   : > { %9882 = vmatpush3.msk.msra.mxu1 %vm978_vm2, %v7978_v57 }
 0xbc4   : > { %v7980_v8 = vpop.f32.mrf.mxu1  ;;  %9884 = vmatmul.mubr.msk.f32.vlgmr.msra.gmra.mxu1 %vm2809_vm6, %v12456_v42 }
 0xbc6   : > { %v9880_v39 = vpop.f32.mrf.mxu1 }
 0xc84   : > { %v8055_v48 = vpop.f32.mrf.mxu1 }
 0xc85   : > { %8060 = vst.msk [vmem:[%s743_s3] sm:$0x1] %vm8059_vm14, %v8055_v48 }
 0xc86   : > { %v9885_v29 = vpop.f32.mrf.mxu1 }
 0xc87 PF: > { %s45_s1 = sadd.s32 1, %s10185_s1  }
 0xc88   : > { %p42_p1 = scmp.ge.s32.totalorder %s45_s1, 8  }
 0xc8a   :  { %44 = sbr.rel (!%p42_p1) target bundleno = 42 (0x2a), region = 202 }

</bundles_post_ra>
